<compile_context>
chip_gen: v6e
topology: v6e:2x2x1
jax: 0.10.0
libtpu: 0.0.40
codegen_flags: <defaults>
</compile_context>

<pallas_src>
import functools

import jax
import jax.numpy as jnp
from jax.experimental import pallas as pl
from jax.experimental.pallas import tpu as pltpu


def _round_up(n, m):
    return ((n + m - 1) // m) * m


def _mlp_kernel(x_ref, w1_ref, b1_ref, w2_ref, b2_ref, w3_ref, b3_ref, o_ref):
    # In-kernel f32 -> bf16 cast of the activations (VPU, hidden under the MXU).
    x = x_ref[...].astype(jnp.bfloat16)
    # Layer 1: (bb, 784) @ (784, 512) on the MXU — bf16 operands, f32 accumulate.
    h1 = jnp.dot(x, w1_ref[...], preferred_element_type=jnp.float32)
    h1 = jnp.maximum(h1 + b1_ref[...], 0.0)           # bias + ReLU in f32 (VPU)
    # Layer 2: (bb, 512) @ (512, 256).
    h2 = jnp.dot(h1.astype(jnp.bfloat16), w2_ref[...],
                 preferred_element_type=jnp.float32)
    h2 = jnp.maximum(h2 + b2_ref[...], 0.0)
    # Layer 3: (bb, 256) @ (256, 128) — classes lane-padded to 128, no activation.
    out = jnp.dot(h2.astype(jnp.bfloat16), w3_ref[...],
                  preferred_element_type=jnp.float32)
    o_ref[...] = (out + b3_ref[...]).astype(o_ref.dtype)


def prepare_mlp_params(w1, b1, w2, b2, w3, b3):
    """One-time (un-jitted) weight prep: bf16 cast + lane-pad classes to 128.

    Weights are stored as (in_features, out_features) == W.T vs. PyTorch layout.
    """
    C = w3.shape[1]
    C_pad = _round_up(max(C, 128), 128)
    bf16, f32 = jnp.bfloat16, jnp.float32
    w1_p = w1.astype(bf16)                                           # (784, 512)
    w2_p = w2.astype(bf16)                                           # (512, 256)
    w3_p = jnp.zeros((w3.shape[0], C_pad), bf16).at[:, :C].set(w3.astype(bf16))
    b1_p = b1.reshape(1, -1).astype(f32)
    b2_p = b2.reshape(1, -1).astype(f32)
    b3_p = jnp.zeros((1, C_pad), f32).at[:, :C].set(b3.reshape(1, -1).astype(f32))
    return (w1_p, b1_p, w2_p, b2_p, w3_p, b3_p)


def _pick_block_b(B, block_b):
    """Batch tile: big enough to amortize per-step overhead, >=2 grid steps for
    the v7x 2-TC megacore, multiple of 16 (bf16 sublane quantum) for tiny B."""
    if B <= 128:
        return _round_up(B, 16)
    half = _round_up(pl.cdiv(B, 2), 128)
    return min(_round_up(block_b, 128), max(128, half))


@functools.partial(jax.jit, static_argnames=("classes", "block_b"))
def mlp_forward(x, params, *, classes, block_b=512):
    """x: (B, 784) f32.  params: output of prepare_mlp_params."""
    w1, b1, w2, b2, w3, b3 = params
    B, D_in = x.shape
    H1 = w1.shape[1]
    H2 = w2.shape[1]
    C_pad = w3.shape[1]

    bb = _pick_block_b(B, block_b)
    grid = (pl.cdiv(B, bb),)          # partial final block handled by Pallas

    const = pl.Buffered(1)            # weights/biases never change across steps
    in_specs = [
        pl.BlockSpec((bb, D_in), lambda i: (i, 0)),                         # x (f32)
        pl.BlockSpec((D_in, H1), lambda i: (0, 0), pipeline_mode=const),    # w1
        pl.BlockSpec((1, H1), lambda i: (0, 0), pipeline_mode=const),       # b1
        pl.BlockSpec((H1, H2), lambda i: (0, 0), pipeline_mode=const),      # w2
        pl.BlockSpec((1, H2), lambda i: (0, 0), pipeline_mode=const),       # b2
        pl.BlockSpec((H2, C_pad), lambda i: (0, 0), pipeline_mode=const),   # w3
        pl.BlockSpec((1, C_pad), lambda i: (0, 0), pipeline_mode=const),    # b3
    ]
    out_spec = pl.BlockSpec((bb, C_pad), lambda i: (i, 0))

    flops = 2 * B * (D_in * H1 + H1 * H2 + H2 * C_pad)
    bytes_accessed = (
        B * D_in * 4                                  # x (f32)
        + (D_in * H1 + H1 * H2 + H2 * C_pad) * 2      # bf16 weights
        + (H1 + H2 + C_pad) * 4                       # f32 biases
        + B * C_pad * 4                               # output (f32)
    )

    out = pl.pallas_call(
        _mlp_kernel,
        out_shape=jax.ShapeDtypeStruct((B, C_pad), jnp.float32),
        grid_spec=pltpu.PrefetchScalarGridSpec(
            num_scalar_prefetch=0,
            grid=grid,
            in_specs=in_specs,
            out_specs=out_spec,
        ),
        compiler_params=pltpu.CompilerParams(
            dimension_semantics=("parallel",),   # batch grid shards across TCs (v7x)
        ),
        cost_estimate=pl.CostEstimate(
            flops=flops, transcendentals=0, bytes_accessed=bytes_accessed),
    )(x, w1, b1, w2, b2, w3, b3)

    return out[:, :classes]


def init_linear(key, fan_in, fan_out):
    """PyTorch nn.Linear default init: U(-1/sqrt(fan_in), 1/sqrt(fan_in))."""
    kw, kb = jax.random.split(key)
    bound = 1.0 / jnp.sqrt(jnp.float32(fan_in))
    # stored as (in_features, out_features) == W.T relative to PyTorch layout
    w = jax.random.uniform(kw, (fan_in, fan_out), jnp.float32, -bound, bound)
    b = jax.random.uniform(kb, (1, fan_out), jnp.float32, -bound, bound)
    return w, b


if __name__ == "__main__":
    classes = 10
    B = 200  # not a multiple of the 128-row tile: exercises the partial final block

    key = jax.random.PRNGKey(0)
    kx, k1, k2, k3 = jax.random.split(key, 4)

    x = jax.random.normal(kx, (B, 28 * 28), dtype=jnp.float32)
    w1, b1 = init_linear(k1, 28 * 28, 512)
    w2, b2 = init_linear(k2, 512, 256)
    w3, b3 = init_linear(k3, 256, classes)

    # One-time param prep (bf16 cast + lane pad), hoisted out of the forward pass.
    params = jax.block_until_ready(prepare_mlp_params(w1, b1, w2, b2, w3, b3))

    out = mlp_forward(x, params, classes=classes)
    out = jax.block_until_ready(out)
    assert out.shape == (B, classes)

    # Pure-JAX reference with the same bf16 operand rounding (f32 accumulation).
    def q(a):
        return a.astype(jnp.bfloat16).astype(jnp.float32)

    ref = jnp.maximum(q(x) @ q(w1) + b1, 0.0)
    ref = jnp.maximum(q(ref) @ q(w2) + b2, 0.0)
    ref = q(ref) @ q(w3) + b3
    assert jnp.allclose(out, ref, atol=1e-2, rtol=1e-2), float(
        jnp.max(jnp.abs(out - ref)))

    print("KERNEL_OK")
</pallas_src>

<mosaic_0001>
module attributes {stable_mosaic.version = 11 : i64} {
  func.func @_mlp_kernel(%arg0: i32, %arg1: memref<128x784xf32, #tpu.memory_space<vmem>>, %arg2: memref<784x512xbf16, #tpu.memory_space<vmem>>, %arg3: memref<1x512xf32, #tpu.memory_space<vmem>>, %arg4: memref<512x256xbf16, #tpu.memory_space<vmem>>, %arg5: memref<1x256xf32, #tpu.memory_space<vmem>>, %arg6: memref<256x128xbf16, #tpu.memory_space<vmem>>, %arg7: memref<1x128xf32, #tpu.memory_space<vmem>>, %arg8: memref<128x128xf32, #tpu.memory_space<vmem>>) attributes {dimension_semantics = [#tpu.dimension_semantics<parallel>], iteration_bounds = array<i64: 2>, scalar_prefetch = 0 : i64, scratch_operands = 0 : i64, tpu.core_type = #tpu.core_type<tc>, window_params = [{transform_indices = @transform_0, window_bounds = array<i64: 128, 784>}, {pipeline_mode = #tpu.pipeline_mode<synchronous>, transform_indices = @transform_1, window_bounds = array<i64: 784, 512>}, {pipeline_mode = #tpu.pipeline_mode<synchronous>, transform_indices = @transform_2, window_bounds = array<i64: 1, 512>}, {pipeline_mode = #tpu.pipeline_mode<synchronous>, transform_indices = @transform_3, window_bounds = array<i64: 512, 256>}, {pipeline_mode = #tpu.pipeline_mode<synchronous>, transform_indices = @transform_4, window_bounds = array<i64: 1, 256>}, {pipeline_mode = #tpu.pipeline_mode<synchronous>, transform_indices = @transform_5, window_bounds = array<i64: 256, 128>}, {pipeline_mode = #tpu.pipeline_mode<synchronous>, transform_indices = @transform_6, window_bounds = array<i64: 1, 128>}, {transform_indices = @transform_7, window_bounds = array<i64: 128, 128>}]} {
    %c0 = arith.constant 0 : index
    %c0_0 = arith.constant 0 : index
    %0 = vector.load %arg1[%c0, %c0_0] : memref<128x784xf32, #tpu.memory_space<vmem>>, vector<128x784xf32>
    %1 = arith.truncf %0 : vector<128x784xf32> to vector<128x784xbf16>
    %c0_1 = arith.constant 0 : index
    %c0_2 = arith.constant 0 : index
    %2 = vector.load %arg2[%c0_1, %c0_2] : memref<784x512xbf16, #tpu.memory_space<vmem>>, vector<784x512xbf16>
    %cst = arith.constant dense<0.000000e+00> : vector<128x512xf32>
    %3 = tpu.matmul %1, %2, %cst {dimension_numbers = #tpu.dot_dimension_numbers<[1], [0], [0], [1], [0, 0, 1, 1], [], []>} : vector<128x784xbf16>, vector<784x512xbf16>, vector<128x512xf32> -> vector<128x512xf32>
    %c0_3 = arith.constant 0 : index
    %c0_4 = arith.constant 0 : index
    %4 = vector.load %arg3[%c0_3, %c0_4] : memref<1x512xf32, #tpu.memory_space<vmem>>, vector<1x512xf32>
    %5 = vector.broadcast %4 : vector<1x512xf32> to vector<128x512xf32>
    %6 = arith.addf %3, %5 : vector<128x512xf32>
    %cst_5 = arith.constant 0.000000e+00 : f32
    %7 = vector.broadcast %cst_5 : f32 to vector<128x512xf32>
    %8 = arith.maximumf %6, %7 : vector<128x512xf32>
    %9 = arith.truncf %8 : vector<128x512xf32> to vector<128x512xbf16>
    %c0_6 = arith.constant 0 : index
    %c0_7 = arith.constant 0 : index
    %10 = vector.load %arg4[%c0_6, %c0_7] : memref<512x256xbf16, #tpu.memory_space<vmem>>, vector<512x256xbf16>
    %cst_8 = arith.constant dense<0.000000e+00> : vector<128x256xf32>
    %11 = tpu.matmul %9, %10, %cst_8 {dimension_numbers = #tpu.dot_dimension_numbers<[1], [0], [0], [1], [0, 0, 1, 1], [], []>} : vector<128x512xbf16>, vector<512x256xbf16>, vector<128x256xf32> -> vector<128x256xf32>
    %c0_9 = arith.constant 0 : index
    %c0_10 = arith.constant 0 : index
    %12 = vector.load %arg5[%c0_9, %c0_10] : memref<1x256xf32, #tpu.memory_space<vmem>>, vector<1x256xf32>
    %13 = vector.broadcast %12 : vector<1x256xf32> to vector<128x256xf32>
    %14 = arith.addf %11, %13 : vector<128x256xf32>
    %cst_11 = arith.constant 0.000000e+00 : f32
    %15 = vector.broadcast %cst_11 : f32 to vector<128x256xf32>
    %16 = arith.maximumf %14, %15 : vector<128x256xf32>
    %17 = arith.truncf %16 : vector<128x256xf32> to vector<128x256xbf16>
    %c0_12 = arith.constant 0 : index
    %c0_13 = arith.constant 0 : index
    %18 = vector.load %arg6[%c0_12, %c0_13] : memref<256x128xbf16, #tpu.memory_space<vmem>>, vector<256x128xbf16>
    %cst_14 = arith.constant dense<0.000000e+00> : vector<128x128xf32>
    %19 = tpu.matmul %17, %18, %cst_14 {dimension_numbers = #tpu.dot_dimension_numbers<[1], [0], [0], [1], [0, 0, 1, 1], [], []>} : vector<128x256xbf16>, vector<256x128xbf16>, vector<128x128xf32> -> vector<128x128xf32>
    %c0_15 = arith.constant 0 : index
    %c0_16 = arith.constant 0 : index
    %20 = vector.load %arg7[%c0_15, %c0_16] : memref<1x128xf32, #tpu.memory_space<vmem>>, vector<1x128xf32>
    %21 = vector.broadcast %20 : vector<1x128xf32> to vector<128x128xf32>
    %22 = arith.addf %19, %21 : vector<128x128xf32>
    %c0_17 = arith.constant 0 : index
    %c0_18 = arith.constant 0 : index
    %23 = vector.load %arg8[%c0_17, %c0_18] : memref<128x128xf32, #tpu.memory_space<vmem>>, vector<128x128xf32>
    tpu.vector_store %arg8[%c0_17, %c0_18], %22 {strides = array<i32>} : memref<128x128xf32, #tpu.memory_space<vmem>>, vector<128x128xf32>,
    return
  }
  func.func @transform_0(%arg0: i32) -> (i32, i32) {
    %c0_i32 = arith.constant 0 : i32
    %c0_i32_0 = arith.constant 0 : i32
    return %arg0, %c0_i32 : i32, i32
  }
  func.func @transform_1(%arg0: i32) -> (i32, i32) {
    %c0_i32 = arith.constant 0 : i32
    %c0_i32_0 = arith.constant 0 : i32
    %c0_i32_1 = arith.constant 0 : i32
    return %c0_i32, %c0_i32_0 : i32, i32
  }
  func.func @transform_2(%arg0: i32) -> (i32, i32) {
    %c0_i32 = arith.constant 0 : i32
    %c0_i32_0 = arith.constant 0 : i32
    %c0_i32_1 = arith.constant 0 : i32
    return %c0_i32, %c0_i32_0 : i32, i32
  }
  func.func @transform_3(%arg0: i32) -> (i32, i32) {
    %c0_i32 = arith.constant 0 : i32
    %c0_i32_0 = arith.constant 0 : i32
    %c0_i32_1 = arith.constant 0 : i32
    return %c0_i32, %c0_i32_0 : i32, i32
  }
  func.func @transform_4(%arg0: i32) -> (i32, i32) {
    %c0_i32 = arith.constant 0 : i32
    %c0_i32_0 = arith.constant 0 : i32
    %c0_i32_1 = arith.constant 0 : i32
    return %c0_i32, %c0_i32_0 : i32, i32
  }
  func.func @transform_5(%arg0: i32) -> (i32, i32) {
    %c0_i32 = arith.constant 0 : i32
    %c0_i32_0 = arith.constant 0 : i32
    %c0_i32_1 = arith.constant 0 : i32
    return %c0_i32, %c0_i32_0 : i32, i32
  }
  func.func @transform_6(%arg0: i32) -> (i32, i32) {
    %c0_i32 = arith.constant 0 : i32
    %c0_i32_0 = arith.constant 0 : i32
    %c0_i32_1 = arith.constant 0 : i32
    return %c0_i32, %c0_i32_0 : i32, i32
  }
  func.func @transform_7(%arg0: i32) -> (i32, i32) {
    %c0_i32 = arith.constant 0 : i32
    %c0_i32_0 = arith.constant 0 : i32
    return %arg0, %c0_i32 : i32, i32
  }
}

</mosaic_0001>

<bundles_post_ra>
// kernel: mlp_forward.1
= control target key start
LH: loop header
LB: loop body
LE: loop exit
PB: predicated region body
PF: predicated region fallthrough
CT: control target
= control target key end

     0   :  { %12 = vsyncpa [#allocation3], 0  ;;  %s6387_s0 = inlined_call_operand.hbm [shape: f32[200,784], index: 0, kind: input, shape index: {}]   ;;  %s6388_s1 = inlined_call_operand.hbm [shape: bf16[784,512], index: 1, kind: input, shape index: {}]   ;;  %s6389_s2 = inlined_call_operand.hbm [shape: f32[1,512], index: 2, kind: input, shape index: {}]   ;;  %s6390_s3 = inlined_call_operand.hbm [shape: bf16[512,256], index: 3, kind: input, shape index: {}]   ;;  %s6391_s4 = inlined_call_operand.vmem [shape: f32[1,256], index: 4, kind: input, shape index: {}]   ;;  %s6392_s5 = inlined_call_operand.hbm [shape: bf16[256,128], index: 5, kind: input, shape index: {}]   ;;  %s6393_s6 = inlined_call_operand.vmem [shape: f32[1,128], index: 6, kind: input, shape index: {}]   ;;  %s6394_s7 = inlined_call_operand.vmem [shape: f32[200,128], index: 7, kind: output, shape index: {}]  }
   0x1   :  { %14 = vsyncpa [#allocation3 + $0x1], 0 }
   0x2   :  { %15 = vsyncpa [#allocation5], 0 }
   0x3   :  { %16 = vsyncpa [#allocation8], 0  ;;  %s5264_s24 = smov 0   ;;  %s5266_s25 = smov 0  }
   0x4   :  { %s5268_s26 = smov 0   ;;  %s5270_s27 = smov 0  }
   0x5 LB: > { %s5283_s28 = sadd.s32 4294967295, %s5176_s27   ;;  %s5286_s29 = sadd.s32 1, %s5176_s27   ;;  %s5176_s27 = sphi %s5270_s27, %s6486_s27   ;;  %s5172_s26 = sphi %s5268_s26, %s6485_s26   ;;  %s5168_s25 = sphi %s5266_s25, %s6484_s25   ;;  %s5164_s24 = sphi %s5264_s24, %s6483_s24  }
   0x6   : > { %s26_s30 = ssub.s32 %s5176_s27, %s5286_s29  ;;  %s29_s8 = sadd.s32 1, %s5172_s26 }
   0x7   : > { %p27_p0 = scmp.eq.s32.totalorder %s26_s30, 0  ;;  %p36_p1 = scmp.ne.s32.totalorder %s5172_s26, %s5168_s25 }
   0x8   : > { %p37_p2 = scmp.eq.s32.totalorder %s5176_s27, 0  ;;  %p42_p3 = scmp.ne.s32.totalorder %s5168_s25, %s5164_s24 }
   0x9   : > { %s5296_s9 = scalar_select %p27_p0, %s5172_s26, %s29_s8  }
   0xa   : > { %p5298_p4 = por %p37_p2, %p36_p1  ;;  %p6395_p5 = scmp.eq.s32.totalorder %s5283_s28, 0 }
   0xb   : > { %p192_p6 = scmp.eq.s32.totalorder %s5283_s28, 1  ;;  %p4004_p7 = scmp.ge.s32.totalorder %s5176_s27, 1 }
   0xc   : > { %s6417_s10 = scalar_select %p5298_p4, 1, 0 }
   0xd   : > { %p5307_p8 = por %p6395_p5, %p42_p3  ;;  %p205_p9 = scmp.lt.s32.totalorder %s5176_s27, 3 }
   0xe   : > { %p5312_p10 = por %p192_p6, %p36_p1  ;;  %s5210_s14 = smov [#allocation4]  }
   0xf   : > { %s6418_s11 = scalar_select %p5307_p8, 1, 0 }
  0x10   : > { %s6419_s12 = scalar_select %p5312_p10, 1, 0 }
  0x11   : > { %p5316_p11 = pnand %p4004_p7, %p205_p9  ;;  %s217_s15 = sshll.u32 %s5210_s14, 4  ;;  %s218_s15 = int_to_ptr.vmem [resolvable:$true] %s217_s15 }
  0x12   : > { %s5211_s17 = smov [#allocation7]   ;;  %s4983_s19 = scalar_lea.vmem %s218_s15, 25088 }
  0x13   : > { %s6420_s13 = scalar_select %p5316_p11, 1, 0 }
  0x14   : > { %p4436_p12 = pneg %p5316_p11  ;;  %s241_s18 = sshll.u32 %s5211_s17, 4  ;;  %s242_s18 = int_to_ptr.vmem [resolvable:$true] %s241_s18 }
  0x15   : > { %p4984_p1 = scmp.ne.s32.totalorder %s218_s15, %s4983_s19  ;;  %p4991_p6 = scmp.lt.s32.totalorder %s218_s15, %s218_s15 }
  0x16   : > { %p5324_p13 = pnand %p4436_p12, %p6395_p5  ;;  %p4992_p7 = scmp.lt.s32.totalorder %s4983_s19, %s4983_s19 }
  0x18   : > { %p4974_p0 = pneg %p5324_p13  ;;  %p4993_p9 = por %p4992_p7, %p4991_p6 }
  0x1a   : > { %p4986_p2 = pnand %p4984_p1, %p4974_p0 }
  0x1c   : > { %p4987_p3 = pneg %p4986_p2 }
  0x1e   : > { %p4994_p12 = pnand %p4993_p9, %p4987_p3 }
  0x20   : > { %4997 = shalt.err (!%p4994_p12)
}
  0x21   : > { %s5212_s20 = smov 256   ;;  %s5213_s21 = smov 16  }
  0x22   : > { %4439 = dma.hbm_to_vmem [thread:$0]  (!%p5324_p13), %s6388_s1, 25088, %s218_s15, [#allocation5], %s5212_s20, %s5212_s20, %s5213_s21  }
  0x23   : > { %s5009_s24 = scalar_lea.vmem %s242_s18, 8192  ;;  %p5017_p10 = scmp.lt.s32.totalorder %s242_s18, %s242_s18 }
  0x24   : > { %p5010_p5 = scmp.ne.s32.totalorder %s242_s18, %s5009_s24  ;;  %p5018_p8 = scmp.lt.s32.totalorder %s5009_s24, %s5009_s24 }
  0x26   : > { %p5012_p1 = pnand %p5010_p5, %p4974_p0  ;;  %p5019_p6 = por %p5018_p8, %p5017_p10 }
  0x28   : > { %p5013_p2 = pneg %p5012_p1 }
  0x2a   : > { %p5020_p3 = pnand %p5019_p6, %p5013_p2 }
  0x2c   : > { %5023 = shalt.err (!%p5020_p3)
}
  0x2d   : > { %s5214_s30 = smov 128   ;;  %s5215_s8 = smov 8  }
  0x2e   : > { %4445 = dma.hbm_to_vmem [thread:$0]  (!%p5324_p13), %s6390_s3, 8192, %s242_s18, [#allocation8], %s5214_s30, %s5214_s30, %s5215_s8  }
  0x2f   : > { %s5216_s15 = smov [#allocation6]   ;;  %s5217_s20 = smov [#allocation9]  }
  0x30   : > { %s231_s19 = sshll.u32 %s5216_s15, 4  ;;  %s257_s21 = sshll.u32 %s5217_s20, 4  ;;  %s232_s19 = int_to_ptr.vmem [resolvable:$true] %s231_s19  ;;  %s258_s21 = int_to_ptr.vmem [resolvable:$true] %s257_s21 }
  0x31   : > { %s5035_s22 = scalar_lea.vmem %s232_s19, 64  ;;  %p5043_p7 = scmp.lt.s32.totalorder %s232_s19, %s232_s19 }
  0x32   : > { %p5036_p5 = scmp.ne.s32.totalorder %s232_s19, %s5035_s22  ;;  %p5044_p9 = scmp.lt.s32.totalorder %s5035_s22, %s5035_s22 }
  0x34   : > { %p5038_p8 = pnand %p5036_p5, %p4974_p0  ;;  %p5045_p12 = por %p5044_p9, %p5043_p7 }
  0x36   : > { %p5039_p10 = pneg %p5038_p8 }
  0x38   : > { %p5046_p1 = pnand %p5045_p12, %p5039_p10 }
  0x3a   : > { %5049 = shalt.err (!%p5046_p1)
}
  0x3b   : > { %4442 = dma.hbm_to_vmem [thread:$0]  (!%p5324_p13), %s6389_s2, 64, %s232_s19, [#allocation5]  }
  0x3c   : > { %s5061_s24 = scalar_lea.vmem %s258_s21, 2048  ;;  %p5069_p5 = scmp.lt.s32.totalorder %s258_s21, %s258_s21 }
  0x3d   : > { %p5062_p2 = scmp.ne.s32.totalorder %s258_s21, %s5061_s24  ;;  %p5070_p8 = scmp.lt.s32.totalorder %s5061_s24, %s5061_s24 }
  0x3f   : > { %p5064_p6 = pnand %p5062_p2, %p4974_p0  ;;  %p5071_p11 = por %p5070_p8, %p5069_p5 }
  0x41   : > { %p5065_p3 = pneg %p5064_p6 }
  0x43   : > { %p5072_p4 = pnand %p5071_p11, %p5065_p3 }
  0x45   : > { %5075 = shalt.err (!%p5072_p4)
}
  0x46   : > { %s5218_s30 = smov 64   ;;  %s5219_s8 = smov 4  }
  0x47   : > { %4448 = dma.hbm_to_vmem [thread:$0]  (!%p5324_p13), %s6392_s5, 2048, %s258_s21, [#allocation8], %s5218_s30, %s5218_s30, %s5219_s8  }
  0x48   : > { %p4009_p10 = scmp.ge.s32.totalorder %s5176_s27, 2 }
  0x49   : > { %p6422_p7 = scmp.ne.s32.totalorder (!%p4009_p10), %s6417_s10, 0 }
  0x4a   : > { %270 = sbr.rel (%p4009_p10) target bundleno = 113 (0x71), region = 40 }
  0x4f   : > { %273 = sbr.rel (!%p6422_p7) target bundleno = 113 (0x71), region = 44  ;;  %s274_s15 = sand.u32 (%p6422_p7), 1, %s5172_s26  }
  0x50   : > { %s4010_s19 = sshll.u32 (%p6422_p7), %s5176_s27, 4  ;;  %s4416_s20 = smul.u32 (%p6422_p7), 896, %s274_s15 }
  0x51   : > { %s280_s22 = ssub.s32 (%p6422_p7), 25, %s4010_s19  ;;  %s5370_s23 = scalar_lea.sflag (%p6422_p7), [#allocation3], %s274_s15 }
  0x52   : > { %p281_p4 = scmp.lt.s32.totalorder (%p6422_p7), %s280_s22, 16  ;;  %s278_s21 = scalar_lea.vmem (%p6422_p7), [#allocation2], %s4416_s20 }
  0x54   : > { %s6488_s22 = smov (!%p281_p4, %s280_s22), 16 }
  0x55   : > { %s5367_s18 = smul.u32 896, %s6488_s22 }
  0x57   : > { %s286_s16 = ssub.s32 14336, %s5367_s18 }
  0x58   : > { %287 = vsyncadd %s5370_s23, %s286_s16  ;;  %p4013_p11 = scmp.ne.s32.totalorder %s5367_s18, 0  ;;  %s4417_s10 = smul.u32 14336, %s5176_s27 }
  0x59   : > { %s293_s24 = sshll.u32 %s278_s21, 4  ;;  %s5080_s27 = scalar_lea.hbm %s6387_s0, 22400  ;;  %s5380_s24 = int_to_ptr.vmem [resolvable:$true] %s293_s24 }
  0x5a   : > { %s5378_s14 = scalar_lea.hbm %s6387_s0, %s4417_s10 }
  0x5b   : > { %s5076_s17 = scalar_lea.hbm %s5378_s14, %s5367_s18  ;;  %p5081_p12 = scmp.lt.s32.totalorder %s5378_s14, %s6387_s0 }
  0x5c   : > { %p5077_p13 = scmp.ne.s32.totalorder %s5378_s14, %s5076_s17  ;;  %p5082_p1 = scmp.lt.s32.totalorder %s5080_s27, %s5076_s17 }
  0x5e   : > { %p5078_p0 = pnand %p5077_p13, %p4013_p11  ;;  %p5083_p2 = por %p5082_p1, %p5081_p12 }
  0x60   : > { %p5079_p9 = pneg %p5078_p0 }
  0x62   : > { %p5084_p6 = pnand %p5083_p2, %p5079_p9 }
  0x64   : > { %5087 = shalt.err (!%p5084_p6)
}
  0x65   : > { %s5088_s16 = scalar_lea.vmem %s5380_s24, %s5367_s18  ;;  %s5220_s21 = smov [#allocation2]  }
  0x66   : > { %p5089_p3 = scmp.ne.s32.totalorder %s5380_s24, %s5088_s16  ;;  %s5092_s10 = sshll.u32 %s5220_s21, 4  ;;  %s5093_s10 = int_to_ptr.vmem [resolvable:$false] %s5092_s10 }
  0x67   : > { %s5094_s30 = scalar_lea.vmem %s5093_s10, 28672  ;;  %p5095_p10 = scmp.lt.s32.totalorder %s5380_s24, %s5093_s10 }
  0x68   : > { %p5090_p5 = pnand %p5089_p3, %p4013_p11  ;;  %p5096_p7 = scmp.lt.s32.totalorder %s5094_s30, %s5088_s16 }
  0x6a   : > { %p5091_p8 = pneg %p5090_p5  ;;  %p5097_p4 = por %p5096_p7, %p5095_p10 }
  0x6c   : > { %p5098_p13 = pnand %p5097_p4, %p5091_p8 }
  0x6e   : > { %5101 = shalt.err (!%p5098_p13)
}
  0x6f   : > { %s5221_s8 = smov 896   ;;  %s5222_s17 = smov 56  }
  0x70   : > { %299 = dma.hbm_to_vmem [thread:$0]  (%p4013_p11), %s5378_s14, %s5367_s18, %s5380_s24, %s5370_s23, %s5221_s8, %s5221_s8, %s5222_s17  }
  0x71 PF: > { %p6423_p0 = scmp.ne.s32.totalorder %s6420_s13, 0 }
  0x73   : > { %305 = sbr.rel (%p6423_p0) target bundleno = 1103 (0x44f), region = 48 }
  0x78   : > { %s5409_s15 = sand.u32 1, %s5168_s25   ;;  %p6424_p9 = scmp.ne.s32.totalorder %s6418_s11, 0 }
  0x79   : > { %s4418_s19 = smul.u32 896, %s5409_s15  ;;  %s308_s27 = scalar_lea.sflag [#allocation3], %s5409_s15 }
  0x7b   : > { %s5413_s20 = scalar_lea.vmem [#allocation2], %s4418_s19 }
  0x7c   : > { %5151 = dma.done.wait (%p6424_p9), %s308_s27, 14336  }
  0x7d   : > { %5153 = vsyncadd (%p6424_p9), %s308_s27, 4294952960  ;;  %p6425_p11 = scmp.eq.s32.totalorder %s5283_s28, 0 }
  0x7f   : > { %5155 = dma.done.wait (%p6425_p11), [#allocation5], 25152   ;;  %p6426_p12 = pmov %p6425_p11 }
  0x80   : > { %p6427_p1 = pmov %p6425_p11 }
  0x81   : > { %5157 = vsyncadd (%p6426_p12), [#allocation5], 4294942144 }
  0x82   : > { %5159 = dma.done.wait (%p6427_p1), [#allocation8], 10240   ;;  %p6428_p2 = pmov %p6427_p1 }
  0x83   : > { %v4566_v0 = vld [vmem:[#allocation4 + $0xe4] ss:$16 sps:$4 sm:$0xff]   ;;  %v4570_v2 = vld [vmem:[#allocation4 + $0xe0] ss:$16 sps:$4 sm:$0xff]   ;;  %v370_v46 = vld [vmem:[%s5413_s20 + $0x8] sm:$0xff]  ;;  %vm1735_vm0 = vcmask 130048  }
  0x84   : > { %5161 = vsyncadd (%p6428_p2), [#allocation8], 4294957056  ;;  %v4568_v1 = vld [vmem:[#allocation4 + $0x2e4] ss:$16 sps:$4 sm:$0xff]   ;;  %1760 = vmatprep.subr.bf16.mxu0 %v4566_v0  ;;  %v4571_v3 = vld [vmem:[#allocation4 + $0x2e0] ss:$16 sps:$4 sm:$0xff]  }
  0x85   : > { %1873 = vmatprep.subr.bf16.mxu1 %v4568_v1  ;;  %v4572_v4 = vld [vmem:[#allocation4 + $0xc4] ss:$16 sps:$4 sm:$0xff]   ;;  %1761 = vmatpush1.bf16.msra.mxu0 %v4570_v2  ;;  %v4576_v6 = vld [vmem:[#allocation4 + $0xc0] ss:$16 sps:$4 sm:$0xff]   ;;  %v372_v48 = vld [vmem:[%s5413_s20 + $0x18] sm:$0xff]  ;;  %s4022_s18 = sshll.u32 %s5409_s15, 7 }
  0x86   : > { %1874 = vmatpush1.bf16.msra.mxu1 %v4571_v3  ;;  %v4574_v5 = vld [vmem:[#allocation4 + $0x2c4] ss:$16 sps:$4 sm:$0xff]   ;;  %1762 = vmatprep.subr.bf16.mxu0 %v4572_v4  ;;  %v4577_v7 = vld [vmem:[#allocation4 + $0x2c0] ss:$16 sps:$4 sm:$0xff]   ;;  %s6251_s14 = scalar_lea.vmem [#allocation10], %s4022_s18   ;;  %p6479_p6 = scmp.ne.s32.totalorder %s6419_s12, 0 }
  0x87   : > { %1875 = vmatprep.subr.bf16.mxu1 %v4574_v5  ;;  %v4578_v8 = vld [vmem:[#allocation4 + $0xa4] ss:$16 sps:$4 sm:$0xff]   ;;  %v4582_v10 = vld [vmem:[#allocation4 + $0xa0] ss:$16 sps:$4 sm:$0xff]   ;;  %s4317_s22 = sshll.u32 (%p6479_p6), %s5283_s28, 4  ;;  %s4333_s16 = sshll.u32 (%p6479_p6), %s5283_s28, 7 }
  0x88   : > { %v4580_v9 = vld [vmem:[#allocation4 + $0x2a4] ss:$16 sps:$4 sm:$0xff]   ;;  %v4583_v11 = vld [vmem:[#allocation4 + $0x2a0] ss:$16 sps:$4 sm:$0xff]   ;;  %s3686_s21 = ssub.s32 (%p6479_p6), 25, %s4317_s22  ;;  %s6291_s8 = scalar_lea.vmem (%p6479_p6), %s6394_s7, %s4333_s16  }
  0x89   : > { %1763 = vmatpush1.bf16.msra.mxu0 %v4576_v6  ;;  %v4584_v12 = vld [vmem:[#allocation4 + $0x84] ss:$16 sps:$4 sm:$0xff]   ;;  %v4588_v14 = vld [vmem:[#allocation4 + $0x80] ss:$16 sps:$4 sm:$0xff]   ;;  %p3687_p3 = scmp.lt.s32.totalorder (%p6479_p6), %s3686_s21, 16 }
  0x8a   : > { %1876 = vmatpush1.bf16.msra.mxu1 %v4577_v7  ;;  %1764 = vmatprep.subr.bf16.mxu0 %v4578_v8  ;;  %v4586_v13 = vld [vmem:[#allocation4 + $0x284] ss:$16 sps:$4 sm:$0xff]   ;;  %v4589_v15 = vld [vmem:[#allocation4 + $0x280] ss:$16 sps:$4 sm:$0xff]   ;;  %v376_v7 = vld [vmem:[%s5413_s20 + $0x38] sm:$0xff] }
  0x8b   : > { %1877 = vmatprep.subr.bf16.mxu1 %v4580_v9  ;;  %v4590_v16 = vld [vmem:[#allocation4 + $0x64] ss:$16 sps:$4 sm:$0xff]   ;;  %v4594_v18 = vld [vmem:[#allocation4 + $0x60] ss:$16 sps:$4 sm:$0xff]   ;;  %v378_v9 = vld [vmem:[%s5413_s20 + $0x48] sm:$0xff] }
  0x8c   : > { %v4592_v17 = vld [vmem:[#allocation4 + $0x264] ss:$16 sps:$4 sm:$0xff]   ;;  %v4595_v19 = vld [vmem:[#allocation4 + $0x260] ss:$16 sps:$4 sm:$0xff]  }
  0x8d   : > { %1765 = vmatpush1.bf16.msra.mxu0 %v4582_v10  ;;  %v4596_v20 = vld [vmem:[#allocation4 + $0x44] ss:$16 sps:$4 sm:$0xff]   ;;  %v4600_v22 = vld [vmem:[#allocation4 + $0x40] ss:$16 sps:$4 sm:$0xff]  }
  0x8e   : > { %1878 = vmatpush1.bf16.msra.mxu1 %v4583_v11  ;;  %1766 = vmatprep.subr.bf16.mxu0 %v4584_v12  ;;  %v4598_v21 = vld [vmem:[#allocation4 + $0x244] ss:$16 sps:$4 sm:$0xff]   ;;  %v4601_v23 = vld [vmem:[#allocation4 + $0x240] ss:$16 sps:$4 sm:$0xff]  }
  0x8f   : > { %1879 = vmatprep.subr.bf16.mxu1 %v4586_v13  ;;  %v4602_v24 = vld [vmem:[#allocation4 + $0x24] ss:$16 sps:$4 sm:$0xff]   ;;  %v4606_v26 = vld [vmem:[#allocation4 + $0x20] ss:$16 sps:$4 sm:$0xff]   ;;  %v384_v13 = vld [vmem:[%s5413_s20 + $0x78] sm:$0xff] }
  0x90   : > { %v4604_v25 = vld [vmem:[#allocation4 + $0x224] ss:$16 sps:$4 sm:$0xff]   ;;  %v4607_v27 = vld [vmem:[#allocation4 + $0x220] ss:$16 sps:$4 sm:$0xff]  }
  0x91   : > { %1767 = vmatpush1.bf16.msra.mxu0 %v4588_v14  ;;  %v4608_v28 = vld [vmem:[#allocation4 + $0x4] ss:$16 sps:$4 sm:$0xff]   ;;  %v4612_v30 = vld [vmem:[#allocation4] ss:$16 sps:$4 sm:$0xff]  }
  0x92   : > { %1880 = vmatpush1.bf16.msra.mxu1 %v4589_v15  ;;  %1768 = vmatprep.subr.bf16.mxu0 %v4590_v16  ;;  %v4610_v29 = vld [vmem:[#allocation4 + $0x204] ss:$16 sps:$4 sm:$0xff]   ;;  %v4613_v31 = vld [vmem:[#allocation4 + $0x200] ss:$16 sps:$4 sm:$0xff]  }
  0x93   : > { %1881 = vmatprep.subr.bf16.mxu1 %v4592_v17  ;;  %v4614_v32 = vld [vmem:[#allocation4 + $0x1e4] ss:$16 sps:$4 sm:$0xff]   ;;  %v4618_v34 = vld [vmem:[#allocation4 + $0x1e0] ss:$16 sps:$4 sm:$0xff]   ;;  %v386_v17 = vld [vmem:[%s5413_s20 + $0x88] sm:$0xff] }
  0x94   : > { %v4616_v33 = vld [vmem:[#allocation4 + $0x3e4] ss:$16 sps:$4 sm:$0xff]   ;;  %v4619_v35 = vld [vmem:[#allocation4 + $0x3e0] ss:$16 sps:$4 sm:$0xff]  }
  0x95   : > { %1769 = vmatpush1.bf16.msra.mxu0 %v4594_v18  ;;  %v4620_v36 = vld [vmem:[#allocation4 + $0x1c4] ss:$16 sps:$4 sm:$0xff]   ;;  %v4624_v38 = vld [vmem:[#allocation4 + $0x1c0] ss:$16 sps:$4 sm:$0xff]  }
  0x96   : > { %1882 = vmatpush1.bf16.msra.mxu1 %v4595_v19  ;;  %1770 = vmatprep.subr.bf16.mxu0 %v4596_v20  ;;  %v4622_v37 = vld [vmem:[#allocation4 + $0x3c4] ss:$16 sps:$4 sm:$0xff]   ;;  %v4625_v39 = vld [vmem:[#allocation4 + $0x3c0] ss:$16 sps:$4 sm:$0xff]  }
  0x97   : > { %1883 = vmatprep.subr.bf16.mxu1 %v4598_v21  ;;  %v4626_v40 = vld [vmem:[#allocation4 + $0x1a4] ss:$16 sps:$4 sm:$0xff]   ;;  %v4630_v42 = vld [vmem:[#allocation4 + $0x1a0] ss:$16 sps:$4 sm:$0xff]  }
  0x98   : > { %v4628_v41 = vld [vmem:[#allocation4 + $0x3a4] ss:$16 sps:$4 sm:$0xff]   ;;  %v4631_v43 = vld [vmem:[#allocation4 + $0x3a0] ss:$16 sps:$4 sm:$0xff]  }
  0x99   : > { %1771 = vmatpush1.bf16.msra.mxu0 %v4600_v22  ;;  %v4632_v44 = vld [vmem:[#allocation4 + $0x184] ss:$16 sps:$4 sm:$0xff]   ;;  %v4636_v50 = vld [vmem:[#allocation4 + $0x180] ss:$16 sps:$4 sm:$0xff]  }
  0x9a   : > { %1884 = vmatpush1.bf16.msra.mxu1 %v4601_v23  ;;  %1772 = vmatprep.subr.bf16.mxu0 %v4602_v24  ;;  %v4634_v45 = vld [vmem:[#allocation4 + $0x384] ss:$16 sps:$4 sm:$0xff]   ;;  %v4637_v51 = vld [vmem:[#allocation4 + $0x380] ss:$16 sps:$4 sm:$0xff]  }
  0x9b   : > { %1885 = vmatprep.subr.bf16.mxu1 %v4604_v25  ;;  %v377_v47 = vld [vmem:[%s5413_s20 + $0x40] sm:$0xff]  ;;  %v379_v49 = vld [vmem:[%s5413_s20 + $0x50] sm:$0xff]  ;;  %v390_v25 = vld [vmem:[%s5413_s20 + $0xa8] sm:$0xff] }
  0x9c   : > { %v4638_v52 = vld [vmem:[#allocation4 + $0x164] ss:$16 sps:$4 sm:$0xff]   ;;  %v5431_v53 = vpack.c.bf16 %v377_v47, %v370_v46  ;;  %v5433_v54 = vpack.c.bf16 %v379_v49, %v372_v48  ;;  %v4642_v56 = vld [vmem:[#allocation4 + $0x160] ss:$16 sps:$4 sm:$0xff]   ;;  %v414_v47 = vld [vmem:[%s5413_s20 + $0x168] sm:$0xff] }
  0x9d   : > { %1773 = vmatpush1.bf16.msra.mxu0 %v4606_v26  ;;  %v4640_v55 = vld [vmem:[#allocation4 + $0x364] ss:$16 sps:$4 sm:$0xff]   ;;  %v4643_v57 = vld [vmem:[#allocation4 + $0x360] ss:$16 sps:$4 sm:$0xff]  }
  0x9e   : > { %1886 = vmatpush1.bf16.msra.mxu1 %v4607_v27  ;;  %1774 = vmatprep.subr.bf16.mxu0 %v4608_v28  ;;  %v4644_v58 = vld [vmem:[#allocation4 + $0x144] ss:$16 sps:$4 sm:$0xff]   ;;  %v4648_v60 = vld [vmem:[#allocation4 + $0x140] ss:$16 sps:$4 sm:$0xff]   ;;  %v392_v27 = vld [vmem:[%s5413_s20 + $0xb8] sm:$0xff] }
  0x9f   : > { %1887 = vmatprep.subr.bf16.mxu1 %v4610_v29  ;;  %1792 = vmatprep.mubr.bf16.mxu0 %v5431_v53  ;;  %v4646_v59 = vld [vmem:[#allocation4 + $0x344] ss:$16 sps:$4 sm:$0xff]   ;;  %v4649_v61 = vld [vmem:[#allocation4 + $0x340] ss:$16 sps:$4 sm:$0xff]   ;;  %v398_v29 = vld [vmem:[%s5413_s20 + $0xe8] sm:$0xff] }
  0xa0   : > { %1905 = vmatprep.mubr.bf16.mxu1 %v5433_v54  ;;  %v4650_v62 = vld [vmem:[#allocation4 + $0x124] ss:$16 sps:$4 sm:$0xff]   ;;  %v4654_v0 = vld [vmem:[#allocation4 + $0x120] ss:$16 sps:$4 sm:$0xff]  }
  0xa1   : > { %1775 = vmatpush1.bf16.msra.mxu0 %v4612_v30  ;;  %v4652_v63 = vld [vmem:[#allocation4 + $0x324] ss:$16 sps:$4 sm:$0xff]   ;;  %v4655_v1 = vld [vmem:[#allocation4 + $0x320] ss:$16 sps:$4 sm:$0xff]  }
  0xa2   : > { %1888 = vmatpush1.bf16.msra.mxu1 %v4613_v31  ;;  %1776 = vmatprep.subr.bf16.mxu0 %v4614_v32  ;;  %v4656_v2 = vld [vmem:[#allocation4 + $0x104] ss:$16 sps:$4 sm:$0xff]   ;;  %v4660_v4 = vld [vmem:[#allocation4 + $0x100] ss:$16 sps:$4 sm:$0xff]   ;;  %v400_v31 = vld [vmem:[%s5413_s20 + $0xf8] sm:$0xff] }
  0xa3   : > { %1889 = vmatprep.subr.bf16.mxu1 %v4616_v33  ;;  %v4658_v3 = vld [vmem:[#allocation4 + $0x304] ss:$16 sps:$4 sm:$0xff]   ;;  %v4661_v5 = vld [vmem:[#allocation4 + $0x300] ss:$16 sps:$4 sm:$0xff]  }
  0xa4   : > { %v369_v6 = vld [vmem:[%s5413_s20] sm:$0xff]  ;;  %v371_v8 = vld [vmem:[%s5413_s20 + $0x10] sm:$0xff] }
  0xa5   : > { %1777 = vmatpush2.bf16.msra.mxu0 %v4618_v34  ;;  %v4664_v10 = vld [vmem:[#allocation4 + $0x4e4] ss:$16 sps:$4 sm:$0xff]   ;;  %v4662_v12 = vld [vmem:[#allocation4 + $0x4e0] ss:$16 sps:$4 sm:$0xff]   ;;  %v5443_v15 = vpack.c.bf16 %v376_v7, %v369_v6  ;;  %v5445_v16 = vpack.c.bf16 %v378_v9, %v371_v8 }
  0xa6   : > { %1890 = vmatpush2.bf16.msra.mxu1 %v4619_v35  ;;  %1778 = vmatprep.subr.bf16.mxu0 %v4620_v36  ;;  %v4667_v11 = vld [vmem:[#allocation4 + $0x604] ss:$16 sps:$4 sm:$0xff]   ;;  %v4665_v19 = vld [vmem:[#allocation4 + $0x600] ss:$16 sps:$4 sm:$0xff]  }
  0xa7   : > { %1891 = vmatprep.subr.bf16.mxu1 %v4622_v37  ;;  %v391_v14 = vld [vmem:[%s5413_s20 + $0xb0] sm:$0xff]  ;;  %v393_v18 = vld [vmem:[%s5413_s20 + $0xc0] sm:$0xff] }
  0xa8   : > { %v4670_v20 = vld [vmem:[#allocation4 + $0x4c4] ss:$16 sps:$4 sm:$0xff]   ;;  %v5449_v21 = vpack.c.bf16 %v391_v14, %v384_v13  ;;  %v4668_v22 = vld [vmem:[#allocation4 + $0x4c0] ss:$16 sps:$4 sm:$0xff]   ;;  %v5451_v23 = vpack.c.bf16 %v393_v18, %v386_v17  ;;  %v4718_v13 = vld [vmem:[#allocation4 + $0x2ec] ss:$16 sps:$4 sm:$0xff]  }
  0xa9   : > { %1779 = vmatpush2.bf16.msra.mxu0 %v4624_v38  ;;  %v383_v24 = vld [vmem:[%s5413_s20 + $0x70] sm:$0xff]  ;;  %v385_v26 = vld [vmem:[%s5413_s20 + $0x80] sm:$0xff]  ;;  %v434_v14 = vld [vmem:[%s5413_s20 + $0x208] sm:$0xff] }
  0xaa   : > { %1892 = vmatpush2.bf16.msra.mxu1 %v4625_v39  ;;  %1780 = vmatprep.subr.bf16.mxu0 %v4626_v40  ;;  %v4673_v28 = vld [vmem:[#allocation4 + $0x4a4] ss:$16 sps:$4 sm:$0xff]   ;;  %v5465_v33 = vpack.c.bf16 %v390_v25, %v383_v24  ;;  %v5467_v34 = vpack.c.bf16 %v392_v27, %v385_v26  ;;  %v4671_v35 = vld [vmem:[#allocation4 + $0x4a0] ss:$16 sps:$4 sm:$0xff]   ;;  %v440_v18 = vld [vmem:[%s5413_s20 + $0x238] sm:$0xff] }
  0xab   : > { %1893 = vmatprep.subr.bf16.mxu1 %v4628_v41  ;;  %v405_v30 = vld [vmem:[%s5413_s20 + $0x120] sm:$0xff]  ;;  %v407_v32 = vld [vmem:[%s5413_s20 + $0x130] sm:$0xff]  ;;  %v404_v41 = vld [vmem:[%s5413_s20 + $0x118] sm:$0xff] }
  0xac   : > { %v5469_v36 = vpack.c.bf16 %v405_v30, %v398_v29  ;;  %v4676_v37 = vld [vmem:[#allocation4 + $0x484] ss:$16 sps:$4 sm:$0xff]   ;;  %v5471_v38 = vpack.c.bf16 %v407_v32, %v400_v31  ;;  %v4674_v39 = vld [vmem:[#allocation4 + $0x480] ss:$16 sps:$4 sm:$0xff]   ;;  %v446_v32 = vld [vmem:[%s5413_s20 + $0x268] sm:$0xff] }
  0xad   : > { %1781 = vmatpush2.bf16.msra.mxu0 %v4630_v42  ;;  %v397_v40 = vld [vmem:[%s5413_s20 + $0xe0] sm:$0xff]  ;;  %v399_v42 = vld [vmem:[%s5413_s20 + $0xf0] sm:$0xff] }
  0xae   : > { %1894 = vmatpush2.bf16.msra.mxu1 %v4631_v43  ;;  %1782 = vmatprep.subr.bf16.mxu0 %v4632_v44  ;;  %v406_v43 = vld [vmem:[%s5413_s20 + $0x128] sm:$0xff]  ;;  %v4679_v44 = vld [vmem:[#allocation4 + $0x464] ss:$16 sps:$4 sm:$0xff]   ;;  %v5485_v49 = vpack.c.bf16 %v404_v41, %v397_v40  ;;  %v4686_v9 = vld [vmem:[#allocation4 + $0x400] ss:$16 sps:$4 sm:$0xff]  }
  0xaf   : > { %1895 = vmatprep.subr.bf16.mxu1 %v4634_v45  ;;  %v412_v45 = vld [vmem:[%s5413_s20 + $0x158] sm:$0xff]  ;;  %v419_v46 = vld [vmem:[%s5413_s20 + $0x190] sm:$0xff]  ;;  %v421_v48 = vld [vmem:[%s5413_s20 + $0x1a0] sm:$0xff] }
  0xb0   : > { %v4688_v7 = vld [vmem:[#allocation4 + $0x404] ss:$16 sps:$4 sm:$0xff]   ;;  %v4689_v26 = vld [vmem:[#allocation4 + $0x5e0] ss:$16 sps:$4 sm:$0xff]   ;;  %v454_v40 = vld [vmem:[%s5413_s20 + $0x2a8] sm:$0xff] }
  0xb1   : > { %1783 = vmatpush2.bf16.msra.mxu0 %v4636_v50  ;;  %v5487_v50 = vpack.c.bf16 %v406_v43, %v399_v42  ;;  %v4691_v17 = vld [vmem:[#allocation4 + $0x5e4] ss:$16 sps:$4 sm:$0xff]   ;;  %v4692_v30 = vld [vmem:[#allocation4 + $0x5c0] ss:$16 sps:$4 sm:$0xff]   ;;  %v456_v42 = vld [vmem:[%s5413_s20 + $0x2b8] sm:$0xff] }
  0xb2   : > { %1896 = vmatpush2.bf16.msra.mxu1 %v4637_v51  ;;  %1784 = vmatprep.subr.bf16.mxu0 %v4638_v52  ;;  %v4677_v51 = vld [vmem:[#allocation4 + $0x460] ss:$16 sps:$4 sm:$0xff]   ;;  %v5489_v52 = vpack.c.bf16 %v419_v46, %v412_v45 }
  0xb3   : > { %1897 = vmatprep.subr.bf16.mxu1 %v4640_v55  ;;  %v4682_v55 = vld [vmem:[#allocation4 + $0x444] ss:$16 sps:$4 sm:$0xff]   ;;  %v4695_v46 = vld [vmem:[#allocation4 + $0x5a0] ss:$16 sps:$4 sm:$0xff]  }
  0xb4   : > { %v439_v31 = vld [vmem:[%s5413_s20 + $0x230] sm:$0xff]  ;;  %v461_v41 = vld [vmem:[%s5413_s20 + $0x2e0] sm:$0xff] }
  0xb5   : > { %1785 = vmatpush2.bf16.msra.mxu0 %v4642_v56  ;;  %v5491_v56 = vpack.c.bf16 %v421_v48, %v414_v47  ;;  %v463_v43 = vld [vmem:[%s5413_s20 + $0x2f0] sm:$0xff]  ;;  %v5549_v47 = vpack.c.bf16 %v461_v41, %v454_v40  ;;  %v382_v41 = vld [vmem:[%s5413_s20 + $0x68] sm:$0xff] }
  0xb6   : > { %1898 = vmatpush2.bf16.msra.mxu1 %v4643_v57  ;;  %1786 = vmatprep.subr.bf16.mxu0 %v4644_v58  ;;  %v4680_v57 = vld [vmem:[#allocation4 + $0x440] ss:$16 sps:$4 sm:$0xff]   ;;  %v4700_v48 = vld [vmem:[#allocation4 + $0x584] ss:$16 sps:$4 sm:$0xff]  }
  0xb7   : > { %1899 = vmatprep.subr.bf16.mxu1 %v4646_v59  ;;  %v411_v58 = vld [vmem:[%s5413_s20 + $0x150] sm:$0xff]  ;;  %v418_v59 = vld [vmem:[%s5413_s20 + $0x188] sm:$0xff] }
  0xb8   : > { %v375_v40 = vld [vmem:[%s5413_s20 + $0x30] sm:$0xff] }
  0xb9   : > { %1787 = vmatpush2.bf16.msra.mxu0 %v4648_v60  ;;  %v413_v60 = vld [vmem:[%s5413_s20 + $0x160] sm:$0xff] }
  0xba   : > { %1900 = vmatpush2.bf16.msra.mxu1 %v4649_v61  ;;  %1788 = vmatprep.subr.bf16.mxu0 %v4650_v62  ;;  %v420_v61 = vld [vmem:[%s5413_s20 + $0x198] sm:$0xff]  ;;  %v4685_v62 = vld [vmem:[#allocation4 + $0x424] ss:$16 sps:$4 sm:$0xff]  }
  0xbb   : > { %1901 = vmatprep.subr.bf16.mxu1 %v4652_v63  ;;  %v426_v63 = vld [vmem:[%s5413_s20 + $0x1c8] sm:$0xff] }
  0xbd   : > { %1789 = vmatpush2.bf16.msra.mxu0 %v4654_v0  ;;  %v433_v0 = vld [vmem:[%s5413_s20 + $0x200] sm:$0xff] }
  0xbe   : > { %1902 = vmatpush2.bf16.msra.mxu1 %v4655_v1  ;;  %1790 = vmatprep.subr.bf16.mxu0 %v4656_v2  ;;  %v428_v1 = vld [vmem:[%s5413_s20 + $0x1d8] sm:$0xff]  ;;  %v435_v2 = vld [vmem:[%s5413_s20 + $0x210] sm:$0xff]  ;;  %v5509_v6 = vpack.c.bf16 %v433_v0, %v426_v63  ;;  %v470_v0 = vld [vmem:[%s5413_s20 + $0x328] sm:$0xff] }
  0xbf   : > { %1903 = vmatprep.subr.bf16.mxu1 %v4658_v3  ;;  %v5505_v3 = vpack.c.bf16 %v418_v59, %v411_v58  ;;  %v5511_v8 = vpack.c.bf16 %v435_v2, %v428_v1  ;;  %v460_v58 = vld [vmem:[%s5413_s20 + $0x2d8] sm:$0xff]  ;;  %v455_v59 = vld [vmem:[%s5413_s20 + $0x2b0] sm:$0xff]  ;;  %v477_v1 = vld [vmem:[%s5413_s20 + $0x360] sm:$0xff] }
  0xc0   : > { %v475_v63 = vld [vmem:[%s5413_s20 + $0x350] sm:$0xff] }
  0xc1   : > { %1791 = vmatpush2.bf16.msra.mxu0 %v4660_v4  ;;  %v5507_v4 = vpack.c.bf16 %v420_v61, %v413_v60  ;;  %v462_v60 = vld [vmem:[%s5413_s20 + $0x2e8] sm:$0xff]  ;;  %v4703_v61 = vld [vmem:[#allocation4 + $0x564] ss:$16 sps:$4 sm:$0xff]  }
  0xc2   : > { %1904 = vmatpush2.bf16.msra.mxu1 %v4661_v5  ;;  %1986 = vmatprep.subr.bf16.mxu0 %v4664_v10  ;;  %v4683_v5 = vld [vmem:[#allocation4 + $0x420] ss:$16 sps:$4 sm:$0xff]  }
  0xc3   : > { %2113 = vmatprep.subr.bf16.mxu1 %v4667_v11  ;;  %v425_v10 = vld [vmem:[%s5413_s20 + $0x1c0] sm:$0xff]  ;;  %v432_v11 = vld [vmem:[%s5413_s20 + $0x1f8] sm:$0xff] }
  0xc4   : > { %1793 = vmatmul.mubr.bf16.vlgmr.msra.gmra.mxu0 %v5443_v15  ;;  %v5525_v24 = vpack.c.bf16 %v432_v11, %v425_v10  ;;  %v4706_v10 = vld [vmem:[#allocation4 + $0x544] ss:$16 sps:$4 sm:$0xff]   ;;  %v5571_v11 = vpack.c.bf16 %v477_v1, %v470_v0  ;;  %v4722_v0 = vld [vmem:[#allocation4 + $0x2c8] ss:$16 sps:$4 sm:$0xff]  }
  0xc5   : > { %1906 = vmatmul.mubr.bf16.vlgmr.msra.gmra.mxu1 %v5445_v16  ;;  %1987 = vmatpush1.bf16.msra.mxu0 %v4662_v12  ;;  %v427_v12 = vld [vmem:[%s5413_s20 + $0x1d0] sm:$0xff] }
  0xc6   : > { %2114 = vmatpush1.bf16.msra.mxu1 %v4665_v19  ;;  %1988 = vmatprep.subr.bf16.mxu0 %v4670_v20  ;;  %v447_v19 = vld [vmem:[%s5413_s20 + $0x270] sm:$0xff]  ;;  %v442_v20 = vld [vmem:[%s5413_s20 + $0x248] sm:$0xff]  ;;  %v5527_v25 = vpack.c.bf16 %v434_v14, %v427_v12 }
  0xc7   : > { %1802 = vmatprep.mubr.bf16.mxu0 %v5449_v21  ;;  %1915 = vmatprep.mubr.bf16.mxu1 %v5451_v23  ;;  %v5529_v27 = vpack.c.bf16 %v447_v19, %v440_v18  ;;  %v4704_v12 = vld [vmem:[#allocation4 + $0x540] ss:$16 sps:$4 sm:$0xff]   ;;  %v474_v14 = vld [vmem:[%s5413_s20 + $0x348] sm:$0xff]  ;;  %v476_v18 = vld [vmem:[%s5413_s20 + $0x358] sm:$0xff] }
  0xc8   : > { %2325 = vmatprep.subr.bf16.mxu1 %v4718_v13  ;;  %v467_v13 = vld [vmem:[%s5413_s20 + $0x310] sm:$0xff] }
  0xc9   : > { %1989 = vmatpush1.bf16.msra.mxu0 %v4668_v22  ;;  %v449_v22 = vld [vmem:[%s5413_s20 + $0x280] sm:$0xff]  ;;  %v387_v1 = vld [vmem:[%s5413_s20 + $0x90] sm:$0xff] }
  0xca   : > { %1990 = vmatprep.subr.bf16.mxu0 %v4673_v28  ;;  %v4694_v28 = vld [vmem:[#allocation4 + $0x5c4] ss:$16 sps:$4 sm:$0xff]   ;;  %v5531_v29 = vpack.c.bf16 %v449_v22, %v442_v20  ;;  %v374_v20 = vld [vmem:[%s5413_s20 + $0x28] sm:$0xff] }
  0xcb   : > { %v4709_v19 = vld [vmem:[#allocation4 + $0x524] ss:$16 sps:$4 sm:$0xff]  }
  0xcc   : > { %1803 = vmatmul.mubr.bf16.gmra.mxu0 %v5465_v33  ;;  %v381_v22 = vld [vmem:[%s5413_s20 + $0x60] sm:$0xff] }
  0xcd   : > { %1916 = vmatmul.mubr.bf16.gmra.mxu1 %v5467_v34  ;;  %1991 = vmatpush1.bf16.msra.mxu0 %v4671_v35  ;;  %v441_v35 = vld [vmem:[%s5413_s20 + $0x240] sm:$0xff] }
  0xce   : > { %1812 = vmatprep.mubr.bf16.mxu0 %v5469_v36  ;;  %1992 = vmatprep.subr.bf16.mxu0 %v4676_v37  ;;  %v448_v37 = vld [vmem:[%s5413_s20 + $0x278] sm:$0xff] }
  0xcf   : > { %1925 = vmatprep.mubr.bf16.mxu1 %v5471_v38  ;;  %v5547_v45 = vpack.c.bf16 %v448_v37, %v441_v35  ;;  %v4710_v35 = vld [vmem:[#allocation4 + $0x500] ss:$16 sps:$4 sm:$0xff]  }
  0xd0   : > { %v373_v37 = vld [vmem:[%s5413_s20 + $0x20] sm:$0xff] }
  0xd1   : > { %1993 = vmatpush1.bf16.msra.mxu0 %v4674_v39  ;;  %v4697_v39 = vld [vmem:[#allocation4 + $0x5a4] ss:$16 sps:$4 sm:$0xff]  }
  0xd2   : > { %1994 = vmatprep.subr.bf16.mxu0 %v4679_v44  ;;  %v5545_v44 = vpack.c.bf16 %v446_v32, %v439_v31  ;;  %v5587_v31 = vpack.c.bf16 %v381_v22, %v374_v20  ;;  %v4712_v32 = vld [vmem:[#allocation4 + $0x504] ss:$16 sps:$4 sm:$0xff]   ;;  %v4725_v22 = vld [vmem:[#allocation4 + $0xa8] ss:$16 sps:$4 sm:$0xff]  }
  0xd3   : > { %v409_v20 = vld [vmem:[%s5413_s20 + $0x140] sm:$0xff] }
  0xd4   : > { %1813 = vmatmul.mubr.bf16.gmra.mxu0 %v5485_v49 }
  0xd5   : > { %1926 = vmatmul.mubr.bf16.gmra.mxu1 %v5487_v50  ;;  %1995 = vmatpush1.bf16.msra.mxu0 %v4677_v51  ;;  %v5551_v51 = vpack.c.bf16 %v463_v43, %v456_v42  ;;  %v6398_v42 = vmov 0   ;;  %v4715_v43 = vld [vmem:[#allocation4 + $0xec] ss:$16 sps:$4 sm:$0xff]  }
  0xd6   : > { %1822 = vmatprep.mubr.bf16.mxu0 %v5489_v52  ;;  %1996 = vmatprep.subr.bf16.mxu0 %v4682_v55  ;;  %v4698_v55 = vld [vmem:[#allocation4 + $0x580] ss:$16 sps:$4 sm:$0xff]  }
  0xd7   : > { %1935 = vmatprep.mubr.bf16.mxu1 %v5491_v56 }
  0xd9   : > { %1997 = vmatpush1.bf16.msra.mxu0 %v4680_v57  ;;  %v453_v57 = vld [vmem:[%s5413_s20 + $0x2a0] sm:$0xff] }
  0xda   : > { %1998 = vmatprep.subr.bf16.mxu0 %v4685_v62  ;;  %v468_v62 = vld [vmem:[%s5413_s20 + $0x318] sm:$0xff]  ;;  %v5565_v2 = vpack.c.bf16 %v460_v58, %v453_v57  ;;  %v5599_v57 = vpack.c.bf16 %v382_v41, %v375_v40  ;;  %v401_v41 = vld [vmem:[%s5413_s20 + $0x100] sm:$0xff] }
  0xdb   : > { %v388_v58 = vld [vmem:[%s5413_s20 + $0x98] sm:$0xff] }
  0xdc   : > { %1823 = vmatmul.mubr.bf16.gmra.mxu0 %v5505_v3 }
  0xdd   : > { %1936 = vmatmul.mubr.bf16.gmra.mxu1 %v5507_v4  ;;  %1999 = vmatpush1.bf16.msra.mxu0 %v4683_v5  ;;  %v5567_v5 = vpack.c.bf16 %v462_v60, %v455_v59  ;;  %v395_v59 = vld [vmem:[%s5413_s20 + $0xd0] sm:$0xff]  ;;  %v4721_v60 = vld [vmem:[#allocation4 + $0xcc] ss:$16 sps:$4 sm:$0xff]  }
  0xde   : > { %1832 = vmatprep.mubr.bf16.mxu0 %v5509_v6  ;;  %2000 = vmatprep.subr.bf16.mxu0 %v4688_v7  ;;  %v4701_v7 = vld [vmem:[#allocation4 + $0x560] ss:$16 sps:$4 sm:$0xff]  }
  0xdf   : > { %1945 = vmatprep.mubr.bf16.mxu1 %v5511_v8 }
  0xe1   : > { %2001 = vmatpush1.bf16.msra.mxu0 %v4686_v9  ;;  %v5569_v9 = vpack.c.bf16 %v475_v63, %v468_v62  ;;  %v4719_v62 = vld [vmem:[#allocation4 + $0xc8] ss:$16 sps:$4 sm:$0xff]   ;;  %v5603_v63 = vpack.c.bf16 %v395_v59, %v388_v58  ;;  %v4739_v58 = vld [vmem:[#allocation4 + $0x6c] ss:$16 sps:$4 sm:$0xff]  }
  0xe2   : > { %2002 = vmatprep.subr.bf16.mxu0 %v4691_v17  ;;  %v469_v17 = vld [vmem:[%s5413_s20 + $0x320] sm:$0xff]  ;;  %v4742_v59 = vld [vmem:[#allocation4 + $0x26c] ss:$16 sps:$4 sm:$0xff]  }
  0xe4   : > { %1833 = vmatmul.mubr.bf16.gmra.mxu0 %v5525_v24 }
  0xe5   : > { %1946 = vmatmul.mubr.bf16.gmra.mxu1 %v5527_v25  ;;  %2003 = vmatpush2.bf16.msra.mxu0 %v4689_v26  ;;  %v5583_v26 = vpack.c.bf16 %v474_v14, %v467_v13  ;;  %v4727_v13 = vld [vmem:[#allocation4 + $0xac] ss:$16 sps:$4 sm:$0xff]  }
  0xe6   : > { %1842 = vmatprep.mubr.bf16.mxu0 %v5529_v27  ;;  %2004 = vmatprep.subr.bf16.mxu0 %v4694_v28  ;;  %v5585_v28 = vpack.c.bf16 %v476_v18, %v469_v17  ;;  %v4730_v14 = vld [vmem:[#allocation4 + $0x2ac] ss:$16 sps:$4 sm:$0xff]  }
  0xe7   : > { %1955 = vmatprep.mubr.bf16.mxu1 %v5531_v29  ;;  %v402_v17 = vld [vmem:[%s5413_s20 + $0x108] sm:$0xff] }
  0xe8   : > { %v5620_v40 = vpack.c.bf16 %v409_v20, %v402_v17  ;;  %v415_v20 = vld [vmem:[%s5413_s20 + $0x170] sm:$0xff] }
  0xe9   : > { %2005 = vmatpush2.bf16.msra.mxu0 %v4692_v30  ;;  %v4707_v30 = vld [vmem:[#allocation4 + $0x520] ss:$16 sps:$4 sm:$0xff]  }
  0xea   : > { %2006 = vmatprep.subr.bf16.mxu0 %v4697_v39  ;;  %v380_v39 = vld [vmem:[%s5413_s20 + $0x58] sm:$0xff] }
  0xec   : > { %1843 = vmatmul.mubr.bf16.gmra.mxu0 %v5545_v44 }
  0xed   : > { %1956 = vmatmul.mubr.bf16.gmra.mxu1 %v5547_v45  ;;  %2007 = vmatpush2.bf16.msra.mxu0 %v4695_v46  ;;  %v4713_v46 = vld [vmem:[#allocation4 + $0xe8] ss:$16 sps:$4 sm:$0xff]  }
  0xee   : > { %1852 = vmatprep.mubr.bf16.mxu0 %v5549_v47  ;;  %2008 = vmatprep.subr.bf16.mxu0 %v4700_v48  ;;  %v4716_v48 = vld [vmem:[#allocation4 + $0x2e8] ss:$16 sps:$4 sm:$0xff]  }
  0xef   : > { %1965 = vmatprep.mubr.bf16.mxu1 %v5551_v51 }
  0xf1   : > { %2009 = vmatpush2.bf16.msra.mxu0 %v4698_v55  ;;  %v5597_v55 = vpack.c.bf16 %v380_v39, %v373_v37  ;;  %v4731_v37 = vld [vmem:[#allocation4 + $0x88] ss:$16 sps:$4 sm:$0xff]  }
  0xf2   : > { %2010 = vmatprep.subr.bf16.mxu0 %v4703_v61  ;;  %v4724_v61 = vld [vmem:[#allocation4 + $0x2cc] ss:$16 sps:$4 sm:$0xff]   ;;  %v4734_v39 = vld [vmem:[#allocation4 + $0x288] ss:$16 sps:$4 sm:$0xff]  }
  0xf4   : > { %1853 = vmatmul.mubr.bf16.gmra.mxu0 %v5565_v2 }
  0xf5   : > { %1966 = vmatmul.mubr.bf16.gmra.mxu1 %v5567_v5  ;;  %2011 = vmatpush2.bf16.msra.mxu0 %v4701_v7  ;;  %v394_v7 = vld [vmem:[%s5413_s20 + $0xc8] sm:$0xff] }
  0xf6   : > { %1862 = vmatprep.mubr.bf16.mxu0 %v5569_v9  ;;  %2012 = vmatprep.subr.bf16.mxu0 %v4706_v10  ;;  %v389_v10 = vld [vmem:[%s5413_s20 + $0xa0] sm:$0xff]  ;;  %v5615_v18 = vpack.c.bf16 %v394_v7, %v387_v1  ;;  %v416_v1 = vld [vmem:[%s5413_s20 + $0x178] sm:$0xff]  ;;  %v423_v7 = vld [vmem:[%s5413_s20 + $0x1b0] sm:$0xff] }
  0xf7   : > { %1975 = vmatprep.mubr.bf16.mxu1 %v5571_v11  ;;  %v5637_v17 = vpack.c.bf16 %v423_v7, %v416_v1  ;;  %v4758_v1 = vld [vmem:[#allocation4 + $0x208] ss:$16 sps:$4 sm:$0xff]  }
  0xf9   : > { %2013 = vmatpush2.bf16.msra.mxu0 %v4704_v12  ;;  %v396_v12 = vld [vmem:[%s5413_s20 + $0xd8] sm:$0xff]  ;;  %6429 = vst [vmem:[#allocation14_spill] sm:$0xff] %v5637_v17 }
  0xfa   : > { %2014 = vmatprep.subr.bf16.mxu0 %v4709_v19  ;;  %v5617_v19 = vpack.c.bf16 %v396_v12, %v389_v10  ;;  %v4745_v10 = vld [vmem:[#allocation4 + $0x4c] ss:$16 sps:$4 sm:$0xff]  }
  0xfb   : > { %v4748_v12 = vld [vmem:[#allocation4 + $0x24c] ss:$16 sps:$4 sm:$0xff]  }
  0xfc   : > { %1863 = vmatmul.mubr.bf16.gmra.mxu0 %v5583_v26 }
  0xfd   : > { %1976 = vmatmul.mubr.bf16.gmra.mxu1 %v5585_v28  ;;  %2015 = vmatpush2.bf16.msra.mxu0 %v4707_v30  ;;  %v4728_v30 = vld [vmem:[#allocation4 + $0x2a8] ss:$16 sps:$4 sm:$0xff]  }
  0xfe   : > { %2018 = vmatprep.mubr.bf16.mxu0 %v5587_v31  ;;  %2016 = vmatprep.subr.bf16.mxu0 %v4712_v32  ;;  %v4733_v32 = vld [vmem:[#allocation4 + $0x8c] ss:$16 sps:$4 sm:$0xff]  }
  0xff   : > { %2131 = vmatprep.mubr.bf16.mxu1 %v6398_v42 }
 0x101   : > { %2017 = vmatpush2.bf16.msra.mxu0 %v4710_v35  ;;  %v4736_v35 = vld [vmem:[#allocation4 + $0x28c] ss:$16 sps:$4 sm:$0xff]  }
 0x102   : > { %2212 = vmatprep.subr.bf16.mxu0 %v4715_v43  ;;  %v408_v43 = vld [vmem:[%s5413_s20 + $0x138] sm:$0xff] }
 0x104   : > { %2019 = vmatmul.mubr.bf16.vlgmr.msra.gmra.mxu0 %v5597_v55 }
 0x105   : > { %4219 = vmatmul.mubr.msk.bf16.vlgmr.msra.gmra.mxu1 %vm1735_vm0, %v5599_v57  ;;  %2213 = vmatpush1.bf16.msra.mxu0 %v4713_v46  ;;  %v403_v46 = vld [vmem:[%s5413_s20 + $0x110] sm:$0xff] }
 0x106   : > { %2326 = vmatpush1.bf16.msra.mxu1 %v4716_v48  ;;  %2214 = vmatprep.subr.bf16.mxu0 %v4721_v60  ;;  %v410_v48 = vld [vmem:[%s5413_s20 + $0x148] sm:$0xff] }
 0x107   : > { %2327 = vmatprep.subr.bf16.mxu1 %v4724_v61  ;;  %2028 = vmatprep.mubr.bf16.mxu0 %v5603_v63  ;;  %v4737_v60 = vld [vmem:[#allocation4 + $0x68] ss:$16 sps:$4 sm:$0xff]  }
 0x108   : > { %2141 = vmatprep.mubr.bf16.mxu1 %v6398_v42  ;;  %v4740_v61 = vld [vmem:[#allocation4 + $0x268] ss:$16 sps:$4 sm:$0xff]  }
 0x109   : > { %2215 = vmatpush1.bf16.msra.mxu0 %v4719_v62  ;;  %v5631_v62 = vpack.c.bf16 %v408_v43, %v401_v41  ;;  %v4752_v41 = vld [vmem:[#allocation4 + $0x228] ss:$16 sps:$4 sm:$0xff]  }
 0x10a   : > { %2328 = vmatpush1.bf16.msra.mxu1 %v4722_v0  ;;  %2216 = vmatprep.subr.bf16.mxu0 %v4727_v13  ;;  %v5633_v0 = vpack.c.bf16 %v410_v48, %v403_v46  ;;  %v4743_v13 = vld [vmem:[#allocation4 + $0x48] ss:$16 sps:$4 sm:$0xff]  }
 0x10b   : > { %2329 = vmatprep.subr.bf16.mxu1 %v4730_v14  ;;  %v4746_v14 = vld [vmem:[#allocation4 + $0x248] ss:$16 sps:$4 sm:$0xff]  }
 0x10c   : > { %2029 = vmatmul.mubr.bf16.gmra.mxu0 %v5615_v18  ;;  %v430_v48 = vld [vmem:[%s5413_s20 + $0x1e8] sm:$0xff] }
 0x10d   : > { %4220 = vmatmul.mubr.msk.bf16.gmra.mxu1 %vm1735_vm0, %v5617_v19  ;;  %2217 = vmatpush1.bf16.msra.mxu0 %v4725_v22  ;;  %v422_v22 = vld [vmem:[%s5413_s20 + $0x1a8] sm:$0xff] }
 0x10e   : > { %2330 = vmatpush1.bf16.msra.mxu1 %v4728_v30  ;;  %2218 = vmatprep.subr.bf16.mxu0 %v4733_v32  ;;  %v417_v30 = vld [vmem:[%s5413_s20 + $0x180] sm:$0xff]  ;;  %v424_v32 = vld [vmem:[%s5413_s20 + $0x1b8] sm:$0xff]  ;;  %v5648_v43 = vpack.c.bf16 %v422_v22, %v415_v20  ;;  %v431_v20 = vld [vmem:[%s5413_s20 + $0x1f0] sm:$0xff] }
 0x10f   : > { %2331 = vmatprep.subr.bf16.mxu1 %v4736_v35  ;;  %2038 = vmatprep.mubr.bf16.mxu0 %v5620_v40  ;;  %v4751_v35 = vld [vmem:[#allocation4 + $0x2c] ss:$16 sps:$4 sm:$0xff]   ;;  %v5650_v46 = vpack.c.bf16 %v424_v32, %v417_v30  ;;  %v4761_v30 = vld [vmem:[#allocation4 + $0x1e8] ss:$16 sps:$4 sm:$0xff]  }
 0x110   : > { %2151 = vmatprep.mubr.bf16.mxu1 %v6398_v42  ;;  %6430 = vst [vmem:[#allocation15_spill] sm:$0xff] %v5648_v43  ;;  %v4766_v22 = vld [vmem:[#allocation4 + $0x3ec] ss:$16 sps:$4 sm:$0xff]   ;;  %v4764_v32 = vld [vmem:[#allocation4 + $0x3e8] ss:$16 sps:$4 sm:$0xff]  }
 0x111   : > { %2219 = vmatpush1.bf16.msra.mxu0 %v4731_v37  ;;  %v4754_v37 = vld [vmem:[#allocation4 + $0x22c] ss:$16 sps:$4 sm:$0xff]   ;;  %6431 = vst [vmem:[#allocation16_spill] sm:$0xff] %v5650_v46 }
 0x112   : > { %2332 = vmatpush1.bf16.msra.mxu1 %v4734_v39  ;;  %2220 = vmatprep.subr.bf16.mxu0 %v4739_v58  ;;  %v4749_v39 = vld [vmem:[#allocation4 + $0x28] ss:$16 sps:$4 sm:$0xff]   ;;  %v437_v58 = vld [vmem:[%s5413_s20 + $0x220] sm:$0xff] }
 0x113   : > { %2333 = vmatprep.subr.bf16.mxu1 %v4742_v59  ;;  %v4757_v59 = vld [vmem:[#allocation4 + $0xc] ss:$16 sps:$4 sm:$0xff]   ;;  %v5654_v7 = vpack.c.bf16 %v437_v58, %v430_v48 }
 0x114   : > { %2039 = vmatmul.mubr.bf16.gmra.mxu0 %v5631_v62  ;;  %v444_v48 = vld [vmem:[%s5413_s20 + $0x258] sm:$0xff] }
 0x115   : > { %4221 = vmatmul.mubr.msk.bf16.gmra.mxu1 %vm1735_vm0, %v5633_v0  ;;  %2221 = vmatpush1.bf16.msra.mxu0 %v4737_v60  ;;  %v4760_v60 = vld [vmem:[#allocation4 + $0x20c] ss:$16 sps:$4 sm:$0xff]   ;;  %6432 = vst [vmem:[#allocation17_spill] sm:$0xff] %v5654_v7 }
 0x116   : > { %2334 = vmatpush1.bf16.msra.mxu1 %v4740_v61  ;;  %2222 = vmatprep.subr.bf16.mxu0 %v4745_v10  ;;  %v4755_v61 = vld [vmem:[#allocation4 + $0x8] ss:$16 sps:$4 sm:$0xff]   ;;  %v429_v10 = vld [vmem:[%s5413_s20 + $0x1e0] sm:$0xff]  ;;  %v4772_v58 = vld [vmem:[#allocation4 + $0x3cc] ss:$16 sps:$4 sm:$0xff]  }
 0x117   : > { %2335 = vmatprep.subr.bf16.mxu1 %v4748_v12  ;;  %2048 = vmatprep.mubr.bf16.mxu0 %v5637_v17  ;;  %v436_v12 = vld [vmem:[%s5413_s20 + $0x218] sm:$0xff]  ;;  %v473_v17 = vld [vmem:[%s5413_s20 + $0x340] sm:$0xff] }
 0x118   : > { %2161 = vmatprep.mubr.bf16.mxu1 %v6398_v42 }
 0x119   : > { %2223 = vmatpush1.bf16.msra.mxu0 %v4743_v13  ;;  %v438_v13 = vld [vmem:[%s5413_s20 + $0x228] sm:$0xff] }
 0x11a   : > { %2336 = vmatpush1.bf16.msra.mxu1 %v4746_v14  ;;  %2224 = vmatprep.subr.bf16.mxu0 %v4751_v35  ;;  %v4763_v14 = vld [vmem:[#allocation4 + $0x1ec] ss:$16 sps:$4 sm:$0xff]   ;;  %v5665_v35 = vpack.c.bf16 %v436_v12, %v429_v10  ;;  %v445_v10 = vld [vmem:[%s5413_s20 + $0x260] sm:$0xff] }
 0x11b   : > { %2337 = vmatprep.subr.bf16.mxu1 %v4754_v37  ;;  %v5667_v37 = vpack.c.bf16 %v438_v13, %v431_v20  ;;  %v4778_v12 = vld [vmem:[#allocation4 + $0x3ac] ss:$16 sps:$4 sm:$0xff]   ;;  %v6436_v20 = vmov 0   ;;  %v4773_v13 = vld [vmem:[#allocation4 + $0x1a8] ss:$16 sps:$4 sm:$0xff]  }
 0x11c   : > { %2049 = vmatmul.mubr.bf16.gmra.mxu0 %v5648_v43  ;;  %6433 = vst [vmem:[#allocation18_spill] sm:$0xff] %v5665_v35  ;;  %v478_v43 = vld [vmem:[%s5413_s20 + $0x368] sm:$0xff] }
 0x11d   : > { %4222 = vmatmul.mubr.msk.bf16.gmra.mxu1 %vm1735_vm0, %v5650_v46  ;;  %2225 = vmatpush1.bf16.msra.mxu0 %v4749_v39  ;;  %6434 = vst [vmem:[#allocation19_spill] sm:$0xff] %v5667_v37  ;;  %v451_v39 = vld [vmem:[%s5413_s20 + $0x290] sm:$0xff]  ;;  %v450_v46 = vld [vmem:[%s5413_s20 + $0x288] sm:$0xff] }
 0x11e   : > { %2338 = vmatpush1.bf16.msra.mxu1 %v4752_v41  ;;  %2226 = vmatprep.subr.bf16.mxu0 %v4757_v59  ;;  %v4769_v41 = vld [vmem:[#allocation4 + $0x1cc] ss:$16 sps:$4 sm:$0xff]   ;;  %v4767_v59 = vld [vmem:[#allocation4 + $0x1c8] ss:$16 sps:$4 sm:$0xff]  }
 0x11f   : > { %2339 = vmatprep.subr.bf16.mxu1 %v4760_v60  ;;  %2058 = vmatprep.mubr.bf16.mxu0 %v5654_v7  ;;  %v4770_v60 = vld [vmem:[#allocation4 + $0x3c8] ss:$16 sps:$4 sm:$0xff]   ;;  %v443_v7 = vld [vmem:[%s5413_s20 + $0x250] sm:$0xff] }
 0x120   : > { %2171 = vmatprep.mubr.bf16.mxu1 %v6398_v42  ;;  %v5671_v42 = vpack.c.bf16 %v451_v39, %v444_v48  ;;  %v458_v48 = vld [vmem:[%s5413_s20 + $0x2c8] sm:$0xff]  ;;  %v465_v39 = vld [vmem:[%s5413_s20 + $0x300] sm:$0xff] }
 0x121   : > { %2227 = vmatpush1.bf16.msra.mxu0 %v4755_v61  ;;  %v452_v61 = vld [vmem:[%s5413_s20 + $0x298] sm:$0xff] }
 0x122   : > { %2340 = vmatpush1.bf16.msra.mxu1 %v4758_v1  ;;  %2228 = vmatprep.subr.bf16.mxu0 %v4763_v14  ;;  %6435 = vst [vmem:[#allocation20_spill] sm:$0xff] %v5671_v42  ;;  %v4775_v1 = vld [vmem:[#allocation4 + $0x1ac] ss:$16 sps:$4 sm:$0xff]   ;;  %v5682_v14 = vpack.c.bf16 %v450_v46, %v443_v7  ;;  %v457_v46 = vld [vmem:[%s5413_s20 + $0x2c0] sm:$0xff] }
 0x123   : > { %2341 = vmatprep.subr.bf16.mxu1 %v4766_v22  ;;  %v5684_v22 = vpack.c.bf16 %v452_v61, %v445_v10  ;;  %v464_v7 = vld [vmem:[%s5413_s20 + $0x2f8] sm:$0xff] }
 0x124   : > { %2059 = vmatmul.mubr.bf16.gmra.mxu0 %v5665_v35  ;;  %6437 = vst [vmem:[#allocation21_spill] sm:$0xff] %v5682_v14  ;;  %v4787_v10 = vld [vmem:[#allocation4 + $0x16c] ss:$16 sps:$4 sm:$0xff]   ;;  %v471_v35 = vld [vmem:[%s5413_s20 + $0x330] sm:$0xff] }
 0x125   : > { %4223 = vmatmul.mubr.msk.bf16.gmra.mxu1 %vm1735_vm0, %v5667_v37  ;;  %2229 = vmatpush2.bf16.msra.mxu0 %v4761_v30  ;;  %6438 = vst [vmem:[#allocation22_spill] sm:$0xff] %v5684_v22  ;;  %v4776_v30 = vld [vmem:[#allocation4 + $0x3a8] ss:$16 sps:$4 sm:$0xff]   ;;  %v5688_v37 = vpack.c.bf16 %v465_v39, %v458_v48  ;;  %v4790_v61 = vld [vmem:[#allocation4 + $0x36c] ss:$16 sps:$4 sm:$0xff]   ;;  %v5700_v48 = vpack.c.bf16 %v464_v7, %v457_v46 }
 0x126   : > { %2342 = vmatpush2.bf16.msra.mxu1 %v4764_v32  ;;  %2230 = vmatprep.subr.bf16.mxu0 %v4769_v41  ;;  %v4781_v32 = vld [vmem:[#allocation4 + $0x18c] ss:$16 sps:$4 sm:$0xff]   ;;  %v4797_v7 = vld [vmem:[#allocation4 + $0x128] ss:$16 sps:$4 sm:$0xff]  }
 0x127   : > { %2343 = vmatprep.subr.bf16.mxu1 %v4772_v58  ;;  %2068 = vmatprep.mubr.bf16.mxu0 %v5671_v42  ;;  %v4784_v41 = vld [vmem:[#allocation4 + $0x38c] ss:$16 sps:$4 sm:$0xff]   ;;  %v4779_v58 = vld [vmem:[#allocation4 + $0x188] ss:$16 sps:$4 sm:$0xff]   ;;  %6439 = vst [vmem:[#allocation23_spill] sm:$0xff] %v5688_v37 }
 0x128   : > { %2181 = vmatprep.mubr.bf16.mxu1 %v6436_v20  ;;  %v4782_v42 = vld [vmem:[#allocation4 + $0x388] ss:$16 sps:$4 sm:$0xff]  }
 0x129   : > { %2231 = vmatpush2.bf16.msra.mxu0 %v4767_v59  ;;  %v459_v59 = vld [vmem:[%s5413_s20 + $0x2d0] sm:$0xff]  ;;  %v480_v46 = vld [vmem:[%s5413_s20 + $0x378] sm:$0xff] }
 0x12a   : > { %2344 = vmatpush2.bf16.msra.mxu1 %v4770_v60  ;;  %2232 = vmatprep.subr.bf16.mxu0 %v4775_v1  ;;  %v466_v60 = vld [vmem:[%s5413_s20 + $0x308] sm:$0xff] }
 0x12b   : > { %2345 = vmatprep.subr.bf16.mxu1 %v4778_v12  ;;  %v4785_v1 = vld [vmem:[#allocation4 + $0x168] ss:$16 sps:$4 sm:$0xff]   ;;  %v5702_v39 = vpack.c.bf16 %v466_v60, %v459_v59  ;;  %v5716_v60 = vpack.c.bf16 %v478_v43, %v471_v35 }
 0x12c   : > { %2069 = vmatmul.mubr.bf16.gmra.mxu0 %v5682_v14  ;;  %v472_v12 = vld [vmem:[%s5413_s20 + $0x338] sm:$0xff] }
 0x12d   : > { %4224 = vmatmul.mubr.msk.bf16.gmra.mxu1 %vm1735_vm0, %v5684_v22  ;;  %2233 = vmatpush2.bf16.msra.mxu0 %v4773_v13  ;;  %v479_v13 = vld [vmem:[%s5413_s20 + $0x370] sm:$0xff]  ;;  %v4794_v22 = vld [vmem:[#allocation4 + $0x348] ss:$16 sps:$4 sm:$0xff]  }
 0x12e   : > { %2346 = vmatpush2.bf16.msra.mxu1 %v4776_v30  ;;  %2234 = vmatprep.subr.bf16.mxu0 %v4781_v32  ;;  %v4788_v30 = vld [vmem:[#allocation4 + $0x368] ss:$16 sps:$4 sm:$0xff]   ;;  %v4793_v32 = vld [vmem:[#allocation4 + $0x14c] ss:$16 sps:$4 sm:$0xff]   ;;  %v5705_v14 = vpack.c.bf16 %v479_v13, %v472_v12 }
 0x12f   : > { %2347 = vmatprep.subr.bf16.mxu1 %v4784_v41  ;;  %2078 = vmatprep.mubr.bf16.mxu0 %v5688_v37  ;;  %v4796_v41 = vld [vmem:[#allocation4 + $0x34c] ss:$16 sps:$4 sm:$0xff]   ;;  %v4791_v37 = vld [vmem:[#allocation4 + $0x148] ss:$16 sps:$4 sm:$0xff]  }
 0x130   : > { %2191 = vmatprep.mubr.bf16.mxu1 %v6436_v20  ;;  %v4800_v59 = vld [vmem:[#allocation4 + $0x328] ss:$16 sps:$4 sm:$0xff]  }
 0x131   : > { %2235 = vmatpush2.bf16.msra.mxu0 %v4779_v58  ;;  %v4802_v58 = vld [vmem:[#allocation4 + $0x32c] ss:$16 sps:$4 sm:$0xff]   ;;  %v4803_v12 = vld [vmem:[#allocation4 + $0x108] ss:$16 sps:$4 sm:$0xff]  }
 0x132   : > { %2348 = vmatpush2.bf16.msra.mxu1 %v4782_v42  ;;  %2236 = vmatprep.subr.bf16.mxu0 %v4787_v10  ;;  %v4799_v42 = vld [vmem:[#allocation4 + $0x12c] ss:$16 sps:$4 sm:$0xff]   ;;  %v5718_v10 = vpack.c.bf16 %v480_v46, %v473_v17  ;;  %v4806_v13 = vld [vmem:[#allocation4 + $0x308] ss:$16 sps:$4 sm:$0xff]  }
 0x133   : > { %2349 = vmatprep.subr.bf16.mxu1 %v4790_v61  ;;  %v4805_v61 = vld [vmem:[#allocation4 + $0x10c] ss:$16 sps:$4 sm:$0xff]   ;;  %v4809_v43 = vld [vmem:[#allocation4 + $0x4e8] ss:$16 sps:$4 sm:$0xff]  }
 0x134   : > { %2079 = vmatmul.mubr.bf16.gmra.mxu0 %v5700_v48  ;;  %v4814_v17 = vld [vmem:[#allocation4 + $0x60c] ss:$16 sps:$4 sm:$0xff]   ;;  %v4812_v35 = vld [vmem:[#allocation4 + $0x608] ss:$16 sps:$4 sm:$0xff]  }
 0x135   : > { %4225 = vmatmul.mubr.msk.bf16.gmra.mxu1 %vm1735_vm0, %v5702_v39  ;;  %2237 = vmatpush2.bf16.msra.mxu0 %v4785_v1  ;;  %v4808_v1 = vld [vmem:[#allocation4 + $0x30c] ss:$16 sps:$4 sm:$0xff]  }
 0x136   : > { %2350 = vmatpush2.bf16.msra.mxu1 %v4788_v30  ;;  %2238 = vmatprep.subr.bf16.mxu0 %v4793_v32  ;;  %v4811_v30 = vld [vmem:[#allocation4 + $0x4ec] ss:$16 sps:$4 sm:$0xff]  }
 0x137   : > { %2351 = vmatprep.subr.bf16.mxu1 %v4796_v41  ;;  %2088 = vmatprep.mubr.bf16.mxu0 %v5705_v14  ;;  %v4823_v32 = vld [vmem:[#allocation4 + $0x48c] ss:$16 sps:$4 sm:$0xff]   ;;  %v4821_v41 = vld [vmem:[#allocation4 + $0x488] ss:$16 sps:$4 sm:$0xff]  }
 0x138   : > { %2201 = vmatprep.mubr.bf16.mxu1 %v6436_v20  ;;  %v4859_v46 = vld [vmem:[#allocation4 + $0x50c] ss:$16 sps:$4 sm:$0xff]  }
 0x139   : > { %2239 = vmatpush2.bf16.msra.mxu0 %v4791_v37  ;;  %v4817_v37 = vld [vmem:[#allocation4 + $0x4cc] ss:$16 sps:$4 sm:$0xff]  }
 0x13a   : > { %2352 = vmatpush2.bf16.msra.mxu1 %v4794_v22  ;;  %2240 = vmatprep.subr.bf16.mxu0 %v4799_v42  ;;  %v4815_v22 = vld [vmem:[#allocation4 + $0x4c8] ss:$16 sps:$4 sm:$0xff]  }
 0x13b   : > { %2353 = vmatprep.subr.bf16.mxu1 %v4802_v58  ;;  %v4865_v58 = vld [vmem:[#allocation7 + $0x64] ss:$8 sps:$4 sm:$0xff]  }
 0x13c   : > { %2089 = vmatmul.mubr.bf16.gmra.mxu0 %v5716_v60 }
 0x13d   : > { %4226 = vmatmul.mubr.msk.bf16.gmra.mxu1 %vm1735_vm0, %v5718_v10  ;;  %2241 = vmatpush2.bf16.msra.mxu0 %v4797_v7 }
 0x13e   : > { %2354 = vmatpush2.bf16.msra.mxu1 %v4800_v59  ;;  %2242 = vmatprep.subr.bf16.mxu0 %v4805_v61 }
 0x13f   : > { %2355 = vmatprep.subr.bf16.mxu1 %v4808_v1  ;;  %2244 = vmatprep.mubr.bf16.mxu0 %v5431_v53  ;;  %v4820_v53 = vld [vmem:[#allocation4 + $0x4ac] ss:$16 sps:$4 sm:$0xff]  }
 0x140   : > { %2357 = vmatprep.mubr.bf16.mxu1 %v5433_v54  ;;  %v4818_v54 = vld [vmem:[#allocation4 + $0x4a8] ss:$16 sps:$4 sm:$0xff]  }
 0x141   : > { %2243 = vmatpush2.bf16.msra.mxu0 %v4803_v12 }
 0x142   : > { %2356 = vmatpush2.bf16.msra.mxu1 %v4806_v13  ;;  %2438 = vmatprep.subr.bf16.mxu0 %v4811_v30  ;;  %v4863_v13 = vld [vmem:[#allocation7 + $0x60] ss:$8 sps:$4 sm:$0xff]  }
 0x143   : > { %2565 = vmatprep.subr.bf16.mxu1 %v4814_v17 }
 0x144   : > { %2245 = vmatmul.mubr.bf16.vlgmr.msra.gmra.mxu0 %v5443_v15  ;;  %v4826_v15 = vld [vmem:[#allocation4 + $0x46c] ss:$16 sps:$4 sm:$0xff]  }
 0x145   : > { %2358 = vmatmul.mubr.bf16.vlgmr.msra.gmra.mxu1 %v5445_v16  ;;  %2439 = vmatpush1.bf16.msra.mxu0 %v4809_v43  ;;  %v4824_v16 = vld [vmem:[#allocation4 + $0x468] ss:$16 sps:$4 sm:$0xff]  }
 0x146   : > { %2566 = vmatpush1.bf16.msra.mxu1 %v4812_v35  ;;  %2440 = vmatprep.subr.bf16.mxu0 %v4817_v37  ;;  %v4868_v43 = vld [vmem:[#allocation7 + $0x54] ss:$8 sps:$4 sm:$0xff]  }
 0x147   : > { %2254 = vmatprep.mubr.bf16.mxu0 %v5449_v21  ;;  %2367 = vmatprep.mubr.bf16.mxu1 %v5451_v23  ;;  %v4829_v21 = vld [vmem:[#allocation4 + $0x44c] ss:$16 sps:$4 sm:$0xff]   ;;  %v4827_v23 = vld [vmem:[#allocation4 + $0x448] ss:$16 sps:$4 sm:$0xff]  }
 0x149   : > { %2441 = vmatpush1.bf16.msra.mxu0 %v4815_v22  ;;  %v4866_v22 = vld [vmem:[#allocation7 + $0x50] ss:$8 sps:$4 sm:$0xff]  }
 0x14a   : > { %2442 = vmatprep.subr.bf16.mxu0 %v4820_v53  ;;  %v4871_v53 = vld [vmem:[#allocation7 + $0x44] ss:$8 sps:$4 sm:$0xff]  }
 0x14c   : > { %2255 = vmatmul.mubr.bf16.gmra.mxu0 %v5465_v33  ;;  %v4832_v33 = vld [vmem:[#allocation4 + $0x42c] ss:$16 sps:$4 sm:$0xff]  }
 0x14d   : > { %2368 = vmatmul.mubr.bf16.gmra.mxu1 %v5467_v34  ;;  %2443 = vmatpush1.bf16.msra.mxu0 %v4818_v54  ;;  %v4830_v34 = vld [vmem:[#allocation4 + $0x428] ss:$16 sps:$4 sm:$0xff]  }
 0x14e   : > { %2264 = vmatprep.mubr.bf16.mxu0 %v5469_v36  ;;  %2444 = vmatprep.subr.bf16.mxu0 %v4823_v32  ;;  %v4835_v36 = vld [vmem:[#allocation4 + $0x40c] ss:$16 sps:$4 sm:$0xff]  }
 0x14f   : > { %2377 = vmatprep.mubr.bf16.mxu1 %v5471_v38  ;;  %v4833_v38 = vld [vmem:[#allocation4 + $0x408] ss:$16 sps:$4 sm:$0xff]  }
 0x151   : > { %2445 = vmatpush1.bf16.msra.mxu0 %v4821_v41 }
 0x152   : > { %2446 = vmatprep.subr.bf16.mxu0 %v4826_v15 }
 0x154   : > { %2265 = vmatmul.mubr.bf16.gmra.mxu0 %v5485_v49  ;;  %v4838_v49 = vld [vmem:[#allocation4 + $0x5ec] ss:$16 sps:$4 sm:$0xff]  }
 0x155   : > { %2378 = vmatmul.mubr.bf16.gmra.mxu1 %v5487_v50  ;;  %2447 = vmatpush1.bf16.msra.mxu0 %v4824_v16  ;;  %v4836_v50 = vld [vmem:[#allocation4 + $0x5e8] ss:$16 sps:$4 sm:$0xff]  }
 0x156   : > { %2274 = vmatprep.mubr.bf16.mxu0 %v5489_v52  ;;  %2448 = vmatprep.subr.bf16.mxu0 %v4829_v21  ;;  %v4841_v52 = vld [vmem:[#allocation4 + $0x5cc] ss:$16 sps:$4 sm:$0xff]  }
 0x157   : > { %2387 = vmatprep.mubr.bf16.mxu1 %v5491_v56  ;;  %v4839_v56 = vld [vmem:[#allocation4 + $0x5c8] ss:$16 sps:$4 sm:$0xff]   ;;  %v4869_v21 = vld [vmem:[#allocation7 + $0x40] ss:$8 sps:$4 sm:$0xff]  }
 0x159   : > { %2449 = vmatpush1.bf16.msra.mxu0 %v4827_v23 }
 0x15a   : > { %2450 = vmatprep.subr.bf16.mxu0 %v4832_v33 }
 0x15c   : > { %2275 = vmatmul.mubr.bf16.gmra.mxu0 %v5505_v3  ;;  %v4844_v3 = vld [vmem:[#allocation4 + $0x5ac] ss:$16 sps:$4 sm:$0xff]  }
 0x15d   : > { %2388 = vmatmul.mubr.bf16.gmra.mxu1 %v5507_v4  ;;  %2451 = vmatpush1.bf16.msra.mxu0 %v4830_v34  ;;  %v4842_v4 = vld [vmem:[#allocation4 + $0x5a8] ss:$16 sps:$4 sm:$0xff]  }
 0x15e   : > { %2284 = vmatprep.mubr.bf16.mxu0 %v5509_v6  ;;  %2452 = vmatprep.subr.bf16.mxu0 %v4835_v36  ;;  %v4847_v6 = vld [vmem:[#allocation4 + $0x58c] ss:$16 sps:$4 sm:$0xff]   ;;  %v4874_v34 = vld [vmem:[#allocation7 + $0x34] ss:$8 sps:$4 sm:$0xff]  }
 0x15f   : > { %2397 = vmatprep.mubr.bf16.mxu1 %v5511_v8  ;;  %v4845_v8 = vld [vmem:[#allocation4 + $0x588] ss:$16 sps:$4 sm:$0xff]  }
 0x161   : > { %2453 = vmatpush1.bf16.msra.mxu0 %v4833_v38 }
 0x162   : > { %2454 = vmatprep.subr.bf16.mxu0 %v4838_v49  ;;  %v4872_v49 = vld [vmem:[#allocation7 + $0x30] ss:$8 sps:$4 sm:$0xff]  }
 0x164   : > { %2285 = vmatmul.mubr.bf16.gmra.mxu0 %v5525_v24  ;;  %v4850_v24 = vld [vmem:[#allocation4 + $0x56c] ss:$16 sps:$4 sm:$0xff]  }
 0x165   : > { %2398 = vmatmul.mubr.bf16.gmra.mxu1 %v5527_v25  ;;  %2455 = vmatpush2.bf16.msra.mxu0 %v4836_v50  ;;  %v4848_v25 = vld [vmem:[#allocation4 + $0x568] ss:$16 sps:$4 sm:$0xff]  }
 0x166   : > { %2294 = vmatprep.mubr.bf16.mxu0 %v5529_v27  ;;  %2456 = vmatprep.subr.bf16.mxu0 %v4841_v52  ;;  %v4853_v27 = vld [vmem:[#allocation4 + $0x54c] ss:$16 sps:$4 sm:$0xff]   ;;  %v4910_v50 = vld [vmem:[#allocation7 + $0x174] ss:$8 sps:$4 sm:$0xff]   ;;  %v4877_v52 = vld [vmem:[#allocation7 + $0x24] ss:$8 sps:$4 sm:$0xff]  }
 0x167   : > { %2407 = vmatprep.mubr.bf16.mxu1 %v5531_v29  ;;  %v4851_v29 = vld [vmem:[#allocation4 + $0x548] ss:$16 sps:$4 sm:$0xff]   ;;  %3269 = vmatprep.subr.bf16.mxu1 %v4910_v50 }
 0x169   : > { %2457 = vmatpush2.bf16.msra.mxu0 %v4839_v56  ;;  %v4908_v56 = vld [vmem:[#allocation7 + $0x170] ss:$8 sps:$4 sm:$0xff]  }
 0x16a   : > { %2458 = vmatprep.subr.bf16.mxu0 %v4844_v3 }
 0x16c   : > { %2295 = vmatmul.mubr.bf16.gmra.mxu0 %v5545_v44  ;;  %v735_v44 = vlaneseq }
 0x16d   : > { %2408 = vmatmul.mubr.bf16.gmra.mxu1 %v5547_v45  ;;  %2459 = vmatpush2.bf16.msra.mxu0 %v4842_v4  ;;  %v4856_v45 = vld [vmem:[#allocation4 + $0x52c] ss:$16 sps:$4 sm:$0xff]  }
 0x16e   : > { %2304 = vmatprep.mubr.bf16.mxu0 %v5549_v47  ;;  %2460 = vmatprep.subr.bf16.mxu0 %v4847_v6  ;;  %v4854_v47 = vld [vmem:[#allocation4 + $0x528] ss:$16 sps:$4 sm:$0xff]  }
 0x16f   : > { %2417 = vmatprep.mubr.bf16.mxu1 %v5551_v51  ;;  %v5753_v51 = vshrl.u32 %v735_v44, 7 }
 0x171   : > { %2461 = vmatpush2.bf16.msra.mxu0 %v4845_v8  ;;  %6440 = vst [vmem:[#allocation24_spill] sm:$0xff] %v5753_v51  ;;  %v6411_v42 = vsub.s32 1, %v5753_v51  ;;  %v6442_v8 = vld [vmem:[#allocation14_spill] sm:$0xff] }
 0x172   : > { %2462 = vmatprep.subr.bf16.mxu0 %v4850_v24 }
 0x174   : > { %2305 = vmatmul.mubr.bf16.gmra.mxu0 %v5565_v2  ;;  %v4857_v2 = vld [vmem:[#allocation4 + $0x508] ss:$16 sps:$4 sm:$0xff]  }
 0x175   : > { %2418 = vmatmul.mubr.bf16.gmra.mxu1 %v5567_v5  ;;  %2463 = vmatpush2.bf16.msra.mxu0 %v4848_v25  ;;  %v6410_v5 = vsub.s32 0, %v5753_v51 }
 0x176   : > { %2314 = vmatprep.mubr.bf16.mxu0 %v5569_v9  ;;  %2464 = vmatprep.subr.bf16.mxu0 %v4853_v27  ;;  %v5760_v9 = vld [vmem:[#allocation6] sm:$0xf]  ;;  %v4875_v27 = vld [vmem:[#allocation7 + $0x20] ss:$8 sps:$4 sm:$0xff]  }
 0x177   : > { %2427 = vmatprep.mubr.bf16.mxu1 %v5571_v11  ;;  %6441 = vst [vmem:[#allocation25_spill] sm:$0xff] %v5760_v9  ;;  %v4862_v11 = vld [vmem:[#allocation7 + $0x74] ss:$8 sps:$4 sm:$0xff]  }
 0x179   : > { %2465 = vmatpush2.bf16.msra.mxu0 %v4851_v29  ;;  %v4913_v29 = vld [vmem:[#allocation7 + $0x164] ss:$8 sps:$4 sm:$0xff]  }
 0x17a   : > { %2466 = vmatprep.subr.bf16.mxu0 %v4856_v45 }
 0x17c   : > { %2315 = vmatmul.mubr.bf16.gmra.mxu0 %v5583_v26  ;;  %v5766_v26 = vrot.slane %v5760_v9, %v6410_v5 }
 0x17d   : > { %2428 = vmatmul.mubr.bf16.gmra.mxu1 %v5585_v28  ;;  %2467 = vmatpush2.bf16.msra.mxu0 %v4854_v47  ;;  %v4860_v28 = vld [vmem:[#allocation7 + $0x70] ss:$8 sps:$4 sm:$0xff]  }
 0x17e   : > { %2470 = vmatprep.mubr.bf16.mxu0 %v5587_v31  ;;  %2468 = vmatprep.subr.bf16.mxu0 %v4859_v46  ;;  %v5771_v31 = vrot.slane %v5760_v9, %v6411_v42 }
 0x17f   : > { %2583 = vmatprep.mubr.bf16.mxu1 %v6436_v20 }
 0x181   : > { %2469 = vmatpush2.bf16.msra.mxu0 %v4857_v2 }
 0x182   : > { %3156 = vmatprep.subr.bf16.mxu0 %v4862_v11 }
 0x184   : > { %v1794_v7 = vpop.f32.mrf.mxu0  ;;  %2471 = vmatmul.mubr.bf16.vlgmr.msra.gmra.mxu0 %v5597_v55 }
 0x185   : > { %v1907_v59 = vpop.f32.mrf.mxu1  ;;  %4227 = vmatmul.mubr.msk.bf16.vlgmr.msra.gmra.mxu1 %vm1735_vm0, %v5599_v57  ;;  %v1795_v61 = vadd.f32 %v1794_v7, %v5766_v26  ;;  %2480 = vmatprep.mubr.bf16.mxu0 %v5603_v63  ;;  %v4916_v7 = vld [vmem:[#allocation7 + $0x154] ss:$8 sps:$4 sm:$0xff]  }
 0x186   : > { %2593 = vmatprep.mubr.bf16.mxu1 %v6436_v20  ;;  %v1796_v1 = vpop.f32.mrf.mxu0  ;;  %3157 = vmatpush1.bf16.msra.mxu0 %v4860_v28 }
 0x187   : > { %v1909_v12 = vpop.f32.mrf.mxu1  ;;  %v5779_v30 = vadd.f32 %v1907_v59, %v1795_v61  ;;  %v1797_v17 = vadd.f32 %v1796_v1, %v5771_v31  ;;  %3158 = vmatprep.subr.bf16.mxu0 %v4865_v58  ;;  %3270 = vmatpush1.bf16.msra.mxu1 %v4908_v56  ;;  %v4878_v58 = vld [vmem:[#allocation7 + $0x10] ss:$8 sps:$4 sm:$0xff]   ;;  %v4883_v59 = vld [vmem:[#allocation7 + $0x4] ss:$8 sps:$4 sm:$0xff]  }
 0x188   : > { %v5782_v55 = vpop.f32.mrf.mxu0  ;;  %3271 = vmatprep.subr.bf16.mxu1 %v4913_v29  ;;  %v4914_v61 = vld [vmem:[#allocation7 + $0x150] ss:$8 sps:$4 sm:$0xff]   ;;  %v6447_v29 = vld [vmem:[#allocation19_spill] sm:$0xff] }
 0x189   : > { %v5784_v35 = vpop.f32.mrf.mxu1  ;;  %v5786_v57 = vadd.f32 %v1909_v12, %v1797_v17  ;;  %v6444_v17 = vld [vmem:[#allocation16_spill] sm:$0xff] }
 0x18a   : > { %v5788_v37 = vpop.f32.mrf.mxu0  ;;  %3159 = vmatpush1.bf16.msra.mxu0 %v4863_v13  ;;  %v6443_v13 = vld [vmem:[#allocation15_spill] sm:$0xff] }
 0x18b   : > { %v5790_v63 = vpop.f32.mrf.mxu1  ;;  %3160 = vmatprep.subr.bf16.mxu0 %v4868_v43 }
 0x18c   : > { %v1804_v54 = vpop.f32.mrf.mxu0  ;;  %2481 = vmatmul.mubr.bf16.gmra.mxu0 %v5615_v18 }
 0x18d   : > { %v1917_v32 = vpop.f32.mrf.mxu1  ;;  %4228 = vmatmul.mubr.msk.bf16.gmra.mxu1 %vm1735_vm0, %v5617_v19  ;;  %v1805_v41 = vadd.f32 %v1804_v54, %v5766_v26  ;;  %2490 = vmatprep.mubr.bf16.mxu0 %v5620_v40 }
 0x18e   : > { %2603 = vmatprep.mubr.bf16.mxu1 %v6436_v20  ;;  %v1806_v15 = vpop.f32.mrf.mxu0  ;;  %3161 = vmatpush1.bf16.msra.mxu0 %v4866_v22  ;;  %v6445_v22 = vld [vmem:[#allocation17_spill] sm:$0xff] }
 0x18f   : > { %v1919_v16 = vpop.f32.mrf.mxu1  ;;  %v5798_v23 = vadd.f32 %v1917_v32, %v1805_v41  ;;  %v1807_v33 = vadd.f32 %v1806_v15, %v5771_v31  ;;  %3162 = vmatprep.subr.bf16.mxu0 %v4871_v53  ;;  %v4881_v32 = vld [vmem:[#allocation7] ss:$8 sps:$4 sm:$0xff]   ;;  %v4919_v41 = vld [vmem:[#allocation7 + $0x144] ss:$8 sps:$4 sm:$0xff]  }
 0x190   : > { %v5801_v18 = vpop.f32.mrf.mxu0 }
 0x191   : > { %v5803_v36 = vpop.f32.mrf.mxu1  ;;  %v5805_v19 = vadd.f32 %v1919_v16, %v1807_v33  ;;  %v4917_v33 = vld [vmem:[#allocation7 + $0x140] ss:$8 sps:$4 sm:$0xff]   ;;  %v1809_v51 = vadd.f32 %v5801_v18, %v5766_v26 }
 0x192   : > { %v5807_v38 = vpop.f32.mrf.mxu0  ;;  %3163 = vmatpush1.bf16.msra.mxu0 %v4869_v21  ;;  %v4886_v21 = vld [vmem:[#allocation7 + $0xf4] ss:$8 sps:$4 sm:$0xff]  }
 0x193   : > { %v5809_v40 = vpop.f32.mrf.mxu1  ;;  %3164 = vmatprep.subr.bf16.mxu0 %v4874_v34 }
 0x194   : > { %v1814_v3 = vpop.f32.mrf.mxu0  ;;  %2491 = vmatmul.mubr.bf16.gmra.mxu0 %v5631_v62  ;;  %v4880_v62 = vld [vmem:[#allocation7 + $0x14] ss:$8 sps:$4 sm:$0xff]  }
 0x195   : > { %v1927_v4 = vpop.f32.mrf.mxu1  ;;  %4229 = vmatmul.mubr.msk.bf16.gmra.mxu1 %vm1735_vm0, %v5633_v0  ;;  %v1815_v6 = vadd.f32 %v1814_v3, %v5766_v26  ;;  %2500 = vmatprep.mubr.bf16.mxu0 %v6442_v8  ;;  %v4911_v0 = vld [vmem:[#allocation7 + $0x160] ss:$8 sps:$4 sm:$0xff]   ;;  %v4884_v3 = vld [vmem:[#allocation7 + $0xf0] ss:$8 sps:$4 sm:$0xff]  }
 0x196   : > { %2613 = vmatprep.mubr.bf16.mxu1 %v6436_v20  ;;  %v1816_v24 = vpop.f32.mrf.mxu0  ;;  %3165 = vmatpush1.bf16.msra.mxu0 %v4872_v49  ;;  %v4920_v8 = vld [vmem:[#allocation7 + $0x130] ss:$8 sps:$4 sm:$0xff]  }
 0x197   : > { %v1929_v25 = vpop.f32.mrf.mxu1  ;;  %v5817_v44 = vadd.f32 %v1927_v4, %v1815_v6  ;;  %v1817_v45 = vadd.f32 %v1816_v24, %v5771_v31  ;;  %3166 = vmatprep.subr.bf16.mxu0 %v4877_v52  ;;  %3272 = vmatpush1.bf16.msra.mxu1 %v4911_v0  ;;  %v4922_v4 = vld [vmem:[#allocation7 + $0x134] ss:$8 sps:$4 sm:$0xff]   ;;  %v4889_v6 = vld [vmem:[#allocation7 + $0xe4] ss:$8 sps:$4 sm:$0xff]  }
 0x198   : > { %v5820_v47 = vpop.f32.mrf.mxu0  ;;  %3273 = vmatprep.subr.bf16.mxu1 %v4916_v7  ;;  %v4887_v7 = vld [vmem:[#allocation7 + $0xe0] ss:$8 sps:$4 sm:$0xff]  }
 0x199   : > { %v5822_v46 = vpop.f32.mrf.mxu1  ;;  %v5824_v2 = vadd.f32 %v1929_v25, %v1817_v45 }
 0x19a   : > { %v5826_v11 = vpop.f32.mrf.mxu0  ;;  %3167 = vmatpush1.bf16.msra.mxu0 %v4875_v27  ;;  %v6446_v27 = vld [vmem:[#allocation18_spill] sm:$0xff] }
 0x19b   : > { %v5828_v28 = vpop.f32.mrf.mxu1  ;;  %3168 = vmatprep.subr.bf16.mxu0 %v4880_v62  ;;  %3274 = vmatpush1.bf16.msra.mxu1 %v4914_v61  ;;  %v6448_v62 = vld [vmem:[#allocation20_spill] sm:$0xff] }
 0x19c   : > { %v1824_v1 = vpop.f32.mrf.mxu0  ;;  %2501 = vmatmul.mubr.bf16.gmra.mxu0 %v6443_v13  ;;  %3275 = vmatprep.subr.bf16.mxu1 %v4919_v41  ;;  %v4923_v13 = vld [vmem:[#allocation7 + $0x120] ss:$8 sps:$4 sm:$0xff]   ;;  %v4928_v41 = vld [vmem:[#allocation7 + $0x114] ss:$8 sps:$4 sm:$0xff]  }
 0x19d   : > { %v1937_v12 = vpop.f32.mrf.mxu1  ;;  %4230 = vmatmul.mubr.msk.bf16.gmra.mxu1 %vm1735_vm0, %v6444_v17  ;;  %v1825_v43 = vadd.f32 %v1824_v1, %v5766_v26  ;;  %2510 = vmatprep.mubr.bf16.mxu0 %v6445_v22 }
 0x19e   : > { %2623 = vmatprep.mubr.bf16.mxu1 %v6436_v20  ;;  %v1826_v53 = vpop.f32.mrf.mxu0  ;;  %3169 = vmatpush1.bf16.msra.mxu0 %v4878_v58 }
 0x19f   : > { %v1939_v54 = vpop.f32.mrf.mxu1  ;;  %v5836_v15 = vadd.f32 %v1937_v12, %v1825_v43  ;;  %v1827_v16 = vadd.f32 %v1826_v53, %v5771_v31  ;;  %3170 = vmatprep.subr.bf16.mxu0 %v4883_v59  ;;  %3276 = vmatpush1.bf16.msra.mxu1 %v4917_v33  ;;  %v4925_v59 = vld [vmem:[#allocation7 + $0x124] ss:$8 sps:$4 sm:$0xff]   ;;  %v4892_v12 = vld [vmem:[#allocation7 + $0xd4] ss:$8 sps:$4 sm:$0xff]  }
 0x1a0   : > { %v5839_v34 = vpop.f32.mrf.mxu0  ;;  %3277 = vmatprep.subr.bf16.mxu1 %v4922_v4  ;;  %v6449_v4 = vld [vmem:[#allocation21_spill] sm:$0xff] }
 0x1a1   : > { %v5841_v49 = vpop.f32.mrf.mxu1  ;;  %v5843_v50 = vadd.f32 %v1939_v54, %v1827_v16  ;;  %v4895_v16 = vld [vmem:[#allocation7 + $0xc4] ss:$8 sps:$4 sm:$0xff]  }
 0x1a2   : > { %v5845_v52 = vpop.f32.mrf.mxu0  ;;  %3171 = vmatpush1.bf16.msra.mxu0 %v4881_v32  ;;  %v4890_v32 = vld [vmem:[#allocation7 + $0xd0] ss:$8 sps:$4 sm:$0xff]  }
 0x1a3   : > { %v5847_v56 = vpop.f32.mrf.mxu1  ;;  %3172 = vmatprep.subr.bf16.mxu0 %v4886_v21  ;;  %3278 = vmatpush1.bf16.msra.mxu1 %v4920_v8  ;;  %v4926_v21 = vld [vmem:[#allocation7 + $0x110] ss:$8 sps:$4 sm:$0xff]  }
 0x1a4   : > { %v1834_v24 = vpop.f32.mrf.mxu0  ;;  %2511 = vmatmul.mubr.bf16.gmra.mxu0 %v6446_v27  ;;  %3279 = vmatprep.subr.bf16.mxu1 %v4925_v59 }
 0x1a5   : > { %v1947_v25 = vpop.f32.mrf.mxu1  ;;  %4231 = vmatmul.mubr.msk.bf16.gmra.mxu1 %vm1735_vm0, %v6447_v29  ;;  %v1835_v45 = vadd.f32 %v1834_v24, %v5766_v26  ;;  %2520 = vmatprep.mubr.bf16.mxu0 %v6448_v62  ;;  %v6451_v24 = vld [vmem:[#allocation23_spill] sm:$0xff] }
 0x1a6   : > { %2633 = vmatprep.mubr.bf16.mxu1 %v6436_v20  ;;  %v1836_v0 = vpop.f32.mrf.mxu0  ;;  %3173 = vmatpush2.bf16.msra.mxu0 %v4884_v3  ;;  %v4893_v29 = vld [vmem:[#allocation7 + $0xc0] ss:$8 sps:$4 sm:$0xff]  }
 0x1a7   : > { %v1949_v58 = vpop.f32.mrf.mxu1  ;;  %v5855_v61 = vadd.f32 %v1947_v25, %v1835_v45  ;;  %v1837_v1 = vadd.f32 %v1836_v0, %v5771_v31  ;;  %3174 = vmatprep.subr.bf16.mxu0 %v4889_v6  ;;  %3280 = vmatpush1.bf16.msra.mxu1 %v4923_v13  ;;  %v6450_v6 = vld [vmem:[#allocation22_spill] sm:$0xff] }
 0x1a8   : > { %v5858_v17 = vpop.f32.mrf.mxu0  ;;  %3281 = vmatprep.subr.bf16.mxu1 %v4928_v41  ;;  %v4931_v45 = vld [vmem:[#allocation7 + $0x104] ss:$8 sps:$4 sm:$0xff]   ;;  %v4896_v41 = vld [vmem:[#allocation7 + $0xb0] ss:$8 sps:$4 sm:$0xff]  }
 0x1a9   : > { %v5860_v43 = vpop.f32.mrf.mxu1  ;;  %v5862_v22 = vadd.f32 %v1949_v58, %v1837_v1  ;;  %v4898_v58 = vld [vmem:[#allocation7 + $0xb4] ss:$8 sps:$4 sm:$0xff]  }
 0x1aa   : > { %v5864_v53 = vpop.f32.mrf.mxu0  ;;  %3175 = vmatpush2.bf16.msra.mxu0 %v4887_v7  ;;  %v4929_v7 = vld [vmem:[#allocation7 + $0x100] ss:$8 sps:$4 sm:$0xff]  }
 0x1ab   : > { %v5866_v54 = vpop.f32.mrf.mxu1  ;;  %3176 = vmatprep.subr.bf16.mxu0 %v4892_v12  ;;  %3282 = vmatpush1.bf16.msra.mxu1 %v4926_v21 }
 0x1ac   : > { %v1844_v33 = vpop.f32.mrf.mxu0  ;;  %2521 = vmatmul.mubr.bf16.gmra.mxu0 %v6449_v4  ;;  %3283 = vmatprep.subr.bf16.mxu1 %v4931_v45 }
 0x1ad   : > { %v1957_v3 = vpop.f32.mrf.mxu1  ;;  %4232 = vmatmul.mubr.msk.bf16.gmra.mxu1 %vm1735_vm0, %v6450_v6  ;;  %v1845_v8 = vadd.f32 %v1844_v33, %v5766_v26  ;;  %2530 = vmatprep.mubr.bf16.mxu0 %v6451_v24  ;;  %v4934_v33 = vld [vmem:[#allocation7 + $0x1f4] ss:$8 sps:$4 sm:$0xff]  }
 0x1ae   : > { %2643 = vmatprep.mubr.bf16.mxu1 %v6436_v20  ;;  %v1846_v25 = vpop.f32.mrf.mxu0  ;;  %3177 = vmatpush2.bf16.msra.mxu0 %v4890_v32 }
 0x1af   : > { %v1959_v27 = vpop.f32.mrf.mxu1  ;;  %v5874_v62 = vadd.f32 %v1957_v3, %v1845_v8  ;;  %v1847_v0 = vadd.f32 %v1846_v25, %v5771_v31  ;;  %3178 = vmatprep.subr.bf16.mxu0 %v4895_v16  ;;  %v4901_v3 = vld [vmem:[#allocation7 + $0xa4] ss:$8 sps:$4 sm:$0xff]   ;;  %3284 = vmatpush1.bf16.msra.mxu1 %v4929_v7  ;;  %v4932_v16 = vld [vmem:[#allocation7 + $0x1f0] ss:$8 sps:$4 sm:$0xff]   ;;  %v4899_v25 = vld [vmem:[#allocation7 + $0xa0] ss:$8 sps:$4 sm:$0xff]  }
 0x1b0   : > { %v5877_v59 = vpop.f32.mrf.mxu0  ;;  %3285 = vmatprep.subr.bf16.mxu1 %v4934_v33  ;;  %v4940_v33 = vld [vmem:[#allocation7 + $0x1d4] ss:$8 sps:$4 sm:$0xff]  }
 0x1b1   : > { %v5879_v1 = vpop.f32.mrf.mxu1  ;;  %v5881_v12 = vadd.f32 %v1959_v27, %v1847_v0  ;;  %v4937_v27 = vld [vmem:[#allocation7 + $0x1e4] ss:$8 sps:$4 sm:$0xff]  }
 0x1b2   : > { %v5883_v13 = vpop.f32.mrf.mxu0  ;;  %3179 = vmatpush2.bf16.msra.mxu0 %v4893_v29 }
 0x1b3   : > { %v5885_v32 = vpop.f32.mrf.mxu1  ;;  %3180 = vmatprep.subr.bf16.mxu0 %v4898_v58  ;;  %3286 = vmatpush2.bf16.msra.mxu1 %v4932_v16 }
 0x1b4   : > { %v1854_v21 = vpop.f32.mrf.mxu0  ;;  %2531 = vmatmul.mubr.bf16.gmra.mxu0 %v5700_v48  ;;  %v4904_v48 = vld [vmem:[#allocation7 + $0x94] ss:$8 sps:$4 sm:$0xff]   ;;  %3287 = vmatprep.subr.bf16.mxu1 %v4937_v27  ;;  %v4943_v27 = vld [vmem:[#allocation7 + $0x1c4] ss:$8 sps:$4 sm:$0xff]  }
 0x1b5   : > { %v1967_v4 = vpop.f32.mrf.mxu1  ;;  %4233 = vmatmul.mubr.msk.bf16.gmra.mxu1 %vm1735_vm0, %v5702_v39  ;;  %v1855_v6 = vadd.f32 %v1854_v21, %v5766_v26  ;;  %2540 = vmatprep.mubr.bf16.mxu0 %v5705_v14  ;;  %v4935_v39 = vld [vmem:[#allocation7 + $0x1e0] ss:$8 sps:$4 sm:$0xff]   ;;  %v4907_v21 = vld [vmem:[#allocation7 + $0x84] ss:$8 sps:$4 sm:$0xff]  }
 0x1b6   : > { %2653 = vmatprep.mubr.bf16.mxu1 %v6436_v20  ;;  %v1856_v8 = vpop.f32.mrf.mxu0  ;;  %3181 = vmatpush2.bf16.msra.mxu0 %v4896_v41  ;;  %v4902_v41 = vld [vmem:[#allocation7 + $0x90] ss:$8 sps:$4 sm:$0xff]  }
 0x1b7   : > { %v1969_v24 = vpop.f32.mrf.mxu1  ;;  %v5893_v29 = vadd.f32 %v1967_v4, %v1855_v6  ;;  %v1857_v45 = vadd.f32 %v1856_v8, %v5771_v31  ;;  %3182 = vmatprep.subr.bf16.mxu0 %v4901_v3  ;;  %3288 = vmatpush2.bf16.msra.mxu1 %v4935_v39  ;;  %v4938_v3 = vld [vmem:[#allocation7 + $0x1d0] ss:$8 sps:$4 sm:$0xff]   ;;  %v4941_v39 = vld [vmem:[#allocation7 + $0x1c0] ss:$8 sps:$4 sm:$0xff]  }
 0x1b8   : > { %v5896_v0 = vpop.f32.mrf.mxu0  ;;  %3289 = vmatprep.subr.bf16.mxu1 %v4940_v33 }
 0x1b9   : > { %v5898_v58 = vpop.f32.mrf.mxu1  ;;  %v5900_v20 = vadd.f32 %v1969_v24, %v1857_v45 }
 0x1ba   : > { %v5902_v14 = vpop.f32.mrf.mxu0  ;;  %3183 = vmatpush2.bf16.msra.mxu0 %v4899_v25  ;;  %v4905_v25 = vld [vmem:[#allocation7 + $0x80] ss:$8 sps:$4 sm:$0xff]  }
 0x1bb   : > { %v5904_v7 = vpop.f32.mrf.mxu1  ;;  %3184 = vmatprep.subr.bf16.mxu0 %v4904_v48  ;;  %3290 = vmatpush2.bf16.msra.mxu1 %v4938_v3 }
 0x1bc   : > { %v1864_v16 = vpop.f32.mrf.mxu0  ;;  %2541 = vmatmul.mubr.bf16.gmra.mxu0 %v5716_v60  ;;  %3291 = vmatprep.subr.bf16.mxu1 %v4943_v27 }
 0x1bd   : > { %v1977_v4 = vpop.f32.mrf.mxu1  ;;  %4234 = vmatmul.mubr.msk.bf16.gmra.mxu1 %vm1735_vm0, %v5718_v10  ;;  %v1865_v6 = vadd.f32 %v1864_v16, %v5766_v26 }
 0x1be   : > { %v1866_v8 = vpop.f32.mrf.mxu0  ;;  %3185 = vmatpush2.bf16.msra.mxu0 %v4902_v41  ;;  %v4946_v41 = vld [vmem:[#allocation7 + $0x1b4] ss:$8 sps:$4 sm:$0xff]  }
 0x1bf   : > { %v1979_v24 = vpop.f32.mrf.mxu1  ;;  %v5910_v45 = vadd.f32 %v1977_v4, %v1865_v6  ;;  %v1867_v48 = vadd.f32 %v1866_v8, %v5771_v31  ;;  %3186 = vmatprep.subr.bf16.mxu0 %v4907_v21  ;;  %v1799_v4 = vadd.f32 %v5782_v55, %v5766_v26  ;;  %3292 = vmatpush2.bf16.msra.mxu1 %v4941_v39  ;;  %v4944_v21 = vld [vmem:[#allocation7 + $0x1b0] ss:$8 sps:$4 sm:$0xff]  }
 0x1c0   : > { %v5913_v5 = vpop.f32.mrf.mxu0  ;;  %3293 = vmatprep.subr.bf16.mxu1 %v4946_v41  ;;  %v1801_v8 = vadd.f32 %v5788_v37, %v5771_v31  ;;  %v4952_v37 = vld [vmem:[#allocation7 + $0x194] ss:$8 sps:$4 sm:$0xff]  }
 0x1c1   : > { %6452 = vst [vmem:[#allocation14_spill] sm:$0xff] %v5910_v45  ;;  %6453 = vst [vmem:[#allocation15_spill] sm:$0xff] %v5913_v5  ;;  %v5915_v60 = vpop.f32.mrf.mxu1  ;;  %v5917_v10 = vadd.f32 %v1979_v24, %v1867_v48  ;;  %v4949_v48 = vld [vmem:[#allocation7 + $0x1a4] ss:$8 sps:$4 sm:$0xff]   ;;  %v1912_v42 = vadd.f32 %v5784_v35, %v1799_v4  ;;  %v1922_v5 = vadd.f32 %v5803_v36, %v1809_v51 }
 0x1c2   : > { %6454 = vst [vmem:[#allocation16_spill] sm:$0xff] %v5915_v60  ;;  %v5919_v33 = vpop.f32.mrf.mxu0  ;;  %3187 = vmatpush2.bf16.msra.mxu0 %v4905_v25  ;;  %v4947_v25 = vld [vmem:[#allocation7 + $0x1a0] ss:$8 sps:$4 sm:$0xff]   ;;  %v1914_v45 = vadd.f32 %v5790_v63, %v1801_v8 }
 0x1c3   : > { %6455 = vst [vmem:[#allocation17_spill] sm:$0xff] %v5917_v10  ;;  %6456 = vst [vmem:[#allocation18_spill] sm:$0xff] %v5919_v33  ;;  %v5921_v16 = vpop.f32.mrf.mxu1  ;;  %3294 = vmatpush2.bf16.msra.mxu1 %v4944_v21 }
 0x1c4   : > { %6457 = vst [vmem:[#allocation19_spill] sm:$0xff] %v5921_v16  ;;  %v2020_v3 = vpop.f32.mrf.mxu0  ;;  %3295 = vmatprep.subr.bf16.mxu1 %v4949_v48 }
 0x1c5   : > { %v2133_v6 = vpop.f32.mrf.mxu1  ;;  %v2021_v16 = vadd.f32 %v2020_v3, %v5779_v30  ;;  %v1811_v3 = vadd.f32 %v5807_v38, %v5771_v31 }
 0x1c6   : > { %v2022_v27 = vpop.f32.mrf.mxu0 }
 0x1c7   : > { %v2135_v24 = vpop.f32.mrf.mxu1  ;;  %v2023_v9 = vadd.f32 %v2022_v27, %v5786_v57  ;;  %3296 = vmatpush2.bf16.msra.mxu1 %v4947_v25  ;;  %v4950_v57 = vld [vmem:[#allocation7 + $0x190] ss:$8 sps:$4 sm:$0xff]   ;;  %v2134_v21 = vadd.f32 %v2133_v6, %v2021_v16  ;;  %v1924_v38 = vadd.f32 %v5809_v40, %v1811_v3  ;;  %v1821_v40 = vadd.f32 %v5826_v11, %v5771_v31 }
 0x1c8   : > { %v2024_v55 = vpop.f32.mrf.mxu0  ;;  %3297 = vmatprep.subr.bf16.mxu1 %v4952_v37 }
 0x1c9   : > { %v2137_v39 = vpop.f32.mrf.mxu1  ;;  %v2025_v41 = vadd.f32 %v2024_v55, %v1912_v42  ;;  %v2136_v33 = vadd.f32 %v2135_v24, %v2023_v9  ;;  %v4955_v55 = vld [vmem:[#allocation7 + $0x184] ss:$8 sps:$4 sm:$0xff]   ;;  %v2664_v16 = vmax.f32 %v2134_v21, 0.0 }
 0x1ca   : > { %v2026_v10 = vpop.f32.mrf.mxu0 }
 0x1cb   : > { %v2139_v60 = vpop.f32.mrf.mxu1  ;;  %v2138_v35 = vadd.f32 %v2137_v39, %v2025_v41  ;;  %v2027_v4 = vadd.f32 %v2026_v10, %v1914_v45  ;;  %v2665_v18 = vmax.f32 %v2136_v33, 0.0  ;;  %3298 = vmatpush2.bf16.msra.mxu1 %v4950_v57  ;;  %v4953_v10 = vld [vmem:[#allocation7 + $0x180] ss:$8 sps:$4 sm:$0xff]   ;;  %v1819_v41 = vadd.f32 %v5820_v47, %v5766_v26 }
 0x1cc   : > { %v2030_v27 = vpop.f32.mrf.mxu0  ;;  %3299 = vmatprep.subr.bf16.mxu1 %v4955_v55 }
 0x1cd   : > { %v2143_v30 = vpop.f32.mrf.mxu1  ;;  %v2140_v63 = vadd.f32 %v2139_v60, %v2027_v4  ;;  %v2668_v42 = vmax.f32 %v2138_v35, 0.0  ;;  %v2031_v6 = vadd.f32 %v2030_v27, %v5798_v23  ;;  %v1932_v47 = vadd.f32 %v5822_v46, %v1819_v41 }
 0x1ce   : > { %v2032_v8 = vpop.f32.mrf.mxu0 }
 0x1cf   : > { %v2145_v48 = vpop.f32.mrf.mxu1  ;;  %v2669_v9 = vmax.f32 %v2140_v63, 0.0  ;;  %v2033_v45 = vadd.f32 %v2032_v8, %v5805_v19  ;;  %v2728_v51 = vpack.c.bf16 %v2668_v42, %v2664_v16  ;;  %3300 = vmatpush2.bf16.msra.mxu1 %v4953_v10  ;;  %v2144_v4 = vadd.f32 %v2143_v30, %v2031_v6 }
 0x1d0   : > { %v2034_v24 = vpop.f32.mrf.mxu0 }
 0x1d1   : > { %v2147_v25 = vpop.f32.mrf.mxu1  ;;  %v2035_v60 = vadd.f32 %v2034_v24, %v1922_v5  ;;  %v2729_v39 = vpack.c.bf16 %v2669_v9, %v2665_v18  ;;  %v2146_v37 = vadd.f32 %v2145_v48, %v2033_v45  ;;  %v2672_v48 = vmax.f32 %v2144_v4, 0.0 }
 0x1d2   : > { %v2036_v36 = vpop.f32.mrf.mxu0  ;;  %v1934_v9 = vadd.f32 %v5828_v28, %v1821_v40  ;;  %v1829_v24 = vadd.f32 %v5839_v34, %v5766_v26 }
 0x1d3   : > { %v2149_v33 = vpop.f32.mrf.mxu1  ;;  %v2148_v19 = vadd.f32 %v2147_v25, %v2035_v60  ;;  %v2037_v35 = vadd.f32 %v2036_v36, %v1924_v38  ;;  %3188 = vmatprep.mubr.bf16.mxu0 %v2729_v39  ;;  %v2673_v63 = vmax.f32 %v2146_v37, 0.0 }
 0x1d4   : > { %v2040_v23 = vpop.f32.mrf.mxu0  ;;  %3189 = vmatmul.mubr.bf16.vlgmr.msra.gmra.mxu0 %v2728_v51 }
 0x1d5   : > { %v2153_v57 = vpop.f32.mrf.mxu1  ;;  %v2150_v5 = vadd.f32 %v2149_v33, %v2037_v35  ;;  %v2676_v21 = vmax.f32 %v2148_v19, 0.0  ;;  %v2041_v55 = vadd.f32 %v2040_v23, %v5817_v44  ;;  %v1831_v44 = vadd.f32 %v5845_v52, %v5771_v31 }
 0x1d6   : > { %v2042_v27 = vpop.f32.mrf.mxu0  ;;  %v1942_v33 = vadd.f32 %v5841_v49, %v1829_v24 }
 0x1d7   : > { %v2155_v3 = vpop.f32.mrf.mxu1  ;;  %v2677_v42 = vmax.f32 %v2150_v5, 0.0  ;;  %v2043_v8 = vadd.f32 %v2042_v27, %v5824_v2  ;;  %v2732_v11 = vpack.c.bf16 %v2676_v21, %v2672_v48  ;;  %v2154_v2 = vadd.f32 %v2153_v57, %v2041_v55 }
 0x1d8   : > { %v2044_v30 = vpop.f32.mrf.mxu0  ;;  %v1944_v40 = vadd.f32 %v5847_v56, %v1831_v44 }
 0x1d9   : > { %v2157_v18 = vpop.f32.mrf.mxu1  ;;  %v2045_v45 = vadd.f32 %v2044_v30, %v1932_v47  ;;  %v2733_v10 = vpack.c.bf16 %v2677_v42, %v2673_v63  ;;  %v2156_v46 = vadd.f32 %v2155_v3, %v2043_v8  ;;  %v2680_v35 = vmax.f32 %v2154_v2, 0.0 }
 0x1da   : > { %v2046_v16 = vpop.f32.mrf.mxu0  ;;  %v1839_v47 = vadd.f32 %v5858_v17, %v5766_v26 }
 0x1db   : > { %v2159_v6 = vpop.f32.mrf.mxu1  ;;  %v2158_v25 = vadd.f32 %v2157_v18, %v2045_v45  ;;  %v2047_v38 = vadd.f32 %v2046_v16, %v1934_v9  ;;  %3198 = vmatprep.mubr.bf16.mxu0 %v2733_v10  ;;  %v2681_v37 = vmax.f32 %v2156_v46, 0.0 }
 0x1dc   : > { %v2050_v60 = vpop.f32.mrf.mxu0  ;;  %3199 = vmatmul.mubr.bf16.gmra.mxu0 %v2732_v11  ;;  %v1952_v9 = vadd.f32 %v5860_v43, %v1839_v47  ;;  %v1859_v47 = vadd.f32 %v5896_v0, %v5766_v26 }
 0x1dd   : > { %v2163_v39 = vpop.f32.mrf.mxu1  ;;  %v2160_v28 = vadd.f32 %v2159_v6, %v2047_v38  ;;  %v2684_v41 = vmax.f32 %v2158_v25, 0.0  ;;  %v2051_v4 = vadd.f32 %v2050_v60, %v5836_v15  ;;  %v1841_v15 = vadd.f32 %v5864_v53, %v5771_v31 }
 0x1de   : > { %v2052_v51 = vpop.f32.mrf.mxu0 }
 0x1df   : > { %v2165_v36 = vpop.f32.mrf.mxu1  ;;  %v2685_v19 = vmax.f32 %v2160_v28, 0.0  ;;  %v2053_v34 = vadd.f32 %v2052_v51, %v5843_v50  ;;  %v2736_v52 = vpack.c.bf16 %v2684_v41, %v2680_v35  ;;  %v2164_v50 = vadd.f32 %v2163_v39, %v2051_v4 }
 0x1e0   : > { %v2054_v23 = vpop.f32.mrf.mxu0  ;;  %v1954_v46 = vadd.f32 %v5866_v54, %v1841_v15  ;;  %v1849_v39 = vadd.f32 %v5877_v59, %v5766_v26 }
 0x1e1   : > { %v2167_v57 = vpop.f32.mrf.mxu1  ;;  %v2055_v5 = vadd.f32 %v2054_v23, %v1942_v33  ;;  %v2737_v21 = vpack.c.bf16 %v2685_v19, %v2681_v37  ;;  %v2166_v49 = vadd.f32 %v2165_v36, %v2053_v34  ;;  %v2688_v11 = vmax.f32 %v2164_v50, 0.0 }
 0x1e2   : > { %v2056_v27 = vpop.f32.mrf.mxu0  ;;  %v1962_v19 = vadd.f32 %v5879_v1, %v1849_v39 }
 0x1e3   : > { %v2169_v3 = vpop.f32.mrf.mxu1  ;;  %v2168_v63 = vadd.f32 %v2167_v57, %v2055_v5  ;;  %v2057_v42 = vadd.f32 %v2056_v27, %v1944_v40  ;;  %3208 = vmatprep.mubr.bf16.mxu0 %v2737_v21  ;;  %v2689_v45 = vmax.f32 %v2166_v49, 0.0 }
 0x1e4   : > { %v2060_v8 = vpop.f32.mrf.mxu0  ;;  %3209 = vmatmul.mubr.bf16.gmra.mxu0 %v2736_v52 }
 0x1e5   : > { %v2173_v48 = vpop.f32.mrf.mxu1  ;;  %v2170_v56 = vadd.f32 %v2169_v3, %v2057_v42  ;;  %v2692_v55 = vmax.f32 %v2168_v63, 0.0  ;;  %v2061_v16 = vadd.f32 %v2060_v8, %v5855_v61  ;;  %v1851_v61 = vadd.f32 %v5883_v13, %v5771_v31 }
 0x1e6   : > { %v2062_v30 = vpop.f32.mrf.mxu0 }
 0x1e7   : > { %v2175_v18 = vpop.f32.mrf.mxu1  ;;  %v2693_v10 = vmax.f32 %v2170_v56, 0.0  ;;  %v2063_v17 = vadd.f32 %v2062_v30, %v5862_v22  ;;  %v2740_v53 = vpack.c.bf16 %v2692_v55, %v2688_v11  ;;  %v2174_v22 = vadd.f32 %v2173_v48, %v2061_v16 }
 0x1e8   : > { %v2064_v6 = vpop.f32.mrf.mxu0  ;;  %v1964_v5 = vadd.f32 %v5885_v32, %v1851_v61  ;;  %v1972_v56 = vadd.f32 %v5898_v58, %v1859_v47 }
 0x1e9   : > { %v2177_v24 = vpop.f32.mrf.mxu1  ;;  %v2065_v25 = vadd.f32 %v2064_v6, %v1952_v9  ;;  %v2741_v38 = vpack.c.bf16 %v2693_v10, %v2689_v45  ;;  %v2176_v43 = vadd.f32 %v2175_v18, %v2063_v17  ;;  %v2696_v4 = vmax.f32 %v2174_v22, 0.0 }
 0x1ea   : > { %v2066_v2 = vpop.f32.mrf.mxu0 }
 0x1eb   : > { %v2179_v60 = vpop.f32.mrf.mxu1  ;;  %v2178_v44 = vadd.f32 %v2177_v24, %v2065_v25  ;;  %v2067_v28 = vadd.f32 %v2066_v2, %v1954_v46  ;;  %3218 = vmatprep.mubr.bf16.mxu0 %v2741_v38  ;;  %v2697_v34 = vmax.f32 %v2176_v43, 0.0  ;;  %v6458_v46 = vld [vmem:[#allocation15_spill] sm:$0xff]  ;;  %v6460_v43 = vld [vmem:[#allocation24_spill] sm:$0xff] }
 0x1ec   : > { %v2070_v41 = vpop.f32.mrf.mxu0  ;;  %3219 = vmatmul.mubr.bf16.gmra.mxu0 %v2740_v53  ;;  %v1869_v25 = vadd.f32 %v6458_v46, %v5766_v26  ;;  %v6461_v26 = vld [vmem:[#allocation16_spill] sm:$0xff] }
 0x1ed   : > { %v2183_v51 = vpop.f32.mrf.mxu1  ;;  %v2180_v54 = vadd.f32 %v2179_v60, %v2067_v28  ;;  %v2700_v36 = vmax.f32 %v2178_v44, 0.0  ;;  %v2071_v23 = vadd.f32 %v2070_v41, %v5874_v62  ;;  %v1861_v62 = vadd.f32 %v5902_v14, %v5771_v31 }
 0x1ee   : > { %v2072_v33 = vpop.f32.mrf.mxu0  ;;  %v745_v44 = vsub.s32 2, %v6460_v43  ;;  %v1982_v61 = vadd.f32 %v6461_v26, %v1869_v25 }
 0x1ef   : > { %v2185_v37 = vpop.f32.mrf.mxu1  ;;  %v2701_v35 = vmax.f32 %v2180_v54, 0.0  ;;  %v2073_v59 = vadd.f32 %v2072_v33, %v5881_v12  ;;  %v2744_v13 = vpack.c.bf16 %v2700_v36, %v2696_v4  ;;  %v2184_v12 = vadd.f32 %v2183_v51, %v2071_v23  ;;  %v6462_v33 = vld [vmem:[#allocation17_spill] sm:$0xff] }
 0x1f0   : > { %v2074_v57 = vpop.f32.mrf.mxu0  ;;  %v1974_v17 = vadd.f32 %v5904_v7, %v1861_v62  ;;  %v749_v51 = vsub.s32 3, %v6460_v43 }
 0x1f1   : > { %v2187_v40 = vpop.f32.mrf.mxu1  ;;  %v2075_v21 = vadd.f32 %v2074_v57, %v1962_v19  ;;  %v2745_v52 = vpack.c.bf16 %v2701_v35, %v2697_v34  ;;  %v2186_v1 = vadd.f32 %v2185_v37, %v2073_v59  ;;  %v2704_v18 = vmax.f32 %v2184_v12, 0.0  ;;  %v6463_v34 = vld [vmem:[#allocation14_spill] sm:$0xff] }
 0x1f2   : > { %v2076_v27 = vpop.f32.mrf.mxu0 }
 0x1f3   : > { %v2189_v3 = vpop.f32.mrf.mxu1  ;;  %v2188_v49 = vadd.f32 %v2187_v40, %v2075_v21  ;;  %v2077_v63 = vadd.f32 %v2076_v27, %v1964_v5  ;;  %3228 = vmatprep.mubr.bf16.mxu0 %v2745_v52  ;;  %v2705_v55 = vmax.f32 %v2186_v1, 0.0  ;;  %v6465_v5 = vld [vmem:[#allocation25_spill] sm:$0xff] }
 0x1f4   : > { %v2080_v42 = vpop.f32.mrf.mxu0  ;;  %3229 = vmatmul.mubr.bf16.gmra.mxu0 %v2744_v13  ;;  %v5990_v21 = vrot.slane %v6465_v5, %v745_v44 }
 0x1f5   : > { %v2193_v50 = vpop.f32.mrf.mxu1  ;;  %v2190_v32 = vadd.f32 %v2189_v3, %v2077_v63  ;;  %v2708_v8 = vmax.f32 %v2188_v49, 0.0  ;;  %v2081_v9 = vadd.f32 %v2080_v42, %v5893_v29  ;;  %v6459_v29 = vld [vmem:[#allocation18_spill] sm:$0xff]  ;;  %v5993_v49 = vrot.slane %v6465_v5, %v749_v51 }
 0x1f6   : > { %v2082_v48 = vpop.f32.mrf.mxu0  ;;  %v1871_v39 = vadd.f32 %v6459_v29, %v5771_v31  ;;  %v6464_v31 = vld [vmem:[#allocation19_spill] sm:$0xff] }
 0x1f7   : > { %v2195_v15 = vpop.f32.mrf.mxu1  ;;  %v2709_v30 = vmax.f32 %v2190_v32, 0.0  ;;  %v2083_v0 = vadd.f32 %v2082_v48, %v5900_v20  ;;  %v2748_v14 = vpack.c.bf16 %v2708_v8, %v2704_v18  ;;  %v2194_v20 = vadd.f32 %v2193_v50, %v2081_v9 }
 0x1f8   : > { %v2084_v45 = vpop.f32.mrf.mxu0  ;;  %v1984_v23 = vadd.f32 %v6464_v31, %v1871_v39 }
 0x1f9   : > { %v2197_v10 = vpop.f32.mrf.mxu1  ;;  %v2085_v11 = vadd.f32 %v2084_v45, %v1972_v56  ;;  %v2749_v16 = vpack.c.bf16 %v2709_v30, %v2705_v55  ;;  %v2196_v58 = vadd.f32 %v2195_v15, %v2083_v0  ;;  %v2712_v19 = vmax.f32 %v2194_v20, 0.0 }
 0x1fa   : > { %v2086_v6 = vpop.f32.mrf.mxu0 }
 0x1fb   : > { %v2199_v24 = vpop.f32.mrf.mxu1  ;;  %v2198_v38 = vadd.f32 %v2197_v10, %v2085_v11  ;;  %v2087_v53 = vadd.f32 %v2086_v6, %v1974_v17  ;;  %3238 = vmatprep.mubr.bf16.mxu0 %v2749_v16  ;;  %v2713_v54 = vmax.f32 %v2196_v58, 0.0 }
 0x1fc   : > { %v2090_v2 = vpop.f32.mrf.mxu0  ;;  %3239 = vmatmul.mubr.bf16.gmra.mxu0 %v2748_v14 }
 0x1fd   : > { %v2203_v60 = vpop.f32.mrf.mxu1  ;;  %v2200_v7 = vadd.f32 %v2199_v24, %v2087_v53  ;;  %v2716_v28 = vmax.f32 %v2198_v38, 0.0  ;;  %v2091_v35 = vadd.f32 %v2090_v2, %v6463_v34 }
 0x1fe   : > { %v2092_v22 = vpop.f32.mrf.mxu0 }
 0x1ff   : > { %v2205_v41 = vpop.f32.mrf.mxu1  ;;  %v2717_v36 = vmax.f32 %v2200_v7, 0.0  ;;  %v2093_v37 = vadd.f32 %v2092_v22, %v6462_v33  ;;  %v2752_v52 = vpack.c.bf16 %v2716_v28, %v2712_v19  ;;  %v2204_v63 = vadd.f32 %v2203_v60, %v2091_v35 }
 0x200   : > { %v2094_v59 = vpop.f32.mrf.mxu0 }
 0x201   : > { %v2207_v4 = vpop.f32.mrf.mxu1  ;;  %v2095_v57 = vadd.f32 %v2094_v59, %v1982_v61  ;;  %v2753_v40 = vpack.c.bf16 %v2717_v36, %v2713_v54  ;;  %v2206_v3 = vadd.f32 %v2205_v41, %v2093_v37  ;;  %v2720_v0 = vmax.f32 %v2204_v63, 0.0 }
 0x202   : > { %v2096_v13 = vpop.f32.mrf.mxu0 }
 0x203   : > { %v2209_v27 = vpop.f32.mrf.mxu1  ;;  %v2208_v47 = vadd.f32 %v2207_v4, %v2095_v57  ;;  %v2097_v1 = vadd.f32 %v2096_v13, %v1984_v23  ;;  %3248 = vmatprep.mubr.bf16.mxu0 %v2753_v40  ;;  %v2721_v15 = vmax.f32 %v2206_v3, 0.0 }
 0x204   : > { %v2246_v12 = vpop.f32.mrf.mxu0  ;;  %3249 = vmatmul.mubr.bf16.gmra.mxu0 %v2752_v52 }
 0x205   : > { %v2359_v42 = vpop.f32.mrf.mxu1  ;;  %v2210_v50 = vadd.f32 %v2209_v27, %v2097_v1  ;;  %v2247_v62 = vadd.f32 %v2246_v12, %v5990_v21  ;;  %v2724_v32 = vmax.f32 %v2208_v47, 0.0 }
 0x206   : > { %v2248_v8 = vpop.f32.mrf.mxu0 }
 0x207   : > { %v2361_v48 = vpop.f32.mrf.mxu1  ;;  %v2725_v56 = vmax.f32 %v2210_v50, 0.0  ;;  %v5996_v55 = vadd.f32 %v2359_v42, %v2247_v62  ;;  %v2249_v30 = vadd.f32 %v2248_v8, %v5993_v49  ;;  %v2756_v17 = vpack.c.bf16 %v2724_v32, %v2720_v0 }
 0x208   : > { %v5999_v18 = vpop.f32.mrf.mxu0 }
 0x209   : > { %v6001_v9 = vpop.f32.mrf.mxu1  ;;  %v6003_v45 = vadd.f32 %v2361_v48, %v2249_v30  ;;  %v2757_v10 = vpack.c.bf16 %v2725_v56, %v2721_v15 }
 0x20a   : > { %v6005_v11 = vpop.f32.mrf.mxu0 }
 0x20b   : > { %v6007_v16 = vpop.f32.mrf.mxu1  ;;  %3258 = vmatprep.mubr.bf16.mxu0 %v2757_v10 }
 0x20c   : > { %v2256_v14 = vpop.f32.mrf.mxu0  ;;  %3259 = vmatmul.mubr.bf16.gmra.mxu0 %v2756_v17 }
 0x20d   : > { %v2369_v6 = vpop.f32.mrf.mxu1  ;;  %v2257_v24 = vadd.f32 %v2256_v14, %v5990_v21 }
 0x20e   : > { %v2258_v46 = vpop.f32.mrf.mxu0 }
 0x20f   : > { %v2371_v25 = vpop.f32.mrf.mxu1  ;;  %v6010_v58 = vadd.f32 %v2369_v6, %v2257_v24  ;;  %v2259_v38 = vadd.f32 %v2258_v46, %v5993_v49 }
 0x210   : > { %v6013_v53 = vpop.f32.mrf.mxu0 }
 0x211   : > { %v6015_v20 = vpop.f32.mrf.mxu1  ;;  %v6017_v2 = vadd.f32 %v2371_v25, %v2259_v38 }
 0x212   : > { %v6019_v60 = vpop.f32.mrf.mxu0 }
 0x213   : > { %v6021_v29 = vpop.f32.mrf.mxu1 }
 0x214   : > { %v2266_v39 = vpop.f32.mrf.mxu0 }
 0x215   : > { %v2379_v7 = vpop.f32.mrf.mxu1  ;;  %v2267_v44 = vadd.f32 %v2266_v39, %v5990_v21 }
 0x216   : > { %v2268_v28 = vpop.f32.mrf.mxu0 }
 0x217   : > { %v2381_v22 = vpop.f32.mrf.mxu1  ;;  %v6024_v41 = vadd.f32 %v2379_v7, %v2267_v44  ;;  %v2269_v51 = vadd.f32 %v2268_v28, %v5993_v49 }
 0x218   : > { %v6027_v26 = vpop.f32.mrf.mxu0 }
 0x219   : > { %v6029_v61 = vpop.f32.mrf.mxu1  ;;  %v6031_v54 = vadd.f32 %v2381_v22, %v2269_v51 }
 0x21a   : > { %v6033_v36 = vpop.f32.mrf.mxu0 }
 0x21b   : > { %v6035_v33 = vpop.f32.mrf.mxu1 }
 0x21c   : > { %v2276_v37 = vpop.f32.mrf.mxu0 }
 0x21d   : > { %v2389_v19 = vpop.f32.mrf.mxu1  ;;  %v2277_v34 = vadd.f32 %v2276_v37, %v5990_v21 }
 0x21e   : > { %v2278_v35 = vpop.f32.mrf.mxu0 }
 0x21f   : > { %v2391_v59 = vpop.f32.mrf.mxu1  ;;  %v6038_v4 = vadd.f32 %v2389_v19, %v2277_v34  ;;  %v2279_v31 = vadd.f32 %v2278_v35, %v5993_v49 }
 0x220   : > { %v6041_v23 = vpop.f32.mrf.mxu0 }
 0x221   : > { %v6043_v57 = vpop.f32.mrf.mxu1  ;;  %v6045_v40 = vadd.f32 %v2391_v59, %v2279_v31 }
 0x222   : > { %v6047_v5 = vpop.f32.mrf.mxu0 }
 0x223   : > { %v6049_v52 = vpop.f32.mrf.mxu1 }
 0x224   : > { %v2286_v13 = vpop.f32.mrf.mxu0 }
 0x225   : > { %v2399_v27 = vpop.f32.mrf.mxu1  ;;  %v2287_v3 = vadd.f32 %v2286_v13, %v5990_v21 }
 0x226   : > { %v2288_v47 = vpop.f32.mrf.mxu0 }
 0x227   : > { %v2401_v1 = vpop.f32.mrf.mxu1  ;;  %v6052_v63 = vadd.f32 %v2399_v27, %v2287_v3  ;;  %v2289_v12 = vadd.f32 %v2288_v47, %v5993_v49 }
 0x228   : > { %v6055_v42 = vpop.f32.mrf.mxu0 }
 0x229   : > { %v6057_v50 = vpop.f32.mrf.mxu1  ;;  %v6059_v62 = vadd.f32 %v2401_v1, %v2289_v12 }
 0x22a   : > { %v6061_v32 = vpop.f32.mrf.mxu0 }
 0x22b   : > { %v6063_v8 = vpop.f32.mrf.mxu1 }
 0x22c   : > { %v2296_v48 = vpop.f32.mrf.mxu0 }
 0x22d   : > { %v2409_v15 = vpop.f32.mrf.mxu1  ;;  %v2297_v56 = vadd.f32 %v2296_v48, %v5990_v21 }
 0x22e   : > { %v2298_v30 = vpop.f32.mrf.mxu0 }
 0x22f   : > { %v2411_v0 = vpop.f32.mrf.mxu1  ;;  %v6066_v10 = vadd.f32 %v2409_v15, %v2297_v56  ;;  %v2299_v17 = vadd.f32 %v2298_v30, %v5993_v49 }
 0x230   : > { %v6069_v14 = vpop.f32.mrf.mxu0 }
 0x231   : > { %v6071_v6 = vpop.f32.mrf.mxu1  ;;  %v6073_v24 = vadd.f32 %v2411_v0, %v2299_v17  ;;  %v2251_v17 = vadd.f32 %v5999_v18, %v5990_v21 }
 0x232   : > { %v6075_v46 = vpop.f32.mrf.mxu0 }
 0x233   : > { %v6077_v25 = vpop.f32.mrf.mxu1 }
 0x234   : > { %v2306_v38 = vpop.f32.mrf.mxu0 }
 0x235   : > { %v2419_v39 = vpop.f32.mrf.mxu1  ;;  %v2307_v7 = vadd.f32 %v2306_v38, %v5990_v21 }
 0x236   : > { %v2308_v44 = vpop.f32.mrf.mxu0 }
 0x237   : > { %v2421_v28 = vpop.f32.mrf.mxu1  ;;  %v6080_v22 = vadd.f32 %v2419_v39, %v2307_v7  ;;  %v2309_v51 = vadd.f32 %v2308_v44, %v5993_v49  ;;  %v2253_v7 = vadd.f32 %v6005_v11, %v5993_v49 }
 0x238   : > { %v6083_v37 = vpop.f32.mrf.mxu0 }
 0x239   : > { %v6085_v19 = vpop.f32.mrf.mxu1  ;;  %v6087_v34 = vadd.f32 %v2421_v28, %v2309_v51  ;;  %v2364_v51 = vadd.f32 %v6001_v9, %v2251_v17 }
 0x23a   : > { %v6089_v35 = vpop.f32.mrf.mxu0 }
 0x23b   : > { %v6091_v59 = vpop.f32.mrf.mxu1 }
 0x23c   : > { %v2316_v31 = vpop.f32.mrf.mxu0 }
 0x23d   : > { %v2429_v13 = vpop.f32.mrf.mxu1  ;;  %v2317_v27 = vadd.f32 %v2316_v31, %v5990_v21 }
 0x23e   : > { %v2318_v3 = vpop.f32.mrf.mxu0 }
 0x23f   : > { %v2431_v47 = vpop.f32.mrf.mxu1  ;;  %v6094_v1 = vadd.f32 %v2429_v13, %v2317_v27  ;;  %v2319_v12 = vadd.f32 %v2318_v3, %v5993_v49 }
 0x240   : > { %v6097_v48 = vpop.f32.mrf.mxu0 }
 0x241   : > { %6466 = vst [vmem:[#allocation20_spill] sm:$0xff] %v6094_v1  ;;  %v6099_v15 = vpop.f32.mrf.mxu1  ;;  %v6101_v56 = vadd.f32 %v2431_v47, %v2319_v12  ;;  %v2366_v47 = vadd.f32 %v6007_v16, %v2253_v7 }
 0x242   : > { %6467 = vst [vmem:[#allocation21_spill] sm:$0xff] %v6099_v15  ;;  %v6103_v30 = vpop.f32.mrf.mxu0 }
 0x243   : > { %6468 = vst [vmem:[#allocation22_spill] sm:$0xff] %v6101_v56  ;;  %6469 = vst [vmem:[#allocation23_spill] sm:$0xff] %v6103_v30  ;;  %v6105_v0 = vpop.f32.mrf.mxu1 }
 0x244   : > { %6470 = vst [vmem:[#allocation15_spill] sm:$0xff] %v6105_v0  ;;  %v2472_v38 = vpop.f32.mrf.mxu0  ;;  %v2261_v0 = vadd.f32 %v6013_v53, %v5990_v21 }
 0x245   : > { %v2585_v39 = vpop.f32.mrf.mxu1  ;;  %v2473_v13 = vadd.f32 %v2472_v38, %v5996_v55 }
 0x246   : > { %v2474_v44 = vpop.f32.mrf.mxu0  ;;  %v2374_v16 = vadd.f32 %v6015_v20, %v2261_v0 }
 0x247   : > { %v2587_v28 = vpop.f32.mrf.mxu1  ;;  %v2475_v31 = vadd.f32 %v2474_v44, %v6003_v45  ;;  %v2586_v15 = vadd.f32 %v2585_v39, %v2473_v13  ;;  %v2263_v45 = vadd.f32 %v6019_v60, %v5993_v49 }
 0x248   : > { %v2476_v27 = vpop.f32.mrf.mxu0 }
 0x249   : > { %v2589_v3 = vpop.f32.mrf.mxu1  ;;  %v2477_v12 = vadd.f32 %v2476_v27, %v2364_v51  ;;  %v2588_v1 = vadd.f32 %v2587_v28, %v2475_v31  ;;  %v2666_v53 = vmax.f32 %v2586_v15, 0.0  ;;  %v2376_v31 = vadd.f32 %v6021_v29, %v2263_v45  ;;  %v4957_v15 = vld [vmem:[#allocation9 + $0x38] sm:$0xff]  }
 0x24a   : > { %v2478_v43 = vpop.f32.mrf.mxu0  ;;  %v2273_v29 = vadd.f32 %v6033_v36, %v5993_v49 }
 0x24b   : > { %v2591_v18 = vpop.f32.mrf.mxu1  ;;  %v2590_v11 = vadd.f32 %v2589_v3, %v2477_v12  ;;  %v2479_v56 = vadd.f32 %v2478_v43, %v2366_v47  ;;  %v2667_v7 = vmax.f32 %v2588_v1, 0.0  ;;  %v2271_v12 = vadd.f32 %v6027_v26, %v5990_v21 }
 0x24c   : > { %v2482_v30 = vpop.f32.mrf.mxu0 }
 0x24d   : > { %v2595_v9 = vpop.f32.mrf.mxu1  ;;  %v2592_v55 = vadd.f32 %v2591_v18, %v2479_v56  ;;  %v2670_v17 = vmax.f32 %v2590_v11, 0.0  ;;  %v2483_v28 = vadd.f32 %v2482_v30, %v6010_v58  ;;  %v4958_v18 = vld [vmem:[#allocation9 + $0x70] sm:$0xff]  }
 0x24e   : > { %v2484_v38 = vpop.f32.mrf.mxu0 }
 0x24f   : > { %v2597_v44 = vpop.f32.mrf.mxu1  ;;  %v2671_v51 = vmax.f32 %v2592_v55, 0.0  ;;  %v2485_v27 = vadd.f32 %v2484_v38, %v6017_v2  ;;  %v2730_v60 = vpack.c.bf16 %v2670_v17, %v2666_v53  ;;  %v4956_v2 = vld [vmem:[#allocation9 + $0x78] sm:$0xff]   ;;  %v2596_v58 = vadd.f32 %v2595_v9, %v2483_v28  ;;  %v4959_v38 = vld [vmem:[#allocation9 + $0x30] sm:$0xff]  }
 0x250   : > { %v2486_v43 = vpop.f32.mrf.mxu0  ;;  %4336 = vmatprep.subr.bf16.mxu0 %v4956_v2  ;;  %4400 = vmatprep.subr.bf16.mxu1 %v4956_v2 }
 0x251   : > { %v2599_v39 = vpop.f32.mrf.mxu1  ;;  %v2731_v13 = vpack.c.bf16 %v2671_v51, %v2667_v7  ;;  %v2487_v3 = vadd.f32 %v2486_v43, %v2374_v16  ;;  %v2598_v20 = vadd.f32 %v2597_v44, %v2485_v27  ;;  %4337 = vmatpush3.bf16.msra.mxu0 %v4957_v15  ;;  %v2384_v44 = vadd.f32 %v6029_v61, %v2271_v12  ;;  %v4960_v51 = vld [vmem:[#allocation9 + $0x68] sm:$0xff]  }
 0x252   : > { %v2488_v56 = vpop.f32.mrf.mxu0  ;;  %4338 = vmatprep.subr.bf16.mxu0 %v4958_v18  ;;  %v2674_v27 = vmax.f32 %v2596_v58, 0.0  ;;  %v2386_v43 = vadd.f32 %v6035_v33, %v2273_v29  ;;  %v4963_v58 = vld [vmem:[#allocation9 + $0x20] sm:$0xff]  }
 0x253   : > { %v2601_v47 = vpop.f32.mrf.mxu1  ;;  %v2600_v1 = vadd.f32 %v2599_v39, %v2487_v3  ;;  %v2489_v0 = vadd.f32 %v2488_v56, %v2376_v31  ;;  %3301 = vmatprep.mubr.bf16.mxu1 %v2731_v13  ;;  %v2675_v16 = vmax.f32 %v2598_v20, 0.0  ;;  %v2281_v13 = vadd.f32 %v6041_v23, %v5990_v21 }
 0x254   : > { %v2492_v30 = vpop.f32.mrf.mxu0  ;;  %3302 = vmatmul.mubr.bf16.vlgmr.msra.gmra.mxu1 %v2730_v60  ;;  %v2283_v23 = vadd.f32 %v6047_v5, %v5993_v49 }
 0x255   : > { %v2605_v11 = vpop.f32.mrf.mxu1  ;;  %v2602_v45 = vadd.f32 %v2601_v47, %v2489_v0  ;;  %v2678_v55 = vmax.f32 %v2600_v1, 0.0  ;;  %4408 = vmatpush3.bf16.msra.mxu1 %v4957_v15  ;;  %v2493_v36 = vadd.f32 %v2492_v30, %v6024_v41  ;;  %4339 = vmatpush3.bf16.msra.mxu0 %v4959_v38  ;;  %v4962_v41 = vld [vmem:[#allocation9 + $0x60] sm:$0xff]   ;;  %v2394_v30 = vadd.f32 %v6043_v57, %v2281_v13 }
 0x256   : > { %v2494_v17 = vpop.f32.mrf.mxu0  ;;  %4401 = vmatprep.subr.bf16.mxu1 %v4958_v18  ;;  %4340 = vmatprep.subr.bf16.mxu0 %v4960_v51 }
 0x257   : > { %v2607_v26 = vpop.f32.mrf.mxu1  ;;  %v2679_v7 = vmax.f32 %v2602_v45, 0.0  ;;  %v2495_v9 = vadd.f32 %v2494_v17, %v6031_v54  ;;  %v2734_v61 = vpack.c.bf16 %v2678_v55, %v2674_v27  ;;  %v4961_v54 = vld [vmem:[#allocation9 + $0x28] sm:$0xff]   ;;  %v2606_v20 = vadd.f32 %v2605_v11, %v2493_v36  ;;  %v4964_v55 = vld [vmem:[#allocation9 + $0x58] sm:$0xff]  }
 0x258   : > { %v2496_v53 = vpop.f32.mrf.mxu0 }
 0x259   : > { %v2609_v28 = vpop.f32.mrf.mxu1  ;;  %v2735_v39 = vpack.c.bf16 %v2679_v7, %v2675_v16  ;;  %v2497_v31 = vadd.f32 %v2496_v53, %v2384_v44  ;;  %4409 = vmatpush3.bf16.msra.mxu1 %v4959_v38  ;;  %v2608_v56 = vadd.f32 %v2607_v26, %v2495_v9  ;;  %4341 = vmatpush3.bf16.msra.mxu0 %v4961_v54  ;;  %v2682_v17 = vmax.f32 %v2606_v20, 0.0 }
 0x25a   : > { %v2498_v3 = vpop.f32.mrf.mxu0  ;;  %4402 = vmatprep.subr.bf16.mxu1 %v4960_v51  ;;  %4342 = vmatprep.subr.bf16.mxu0 %v4962_v41  ;;  %v2396_v44 = vadd.f32 %v6049_v52, %v2283_v23  ;;  %v2291_v9 = vadd.f32 %v6055_v42, %v5990_v21  ;;  %v2293_v52 = vadd.f32 %v6061_v32, %v5993_v49 }
 0x25b   : > { %v2611_v60 = vpop.f32.mrf.mxu1  ;;  %v2610_v47 = vadd.f32 %v2609_v28, %v2497_v31  ;;  %v2499_v12 = vadd.f32 %v2498_v3, %v2386_v43  ;;  %3311 = vmatprep.mubr.bf16.mxu1 %v2735_v39  ;;  %v2683_v29 = vmax.f32 %v2608_v56, 0.0 }
 0x25c   : > { %v2502_v1 = vpop.f32.mrf.mxu0  ;;  %3312 = vmatmul.mubr.bf16.gmra.mxu1 %v2734_v61  ;;  %v2404_v3 = vadd.f32 %v6057_v50, %v2291_v9 }
 0x25d   : > { %v2615_v33 = vpop.f32.mrf.mxu1  ;;  %v2612_v0 = vadd.f32 %v2611_v60, %v2499_v12  ;;  %v2686_v2 = vmax.f32 %v2610_v47, 0.0  ;;  %4410 = vmatpush3.bf16.msra.mxu1 %v4961_v54  ;;  %v2503_v26 = vadd.f32 %v2502_v1, %v6038_v4  ;;  %4343 = vmatpush3.bf16.msra.mxu0 %v4963_v58  ;;  %v2406_v1 = vadd.f32 %v6063_v8, %v2293_v52 }
 0x25e   : > { %v2504_v15 = vpop.f32.mrf.mxu0  ;;  %4403 = vmatprep.subr.bf16.mxu1 %v4962_v41  ;;  %4344 = vmatprep.subr.bf16.mxu0 %v4964_v55 }
 0x25f   : > { %v2617_v18 = vpop.f32.mrf.mxu1  ;;  %v2687_v45 = vmax.f32 %v2612_v0, 0.0  ;;  %v2505_v11 = vadd.f32 %v2504_v15, %v6045_v40  ;;  %v2738_v57 = vpack.c.bf16 %v2686_v2, %v2682_v17  ;;  %v4965_v40 = vld [vmem:[#allocation9 + $0x18] sm:$0xff]   ;;  %v2616_v4 = vadd.f32 %v2615_v33, %v2503_v26 }
 0x260   : > { %v2506_v5 = vpop.f32.mrf.mxu0  ;;  %v2301_v15 = vadd.f32 %v6069_v14, %v5990_v21 }
 0x261   : > { %v2619_v38 = vpop.f32.mrf.mxu1  ;;  %v2739_v16 = vpack.c.bf16 %v2687_v45, %v2683_v29  ;;  %v2507_v7 = vadd.f32 %v2506_v5, %v2394_v30  ;;  %4411 = vmatpush3.bf16.msra.mxu1 %v4963_v58  ;;  %v2618_v36 = vadd.f32 %v2617_v18, %v2505_v11  ;;  %4345 = vmatpush3.bf16.msra.mxu0 %v4965_v40  ;;  %v2690_v47 = vmax.f32 %v2616_v4, 0.0 }
 0x262   : > { %v2508_v51 = vpop.f32.mrf.mxu0  ;;  %4404 = vmatprep.subr.bf16.mxu1 %v4964_v55  ;;  %v2414_v17 = vadd.f32 %v6071_v6, %v2301_v15 }
 0x263   : > { %v2621_v27 = vpop.f32.mrf.mxu1  ;;  %v2620_v53 = vadd.f32 %v2619_v38, %v2507_v7  ;;  %v2509_v28 = vadd.f32 %v2508_v51, %v2396_v44  ;;  %3321 = vmatprep.mubr.bf16.mxu1 %v2739_v16  ;;  %v2691_v60 = vmax.f32 %v2618_v36, 0.0  ;;  %v2311_v36 = vadd.f32 %v6083_v37, %v5990_v21 }
 0x264   : > { %v2512_v43 = vpop.f32.mrf.mxu0  ;;  %3322 = vmatmul.mubr.bf16.gmra.mxu1 %v2738_v57 }
 0x265   : > { %v2625_v39 = vpop.f32.mrf.mxu1  ;;  %v2622_v42 = vadd.f32 %v2621_v27, %v2509_v28  ;;  %v2694_v31 = vmax.f32 %v2620_v53, 0.0  ;;  %4412 = vmatpush3.bf16.msra.mxu1 %v4965_v40  ;;  %v2513_v12 = vadd.f32 %v2512_v43, %v6052_v63  ;;  %v2303_v63 = vadd.f32 %v6075_v46, %v5993_v49 }
 0x266   : > { %v2514_v13 = vpop.f32.mrf.mxu0 }
 0x267   : > { %v2627_v61 = vpop.f32.mrf.mxu1  ;;  %v2695_v54 = vmax.f32 %v2622_v42, 0.0  ;;  %v2515_v56 = vadd.f32 %v2514_v13, %v6059_v62  ;;  %v2742_v23 = vpack.c.bf16 %v2694_v31, %v2690_v47  ;;  %v2626_v62 = vadd.f32 %v2625_v39, %v2513_v12 }
 0x268   : > { %v2516_v41 = vpop.f32.mrf.mxu0  ;;  %v2416_v9 = vadd.f32 %v6077_v25, %v2303_v63  ;;  %v2424_v31 = vadd.f32 %v6085_v19, %v2311_v36 }
 0x269   : > { %v2629_v20 = vpop.f32.mrf.mxu1  ;;  %v2743_v32 = vpack.c.bf16 %v2695_v54, %v2691_v60  ;;  %v2517_v33 = vadd.f32 %v2516_v41, %v2404_v3  ;;  %v2628_v50 = vadd.f32 %v2627_v61, %v2515_v56  ;;  %v2698_v38 = vmax.f32 %v2626_v62, 0.0  ;;  %v6472_v62 = vld [vmem:[#allocation21_spill] sm:$0xff] }
 0x26a   : > { %v2518_v0 = vpop.f32.mrf.mxu0 }
 0x26b   : > { %v2631_v2 = vpop.f32.mrf.mxu1  ;;  %v2630_v18 = vadd.f32 %v2629_v20, %v2517_v33  ;;  %v2519_v58 = vadd.f32 %v2518_v0, %v2406_v1  ;;  %3331 = vmatprep.mubr.bf16.mxu1 %v2743_v32  ;;  %v2699_v26 = vmax.f32 %v2628_v50, 0.0  ;;  %v2321_v32 = vadd.f32 %v6097_v48, %v5990_v21  ;;  %v6473_v21 = vld [vmem:[#allocation22_spill] sm:$0xff] }
 0x26c   : > { %v2522_v30 = vpop.f32.mrf.mxu0  ;;  %3332 = vmatmul.mubr.bf16.gmra.mxu1 %v2742_v23 }
 0x26d   : > { %v2635_v29 = vpop.f32.mrf.mxu1  ;;  %v2632_v8 = vadd.f32 %v2631_v2, %v2519_v58  ;;  %v2702_v45 = vmax.f32 %v2630_v18, 0.0  ;;  %v2523_v44 = vadd.f32 %v2522_v30, %v6066_v10  ;;  %v2313_v10 = vadd.f32 %v6089_v35, %v5993_v49 }
 0x26e   : > { %v2524_v11 = vpop.f32.mrf.mxu0  ;;  %v2434_v30 = vadd.f32 %v6472_v62, %v2321_v32  ;;  %v2824_v32 = vld [vmem:[%s6391_s4] sm:$0x3] }
 0x26f   : > { %v2637_v55 = vpop.f32.mrf.mxu1  ;;  %v2703_v5 = vmax.f32 %v2632_v8, 0.0  ;;  %v2525_v14 = vadd.f32 %v2524_v11, %v6073_v24  ;;  %v2746_v46 = vpack.c.bf16 %v2702_v45, %v2698_v38  ;;  %v2636_v24 = vadd.f32 %v2635_v29, %v2523_v44  ;;  %v6474_v45 = vld [vmem:[#allocation20_spill] sm:$0xff] }
 0x270   : > { %v2526_v16 = vpop.f32.mrf.mxu0  ;;  %v2426_v47 = vadd.f32 %v6091_v59, %v2313_v10  ;;  %v4969_v10 = vld [vmem:[#allocation9 + $0x8] sm:$0xff]  }
 0x271   : > { %v2639_v7 = vpop.f32.mrf.mxu1  ;;  %v2747_v57 = vpack.c.bf16 %v2703_v5, %v2699_v26  ;;  %v2527_v51 = vadd.f32 %v2526_v16, %v2414_v17  ;;  %v2638_v6 = vadd.f32 %v2637_v55, %v2525_v14  ;;  %v2706_v3 = vmax.f32 %v2636_v24, 0.0  ;;  %v6475_v26 = vld [vmem:[#allocation15_spill] sm:$0xff]  ;;  %v4966_v24 = vld [vmem:[#allocation9 + $0x50] sm:$0xff]  }
 0x272   : > { %v2528_v27 = vpop.f32.mrf.mxu0  ;;  %4346 = vmatprep.subr.bf16.mxu0 %v4966_v24  ;;  %4405 = vmatprep.subr.bf16.mxu1 %v4966_v24 }
 0x273   : > { %v2641_v40 = vpop.f32.mrf.mxu1  ;;  %v2640_v53 = vadd.f32 %v2639_v7, %v2527_v51  ;;  %v2529_v28 = vadd.f32 %v2528_v27, %v2416_v9  ;;  %3341 = vmatprep.mubr.bf16.mxu1 %v2747_v57  ;;  %v2707_v13 = vmax.f32 %v2638_v6, 0.0 }
 0x274   : > { %v2532_v4 = vpop.f32.mrf.mxu0  ;;  %3342 = vmatmul.mubr.bf16.gmra.mxu1 %v2746_v46 }
 0x275   : > { %v2645_v43 = vpop.f32.mrf.mxu1  ;;  %v2642_v25 = vadd.f32 %v2641_v40, %v2529_v28  ;;  %v2710_v39 = vmax.f32 %v2640_v53, 0.0  ;;  %v2533_v60 = vadd.f32 %v2532_v4, %v6080_v22  ;;  %v6471_v22 = vld [vmem:[#allocation23_spill] sm:$0xff]  ;;  %v4967_v4 = vld [vmem:[#allocation9 + $0x10] sm:$0xff]  }
 0x276   : > { %v2534_v52 = vpop.f32.mrf.mxu0  ;;  %v2323_v15 = vadd.f32 %v6471_v22, %v5993_v49  ;;  %4347 = vmatpush3.bf16.msra.mxu0 %v4967_v4  ;;  %4413 = vmatpush3.bf16.msra.mxu1 %v4967_v4 }
 0x277   : > { %v2647_v42 = vpop.f32.mrf.mxu1  ;;  %v2711_v61 = vmax.f32 %v2642_v25, 0.0  ;;  %v2535_v37 = vadd.f32 %v2534_v52, %v6087_v34  ;;  %v2750_v35 = vpack.c.bf16 %v2710_v39, %v2706_v3  ;;  %v2646_v34 = vadd.f32 %v2645_v43, %v2533_v60  ;;  %v4968_v43 = vld [vmem:[#allocation9 + $0x48] sm:$0xff]   ;;  %v4970_v25 = vld [vmem:[#allocation9 + $0x40] sm:$0xff]  }
 0x278   : > { %v2536_v54 = vpop.f32.mrf.mxu0  ;;  %v2436_v5 = vadd.f32 %v6475_v26, %v2323_v15  ;;  %4348 = vmatprep.subr.bf16.mxu0 %v4968_v43  ;;  %4406 = vmatprep.subr.bf16.mxu1 %v4968_v43  ;;  %v4971_v39 = vld [vmem:[#allocation9] sm:$0xff]  }
 0x279   : > { %v2649_v56 = vpop.f32.mrf.mxu1  ;;  %v2751_v12 = vpack.c.bf16 %v2711_v61, %v2707_v13  ;;  %v2537_v41 = vadd.f32 %v2536_v54, %v2424_v31  ;;  %v2648_v19 = vadd.f32 %v2647_v42, %v2535_v37  ;;  %v2714_v8 = vmax.f32 %v2646_v34, 0.0 }
 0x27a   : > { %v2538_v20 = vpop.f32.mrf.mxu0  ;;  %4349 = vmatpush3.bf16.msra.mxu0 %v4969_v10  ;;  %4414 = vmatpush3.bf16.msra.mxu1 %v4969_v10 }
 0x27b   : > { %v2651_v1 = vpop.f32.mrf.mxu1  ;;  %v2650_v33 = vadd.f32 %v2649_v56, %v2537_v41  ;;  %v2539_v23 = vadd.f32 %v2538_v20, %v2426_v47  ;;  %3351 = vmatprep.mubr.bf16.mxu1 %v2751_v12  ;;  %v2715_v29 = vmax.f32 %v2648_v19, 0.0  ;;  %4350 = vmatprep.subr.bf16.mxu0 %v4970_v25 }
 0x27c   : > { %v2542_v0 = vpop.f32.mrf.mxu0  ;;  %3352 = vmatmul.mubr.bf16.gmra.mxu1 %v2750_v35  ;;  %4407 = vmatprep.subr.bf16.mxu1 %v4970_v25 }
 0x27d   : > { %v2655_v2 = vpop.f32.mrf.mxu1  ;;  %v2652_v59 = vadd.f32 %v2651_v1, %v2539_v23  ;;  %v2718_v50 = vmax.f32 %v2650_v33, 0.0  ;;  %v2543_v11 = vadd.f32 %v2542_v0, %v6474_v45  ;;  %v6476_v33 = vld [vmem:[#allocation24_spill] sm:$0xff] }
 0x27e   : > { %v2544_v18 = vpop.f32.mrf.mxu0  ;;  %4351 = vmatpush3.bf16.msra.mxu0 %v4971_v39  ;;  %4415 = vmatpush3.bf16.msra.mxu1 %v4971_v39  ;;  %v6477_v23 = vsub.s32 1, %v6476_v33  ;;  %v6478_v0 = vsub.s32 0, %v6476_v33 }
 0x27f   : > { %v2657_v58 = vpop.f32.mrf.mxu1  ;;  %v2719_v63 = vmax.f32 %v2652_v59, 0.0  ;;  %v2545_v48 = vadd.f32 %v2544_v18, %v6473_v21  ;;  %v2754_v49 = vpack.c.bf16 %v2718_v50, %v2714_v8  ;;  %v2656_v57 = vadd.f32 %v2655_v2, %v2543_v11 }
 0x280   : > { %v2546_v55 = vpop.f32.mrf.mxu0  ;;  %v6186_v34 = vrot.slane %v2824_v32, %v6477_v23  ;;  %v6190_v2 = vrot.slane %v2824_v32, %v6478_v0 }
 0x281   : > { %v2659_v17 = vpop.f32.mrf.mxu1  ;;  %v2755_v14 = vpack.c.bf16 %v2719_v63, %v2715_v29  ;;  %v2547_v38 = vadd.f32 %v2546_v55, %v2434_v30  ;;  %v2658_v16 = vadd.f32 %v2657_v58, %v2545_v48  ;;  %v2722_v6 = vmax.f32 %v2656_v57, 0.0 }
 0x282   : > { %v2548_v44 = vpop.f32.mrf.mxu0 }
 0x283   : > { %v2660_v7 = vadd.f32 %v2659_v17, %v2547_v38  ;;  %v2549_v9 = vadd.f32 %v2548_v44, %v2436_v5  ;;  %3361 = vmatprep.mubr.bf16.mxu1 %v2755_v14  ;;  %v2661_v51 = vpop.f32.mrf.mxu1  ;;  %v2723_v40 = vmax.f32 %v2658_v16, 0.0 }
 0x284   : > { %3362 = vmatmul.mubr.bf16.gmra.mxu1 %v2754_v49 }
 0x285   : > { %v2662_v46 = vadd.f32 %v2661_v51, %v2549_v9  ;;  %v2726_v27 = vmax.f32 %v2660_v7, 0.0 }
 0x287   : > { %v2727_v36 = vmax.f32 %v2662_v46, 0.0  ;;  %v2758_v28 = vpack.c.bf16 %v2726_v27, %v2722_v6 }
 0x289   : > { %v2759_v53 = vpack.c.bf16 %v2727_v36, %v2723_v40 }
 0x28b   : > { %3371 = vmatprep.mubr.bf16.mxu1 %v2759_v53 }
 0x28c   : > { %3372 = vmatmul.mubr.bf16.gmra.mxu1 %v2758_v28 }
 0x294   : > { %v3190_v52 = vpop.f32.mrf.mxu0 }
 0x295   : > { %v3191_v58 = vadd.f32 %v3190_v52, %v6190_v2 }
 0x296   : > { %v3192_v42 = vpop.f32.mrf.mxu0 }
 0x297   : > { %v3193_v50 = vadd.f32 %v3192_v42, %v6186_v34 }
 0x298   : > { %v3194_v31 = vpop.f32.mrf.mxu0 }
 0x299   : > { %v3195_v18 = vadd.f32 %v3194_v31, %v6190_v2 }
 0x29a   : > { %v3196_v13 = vpop.f32.mrf.mxu0 }
 0x29b   : > { %v3197_v30 = vadd.f32 %v3196_v13, %v6186_v34 }
 0x29c   : > { %v3200_v61 = vpop.f32.mrf.mxu0 }
 0x29d   : > { %v3201_v7 = vadd.f32 %v3200_v61, %v6190_v2 }
 0x29e   : > { %v3202_v37 = vpop.f32.mrf.mxu0 }
 0x29f   : > { %v3203_v49 = vadd.f32 %v3202_v37, %v6186_v34 }
 0x2a0   : > { %v3204_v3 = vpop.f32.mrf.mxu0 }
 0x2a1   : > { %v3205_v44 = vadd.f32 %v3204_v3, %v6190_v2 }
 0x2a2   : > { %v3206_v60 = vpop.f32.mrf.mxu0 }
 0x2a3   : > { %v3207_v51 = vadd.f32 %v3206_v60, %v6186_v34 }
 0x2a4   : > { %v3210_v54 = vpop.f32.mrf.mxu0 }
 0x2a5   : > { %v3211_v13 = vadd.f32 %v3210_v54, %v6190_v2 }
 0x2a6   : > { %v3212_v56 = vpop.f32.mrf.mxu0 }
 0x2a7   : > { %v3213_v52 = vadd.f32 %v3212_v56, %v6186_v34 }
 0x2a8   : > { %v3214_v47 = vpop.f32.mrf.mxu0 }
 0x2a9   : > { %v3215_v42 = vadd.f32 %v3214_v47, %v6190_v2 }
 0x2aa   : > { %v3216_v12 = vpop.f32.mrf.mxu0 }
 0x2ab   : > { %v3217_v3 = vadd.f32 %v3216_v12, %v6186_v34 }
 0x2ac   : > { %v6171_v41 = vpop.f32.mrf.mxu0 }
 0x2ae   : > { %v6173_v35 = vpop.f32.mrf.mxu0 }
 0x2af   : > { %v3223_v54 = vadd.f32 %v6173_v35, %v6186_v34 }
 0x2b0   : > { %v6175_v20 = vpop.f32.mrf.mxu0 }
 0x2b1   : > { %v3225_v12 = vadd.f32 %v6175_v20, %v6190_v2 }
 0x2b2   : > { %v6177_v1 = vpop.f32.mrf.mxu0 }
 0x2b4   : > { %v6182_v19 = vpop.f32.mrf.mxu0 }
 0x2b6   : > { %v6192_v15 = vpop.f32.mrf.mxu0 }
 0x2b8   : > { %v6198_v21 = vpop.f32.mrf.mxu0 }
 0x2ba   : > { %v6200_v5 = vpop.f32.mrf.mxu0 }
 0x2bc   : > { %v6206_v40 = vpop.f32.mrf.mxu0 }
 0x2be   : > { %v6208_v10 = vpop.f32.mrf.mxu0 }
 0x2c0   : > { %v3244_v33 = vpop.f32.mrf.mxu0 }
 0x2c2   : > { %v3246_v47 = vpop.f32.mrf.mxu0 }
 0x314   : > { %v3303_v22 = vpop.f32.mrf.mxu1 }
 0x315   : > { %v3304_v48 = vadd.f32 %v3303_v22, %v3191_v58 }
 0x316   : > { %v3305_v59 = vpop.f32.mrf.mxu1 }
 0x317   : > { %v3306_v29 = vadd.f32 %v3305_v59, %v3193_v50  ;;  %v3382_v14 = vmax.f32 %v3304_v48, 0.0 }
 0x318   : > { %v3307_v62 = vpop.f32.mrf.mxu1 }
 0x319   : > { %v3308_v63 = vadd.f32 %v3307_v62, %v3195_v18  ;;  %v3383_v17 = vmax.f32 %v3306_v29, 0.0  ;;  %v3221_v29 = vadd.f32 %v6171_v41, %v6190_v2 }
 0x31a   : > { %v3309_v8 = vpop.f32.mrf.mxu1 }
 0x31b   : > { %v3310_v45 = vadd.f32 %v3309_v8, %v3197_v30  ;;  %v3384_v11 = vmax.f32 %v3308_v63, 0.0  ;;  %v3227_v8 = vadd.f32 %v6177_v1, %v6186_v34  ;;  %v3235_v1 = vadd.f32 %v6198_v21, %v6190_v2 }
 0x31c   : > { %v3313_v55 = vpop.f32.mrf.mxu1 }
 0x31d   : > { %v3385_v26 = vmax.f32 %v3310_v45, 0.0  ;;  %v3414_v9 = vpack.c.bf16 %v3384_v11, %v3382_v14  ;;  %v3314_v36 = vadd.f32 %v3313_v55, %v3201_v7  ;;  %v3250_v55 = vpop.f32.mrf.mxu0  ;;  %v3233_v7 = vadd.f32 %v6192_v15, %v6186_v34 }
 0x31e   : > { %v3315_v38 = vpop.f32.mrf.mxu1 }
 0x31f   : > { %v3415_v16 = vpack.c.bf16 %v3385_v26, %v3383_v17  ;;  %v3316_v46 = vadd.f32 %v3315_v38, %v3203_v49  ;;  %v3386_v25 = vmax.f32 %v3314_v36, 0.0 }
 0x320   : > { %v3317_v57 = vpop.f32.mrf.mxu1 }
 0x321   : > { %v3318_v27 = vadd.f32 %v3317_v57, %v3205_v44  ;;  %3597 = vmatprep.mubr.bf16.mxu0 %v3415_v16  ;;  %v3387_v4 = vmax.f32 %v3316_v46, 0.0  ;;  %v3252_v44 = vpop.f32.mrf.mxu0  ;;  %v3231_v57 = vadd.f32 %v6182_v19, %v6190_v2 }
 0x322   : > { %v3319_v6 = vpop.f32.mrf.mxu1  ;;  %3598 = vmatmul.mubr.bf16.vlgmr.msra.gmra.mxu0 %v3414_v9 }
 0x323   : > { %v3320_v53 = vadd.f32 %v3319_v6, %v3207_v51  ;;  %v3388_v28 = vmax.f32 %v3318_v27, 0.0  ;;  %v3237_v27 = vadd.f32 %v6200_v5, %v6186_v34  ;;  %v3245_v5 = vadd.f32 %v3244_v33, %v6190_v2 }
 0x324   : > { %v3323_v24 = vpop.f32.mrf.mxu1 }
 0x325   : > { %v3389_v43 = vmax.f32 %v3320_v53, 0.0  ;;  %v3416_v61 = vpack.c.bf16 %v3388_v28, %v3386_v25  ;;  %v3324_v23 = vadd.f32 %v3323_v24, %v3211_v13  ;;  %v3254_v53 = vpop.f32.mrf.mxu0  ;;  %v3241_v13 = vadd.f32 %v6206_v40, %v6190_v2 }
 0x326   : > { %v3325_v39 = vpop.f32.mrf.mxu1  ;;  %v3253_v40 = vadd.f32 %v3252_v44, %v6186_v34 }
 0x327   : > { %v3417_v31 = vpack.c.bf16 %v3389_v43, %v3387_v4  ;;  %v3326_v60 = vadd.f32 %v3325_v39, %v3213_v52  ;;  %v3390_v58 = vmax.f32 %v3324_v23, 0.0  ;;  %v3256_v39 = vpop.f32.mrf.mxu0 }
 0x328   : > { %v3327_v37 = vpop.f32.mrf.mxu1 }
 0x329   : > { %v3328_v32 = vadd.f32 %v3327_v37, %v3215_v42  ;;  %3605 = vmatprep.mubr.bf16.mxu0 %v3417_v31  ;;  %v3391_v56 = vmax.f32 %v3326_v60, 0.0  ;;  %v3243_v42 = vadd.f32 %v6208_v10, %v6186_v34  ;;  %v3260_v23 = vpop.f32.mrf.mxu0 }
 0x32a   : > { %v3329_v0 = vpop.f32.mrf.mxu1  ;;  %3606 = vmatmul.mubr.bf16.gmra.mxu0 %v3416_v61 }
 0x32b   : > { %v3330_v22 = vadd.f32 %v3329_v0, %v3217_v3  ;;  %v3392_v59 = vmax.f32 %v3328_v32, 0.0  ;;  %v3247_v3 = vadd.f32 %v3246_v47, %v6186_v34 }
 0x32c   : > { %v3333_v50 = vpop.f32.mrf.mxu1 }
 0x32d   : > { %v3393_v18 = vmax.f32 %v3330_v22, 0.0  ;;  %v3418_v63 = vpack.c.bf16 %v3392_v59, %v3390_v58  ;;  %v3334_v17 = vadd.f32 %v3333_v50, %v3221_v29 }
 0x32e   : > { %v3335_v62 = vpop.f32.mrf.mxu1 }
 0x32f   : > { %v3419_v30 = vpack.c.bf16 %v3393_v18, %v3391_v56  ;;  %v3336_v45 = vadd.f32 %v3335_v62, %v3223_v54  ;;  %v3394_v16 = vmax.f32 %v3334_v17, 0.0  ;;  %v3262_v18 = vpop.f32.mrf.mxu0  ;;  %v3255_v54 = vadd.f32 %v3254_v53, %v6190_v2 }
 0x330   : > { %v3337_v48 = vpop.f32.mrf.mxu1 }
 0x331   : > { %v3338_v11 = vadd.f32 %v3337_v48, %v3225_v12  ;;  %3613 = vmatprep.mubr.bf16.mxu0 %v3419_v30  ;;  %v3395_v20 = vmax.f32 %v3336_v45, 0.0  ;;  %v3251_v12 = vadd.f32 %v3250_v55, %v6190_v2  ;;  %v3264_v45 = vpop.f32.mrf.mxu0  ;;  %v3263_v55 = vadd.f32 %v3262_v18, %v6186_v34 }
 0x332   : > { %v3339_v26 = vpop.f32.mrf.mxu1  ;;  %3614 = vmatmul.mubr.bf16.gmra.mxu0 %v3418_v63  ;;  %v3257_v63 = vadd.f32 %v3256_v39, %v6186_v34 }
 0x333   : > { %v3340_v35 = vadd.f32 %v3339_v26, %v3227_v8  ;;  %v3396_v14 = vmax.f32 %v3338_v11, 0.0 }
 0x334   : > { %v3343_v38 = vpop.f32.mrf.mxu1 }
 0x335   : > { %v3397_v49 = vmax.f32 %v3340_v35, 0.0  ;;  %v3420_v51 = vpack.c.bf16 %v3396_v14, %v3394_v16  ;;  %v3344_v28 = vadd.f32 %v3343_v38, %v3231_v57 }
 0x336   : > { %v3345_v41 = vpop.f32.mrf.mxu1 }
 0x337   : > { %v3421_v9 = vpack.c.bf16 %v3397_v49, %v3395_v20  ;;  %v3346_v36 = vadd.f32 %v3345_v41, %v3233_v7  ;;  %v3398_v52 = vmax.f32 %v3344_v28, 0.0  ;;  %v3266_v49 = vpop.f32.mrf.mxu0  ;;  %v3265_v41 = vadd.f32 %v3264_v45, %v6190_v2 }
 0x338   : > { %v3347_v46 = vpop.f32.mrf.mxu1 }
 0x339   : > { %v3348_v6 = vadd.f32 %v3347_v46, %v3235_v1  ;;  %3621 = vmatprep.mubr.bf16.mxu0 %v3421_v9  ;;  %v3399_v21 = vmax.f32 %v3346_v36, 0.0  ;;  %v3261_v1 = vadd.f32 %v3260_v23, %v6190_v2 }
 0x33a   : > { %v3349_v24 = vpop.f32.mrf.mxu1  ;;  %3622 = vmatmul.mubr.bf16.gmra.mxu0 %v3420_v51  ;;  %v3267_v51 = vadd.f32 %v3266_v49, %v6186_v34  ;;  %v6248_v34 = vld [vmem:[%s6393_s6] ss:$0 sm:$0xff] }
 0x33b   : > { %v3350_v15 = vadd.f32 %v3349_v24, %v3237_v27  ;;  %v3400_v4 = vmax.f32 %v3348_v6, 0.0 }
 0x33c   : > { %v3353_v43 = vpop.f32.mrf.mxu1 }
 0x33d   : > { %v3401_v25 = vmax.f32 %v3350_v15, 0.0  ;;  %v3422_v61 = vpack.c.bf16 %v3400_v4, %v3398_v52  ;;  %v3354_v0 = vadd.f32 %v3353_v43, %v3241_v13 }
 0x33e   : > { %v3355_v19 = vpop.f32.mrf.mxu1 }
 0x33f   : > { %v3423_v31 = vpack.c.bf16 %v3401_v25, %v3399_v21  ;;  %v3356_v60 = vadd.f32 %v3355_v19, %v3243_v42  ;;  %v3402_v58 = vmax.f32 %v3354_v0, 0.0 }
 0x340   : > { %v3357_v37 = vpop.f32.mrf.mxu1 }
 0x341   : > { %v3358_v32 = vadd.f32 %v3357_v37, %v3245_v5  ;;  %3629 = vmatprep.mubr.bf16.mxu1 %v3423_v31  ;;  %v3403_v56 = vmax.f32 %v3356_v60, 0.0 }
 0x342   : > { %v3359_v22 = vpop.f32.mrf.mxu1  ;;  %3630 = vmatmul.mubr.bf16.vlgmr.msra.gmra.mxu1 %v3422_v61 }
 0x343   : > { %v3360_v59 = vadd.f32 %v3359_v22, %v3247_v3  ;;  %v3404_v50 = vmax.f32 %v3358_v32, 0.0 }
 0x344   : > { %v3363_v10 = vpop.f32.mrf.mxu1 }
 0x345   : > { %v3405_v33 = vmax.f32 %v3360_v59, 0.0  ;;  %v3424_v30 = vpack.c.bf16 %v3404_v50, %v3402_v58  ;;  %v3364_v11 = vadd.f32 %v3363_v10, %v3251_v12 }
 0x346   : > { %v3365_v62 = vpop.f32.mrf.mxu1 }
 0x347   : > { %v3425_v47 = vpack.c.bf16 %v3405_v33, %v3403_v56  ;;  %v3366_v48 = vadd.f32 %v3365_v62, %v3253_v40  ;;  %v3406_v44 = vmax.f32 %v3364_v11, 0.0 }
 0x348   : > { %v3367_v29 = vpop.f32.mrf.mxu1 }
 0x349   : > { %v3368_v8 = vadd.f32 %v3367_v29, %v3255_v54  ;;  %3637 = vmatprep.mubr.bf16.mxu1 %v3425_v47  ;;  %v3407_v38 = vmax.f32 %v3366_v48, 0.0 }
 0x34a   : > { %v3369_v17 = vpop.f32.mrf.mxu1  ;;  %3638 = vmatmul.mubr.bf16.gmra.mxu1 %v3424_v30 }
 0x34b   : > { %v3370_v26 = vadd.f32 %v3369_v17, %v3257_v63  ;;  %v3408_v35 = vmax.f32 %v3368_v8, 0.0 }
 0x34c   : > { %v3373_v14 = vpop.f32.mrf.mxu1 }
 0x34d   : > { %v3409_v20 = vmax.f32 %v3370_v26, 0.0  ;;  %v3426_v9 = vpack.c.bf16 %v3408_v35, %v3406_v44  ;;  %v3374_v36 = vadd.f32 %v3373_v14, %v3261_v1 }
 0x34e   : > { %v3375_v16 = vpop.f32.mrf.mxu1 }
 0x34f   : > { %v3427_v7 = vpack.c.bf16 %v3409_v20, %v3407_v38  ;;  %v3376_v46 = vadd.f32 %v3375_v16, %v3263_v55  ;;  %v3410_v4 = vmax.f32 %v3374_v36, 0.0 }
 0x350   : > { %v3377_v57 = vpop.f32.mrf.mxu1 }
 0x351   : > { %v3378_v27 = vadd.f32 %v3377_v57, %v3265_v41  ;;  %3645 = vmatprep.mubr.bf16.mxu1 %v3427_v7  ;;  %v3411_v24 = vmax.f32 %v3376_v46, 0.0 }
 0x352   : > { %v3379_v6 = vpop.f32.mrf.mxu1  ;;  %3646 = vmatmul.mubr.bf16.gmra.mxu1 %v3426_v9 }
 0x353   : > { %v3380_v53 = vadd.f32 %v3379_v6, %v3267_v51  ;;  %v3412_v28 = vmax.f32 %v3378_v27, 0.0 }
 0x355   : > { %v3413_v15 = vmax.f32 %v3380_v53, 0.0  ;;  %v3428_v21 = vpack.c.bf16 %v3412_v28, %v3410_v4 }
 0x357   : > { %v3429_v43 = vpack.c.bf16 %v3413_v15, %v3411_v24 }
 0x359   : > { %3653 = vmatprep.mubr.bf16.mxu1 %v3429_v43 }
 0x35a   : > { %3654 = vmatmul.mubr.bf16.gmra.mxu1 %v3428_v21 }
 0x3e2   : > { %v4352_v2 = vpop.f32.mrf.mxu0 }
 0x3e4   : > { %v4353_v25 = vpop.f32.mrf.mxu0 }
 0x3e5   : > { %v4354_v39 = vadd.f32 %v4353_v25, %v4352_v2 }
 0x3e6   : > { %v4355_v52 = vpop.f32.mrf.mxu0 }
 0x3e7   : > { %v3600_v19 = vadd.f32 %v4354_v39, %v6248_v34 }
 0x3e8   : > { %v4356_v42 = vpop.f32.mrf.mxu0 }
 0x3e9   : > { %3662 = vst [vmem:[%s6251_s14] sm:$0xff] %v3600_v19  ;;  %v4357_v5 = vadd.f32 %v4356_v42, %v4355_v52 }
 0x3ea   : > { %v4358_v31 = vpop.f32.mrf.mxu0 }
 0x3eb   : > { %v3603_v13 = vadd.f32 %v4357_v5, %v6248_v34 }
 0x3ec   : > { %v4359_v61 = vpop.f32.mrf.mxu0 }
 0x3ed   : > { %3663 = vst [vmem:[%s6251_s14 + $0x8] sm:$0xff] %v3603_v13  ;;  %v4360_v37 = vadd.f32 %v4359_v61, %v4358_v31 }
 0x3ee   : > { %v4361_v3 = vpop.f32.mrf.mxu0 }
 0x3ef   : > { %v3608_v60 = vadd.f32 %v4360_v37, %v6248_v34 }
 0x3f0   : > { %v4362_v32 = vpop.f32.mrf.mxu0 }
 0x3f1   : > { %3664 = vst [vmem:[%s6251_s14 + $0x10] sm:$0xff] %v3608_v60  ;;  %v4363_v23 = vadd.f32 %v4362_v32, %v4361_v3 }
 0x3f2   : > { %v4364_v0 = vpop.f32.mrf.mxu0 }
 0x3f3   : > { %v3611_v22 = vadd.f32 %v4363_v23, %v6248_v34 }
 0x3f4   : > { %v4365_v59 = vpop.f32.mrf.mxu0 }
 0x3f5   : > { %3665 = vst [vmem:[%s6251_s14 + $0x18] sm:$0xff] %v3611_v22  ;;  %v4366_v50 = vadd.f32 %v4365_v59, %v4364_v0 }
 0x3f6   : > { %v4367_v10 = vpop.f32.mrf.mxu0 }
 0x3f7   : > { %v3616_v56 = vadd.f32 %v4366_v50, %v6248_v34 }
 0x3f8   : > { %v4368_v33 = vpop.f32.mrf.mxu0 }
 0x3f9   : > { %3666 = vst [vmem:[%s6251_s14 + $0x20] sm:$0xff] %v3616_v56  ;;  %v4369_v18 = vadd.f32 %v4368_v33, %v4367_v10 }
 0x3fa   : > { %v4370_v58 = vpop.f32.mrf.mxu0 }
 0x3fb   : > { %v3619_v62 = vadd.f32 %v4369_v18, %v6248_v34 }
 0x3fc   : > { %v4371_v40 = vpop.f32.mrf.mxu0 }
 0x3fd   : > { %3667 = vst [vmem:[%s6251_s14 + $0x28] sm:$0xff] %v3619_v62  ;;  %v4372_v54 = vadd.f32 %v4371_v40, %v4370_v58 }
 0x3fe   : > { %v4373_v47 = vpop.f32.mrf.mxu0 }
 0x3ff   : > { %v3624_v12 = vadd.f32 %v4372_v54, %v6248_v34 }
 0x400   : > { %v4374_v30 = vpop.f32.mrf.mxu0 }
 0x401   : > { %3668 = vst [vmem:[%s6251_s14 + $0x30] sm:$0xff] %v3624_v12  ;;  %v4375_v29 = vadd.f32 %v4374_v30, %v4373_v47 }
 0x402   : > { %v4376_v63 = vpop.f32.mrf.mxu1 }
 0x403   : > { %v3627_v48 = vadd.f32 %v4375_v29, %v6248_v34 }
 0x404   : > { %v4377_v8 = vpop.f32.mrf.mxu1 }
 0x405   : > { %3669 = vst [vmem:[%s6251_s14 + $0x38] sm:$0xff] %v3627_v48  ;;  %v4378_v45 = vadd.f32 %v4377_v8, %v4376_v63 }
 0x406   : > { %v4379_v11 = vpop.f32.mrf.mxu1 }
 0x407   : > { %v3632_v17 = vadd.f32 %v4378_v45, %v6248_v34 }
 0x408   : > { %v4380_v26 = vpop.f32.mrf.mxu1 }
 0x409   : > { %3670 = vst [vmem:[%s6251_s14 + $0x40] sm:$0xff] %v3632_v17  ;;  %v4381_v35 = vadd.f32 %v4380_v26, %v4379_v11 }
 0x40a   : > { %v4382_v14 = vpop.f32.mrf.mxu1 }
 0x40b   : > { %v3635_v38 = vadd.f32 %v4381_v35, %v6248_v34 }
 0x40c   : > { %v4383_v20 = vpop.f32.mrf.mxu1 }
 0x40d   : > { %3671 = vst [vmem:[%s6251_s14 + $0x48] sm:$0xff] %v3635_v38  ;;  %v4384_v49 = vadd.f32 %v4383_v20, %v4382_v14 }
 0x40e   : > { %v4385_v44 = vpop.f32.mrf.mxu1 }
 0x40f   : > { %v3640_v16 = vadd.f32 %v4384_v49, %v6248_v34 }
 0x410   : > { %v4386_v55 = vpop.f32.mrf.mxu1 }
 0x411   : > { %3672 = vst [vmem:[%s6251_s14 + $0x50] sm:$0xff] %v3640_v16  ;;  %v4387_v41 = vadd.f32 %v4386_v55, %v4385_v44 }
 0x412   : > { %v4388_v7 = vpop.f32.mrf.mxu1 }
 0x413   : > { %v3643_v1 = vadd.f32 %v4387_v41, %v6248_v34 }
 0x414   : > { %v4389_v9 = vpop.f32.mrf.mxu1 }
 0x415   : > { %3673 = vst [vmem:[%s6251_s14 + $0x58] sm:$0xff] %v3643_v1  ;;  %v4390_v57 = vadd.f32 %v4389_v9, %v4388_v7 }
 0x416   : > { %v4391_v51 = vpop.f32.mrf.mxu1 }
 0x417   : > { %v3648_v46 = vadd.f32 %v4390_v57, %v6248_v34 }
 0x418   : > { %v4392_v27 = vpop.f32.mrf.mxu1 }
 0x419   : > { %3674 = vst [vmem:[%s6251_s14 + $0x60] sm:$0xff] %v3648_v46  ;;  %v4393_v36 = vadd.f32 %v4392_v27, %v4391_v51 }
 0x41a   : > { %v4394_v6 = vpop.f32.mrf.mxu1 }
 0x41b   : > { %v3651_v53 = vadd.f32 %v4393_v36, %v6248_v34 }
 0x41c   : > { %v4395_v28 = vpop.f32.mrf.mxu1 }
 0x41d   : > { %3675 = vst [vmem:[%s6251_s14 + $0x68] sm:$0xff] %v3651_v53  ;;  %v4396_v24 = vadd.f32 %v4395_v28, %v4394_v6 }
 0x41e   : > { %v4397_v15 = vpop.f32.mrf.mxu1 }
 0x41f   : > { %v3656_v4 = vadd.f32 %v4396_v24, %v6248_v34 }
 0x420   : > { %v4398_v43 = vpop.f32.mrf.mxu1 }
 0x421   : > { %3676 = vst [vmem:[%s6251_s14 + $0x70] sm:$0xff] %v3656_v4  ;;  %v4399_v21 = vadd.f32 %v4398_v43, %v4397_v15  ;;  %3684 = sbr.rel (!%p6479_p6) target bundleno = 1103 (0x44f), region = 72 }
 0x423   : > { %v3659_v2 = vadd.f32 %v4399_v21, %v6248_v34 }
 0x425   : > { %3677 = vst [vmem:[%s6251_s14 + $0x78] sm:$0xff] %v3659_v2 }
 0x426   : > { %s6490_s21 = smov (!%p3687_p3, %s3686_s21), 16 }
 0x427   : > { %s4318_s17 = sshll.u32 %s6490_s21, 7 }
 0x428   : > { %p4321_p5 = scmp.eq.s32.totalorder %s4318_s17, 0 }
 0x429   : > { %s6297_s12 = sshrl.u32 (!%p4321_p5), %s6490_s21, 4 }
 0x42a   : > { %3695 = sbr.rel (%p4321_p5) target bundleno = 1103 (0x44f), region = 76  ;;  %p4322_p8 = scmp.le.s32.totalorder (!%p4321_p5), %s6297_s12, 0 }
 0x42f   : > { %3920 = sbr.rel (%p4322_p8) target bundleno = 1086 (0x43e), region = 158  ;;  %s6480_s28 = smov (!%p4322_p8), %s6291_s8 }
 0x430   : > { %s6481_s15 = smov (!%p4322_p8), %s6251_s14  ;;  %s6306_s19 = smov (!%p4322_p8), 0  }
 0x431   : > { %s6308_s27 = smov (!%p4322_p8), 0  }
 0x434 LB: >> { %v3788_v34 = vld [vmem:[%s5184_s15] sm:$0xff]  ;;  %v3790_v25 = vld [vmem:[%s5184_s15 + $0x8] sm:$0xff]  ;;  %v3792_v39 = vld [vmem:[%s5184_s15 + $0x10] sm:$0xff]  ;;  %s3820_s20 = sadd.s32 1, %s5188_s19  ;;  %s3782_s27 = sadd.s32 1, %s5192_s27   ;;  %s5192_s27 = sphi %s6308_s27, %s3782_s27   ;;  %s5188_s19 = sphi %s6306_s19, %s6482_s19   ;;  %s5184_s15 = sphi %s6481_s15, %s3825_s15   ;;  %s5180_s28 = sphi %s6480_s28, %s3826_s28  }
 0x435   : >> { %3789 = vst [vmem:[%s5180_s28] sm:$0xff] %v3788_v34  ;;  %3791 = vst [vmem:[%s5180_s28 + $0x8] sm:$0xff] %v3790_v25  ;;  %v3794_v52 = vld [vmem:[%s5184_s15 + $0x18] sm:$0xff]  ;;  %v3796_v19 = vld [vmem:[%s5184_s15 + $0x20] sm:$0xff]  ;;  %p3821_p10 = scmp.ge.s32.totalorder %s3820_s20, %s6297_s12  ;;  %p3781_p7 = scmp.ge.s32.totalorder %s3782_s27, %s6297_s12 }
 0x436   : >> { %3793 = vst [vmem:[%s5180_s28 + $0x10] sm:$0xff] %v3792_v39  ;;  %v3798_v42 = vld [vmem:[%s5184_s15 + $0x28] sm:$0xff]  ;;  %3795 = vst [vmem:[%s5180_s28 + $0x18] sm:$0xff] %v3794_v52  ;;  %v3800_v5 = vld [vmem:[%s5184_s15 + $0x30] sm:$0xff] }
 0x437   : >> { %3797 = vst [vmem:[%s5180_s28 + $0x20] sm:$0xff] %v3796_v19  ;;  %3799 = vst [vmem:[%s5180_s28 + $0x28] sm:$0xff] %v3798_v42  ;;  %v3802_v31 = vld [vmem:[%s5184_s15 + $0x38] sm:$0xff]  ;;  %v3804_v13 = vld [vmem:[%s5184_s15 + $0x40] sm:$0xff]  ;;  %s6492_s20 = smov (%p3821_p10, %s3820_s20), 0 }
 0x438   : >> { %3801 = vst [vmem:[%s5180_s28 + $0x30] sm:$0xff] %v3800_v5  ;;  %3803 = vst [vmem:[%s5180_s28 + $0x38] sm:$0xff] %v3802_v31  ;;  %v3806_v61 = vld [vmem:[%s5184_s15 + $0x48] sm:$0xff]  ;;  %v3808_v37 = vld [vmem:[%s5184_s15 + $0x50] sm:$0xff]  ;;  %s4323_s11 = sshll.u32 %s6492_s20, 7  ;;  %s6482_s19 = smov %s6492_s20 }
 0x439   : >> { %3805 = vst [vmem:[%s5180_s28 + $0x40] sm:$0xff] %v3804_v13  ;;  %v3810_v3 = vld [vmem:[%s5184_s15 + $0x58] sm:$0xff]  ;;  %3807 = vst [vmem:[%s5180_s28 + $0x48] sm:$0xff] %v3806_v61  ;;  %v3812_v60 = vld [vmem:[%s5184_s15 + $0x60] sm:$0xff]  ;;  %3784 = sbr.rel (!%p3781_p7) target bundleno = 1076 (0x434), region = 164 }
 0x43a   : >> { %3809 = vst [vmem:[%s5180_s28 + $0x50] sm:$0xff] %v3808_v37  ;;  %3811 = vst [vmem:[%s5180_s28 + $0x58] sm:$0xff] %v3810_v3  ;;  %v3814_v32 = vld [vmem:[%s5184_s15 + $0x68] sm:$0xff]  ;;  %v3816_v23 = vld [vmem:[%s5184_s15 + $0x70] sm:$0xff] }
 0x43b   : >> { %3813 = vst [vmem:[%s5180_s28 + $0x60] sm:$0xff] %v3812_v60  ;;  %3815 = vst [vmem:[%s5180_s28 + $0x68] sm:$0xff] %v3814_v32  ;;  %v3818_v0 = vld [vmem:[%s5184_s15 + $0x78] sm:$0xff]  ;;  %s3825_s15 = scalar_lea.vmem %s6251_s14, %s4323_s11 [#allocation10]  }
 0x43c   : >> { %3817 = vst [vmem:[%s5180_s28 + $0x70] sm:$0xff] %v3816_v23  ;;  %3819 = vst [vmem:[%s5180_s28 + $0x78] sm:$0xff] %v3818_v0  ;;  %s3826_s28 = scalar_lea.vmem %s6291_s8, %s4323_s11  }
 0x43e PF: > { %s6366_s13 = sand.u32 15, %s6490_s21   ;;  %s4334_s18 = sshll.u32 %s6297_s12, 7 }
 0x43f   : > { %s3831_s23 = scalar_lea.vmem %s6251_s14, %s4334_s18 [#allocation10]   ;;  %s3833_s24 = scalar_lea.vmem %s6291_s8, %s4334_s18  }
 0x440   : > { %p4328_p4 = scmp.le.s32.totalorder %s6366_s13, 0 }
 0x441   : > { %s5194_s22 = smov (!%p4328_p4), %s3833_s24   ;;  %s5198_s16 = smov (!%p4328_p4), %s3831_s23  }
 0x442   : > { %3934 = sbr.rel (%p4328_p4) target bundleno = 1103 (0x44f), region = 169  ;;  %s5202_s10 = smov (!%p4328_p4), 0  }
 0x443   : > { %s5206_s30 = smov (!%p4328_p4), 0  }
 0x447 LB: >> { %v3843_v22 = vld [vmem:[%s5200_s16] sm:$0xff]  ;;  %s3845_s21 = sadd.s32 1, %s5204_s10  ;;  %s3837_s30 = sadd.s32 1, %s5208_s30   ;;  %s5208_s30 = sphi %s5206_s30, %s3837_s30   ;;  %s5204_s10 = sphi %s5202_s10, %s5203_s10   ;;  %s5200_s16 = sphi %s5198_s16, %s3850_s16   ;;  %s5196_s22 = sphi %s5194_s22, %s3851_s22  }
 0x448   : >> { %3844 = vst [vmem:[%s5196_s22] sm:$0xff] %v3843_v22  ;;  %p3846_p13 = scmp.ge.s32.totalorder %s3845_s21, %s6366_s13  ;;  %p3836_p0 = scmp.ge.s32.totalorder %s3837_s30, %s6366_s13 }
 0x44a   : >> { %s6494_s21 = smov (%p3846_p13, %s3845_s21), 0  ;;  %3839 = sbr.rel (!%p3836_p0) target bundleno = 1095 (0x447), region = 175 }
 0x44b   : >> { %s4329_s14 = sshll.u32 %s6494_s21, 3  ;;  %s5203_s10 = smov %s6494_s21  }
 0x44c   : >> { %s3850_s16 = scalar_lea.vmem %s3831_s23, %s4329_s14 [#allocation10]   ;;  %s3851_s22 = scalar_lea.vmem %s3833_s24, %s4329_s14  }
 0x44f PF: > { %p19_p9 = scmp.ge.s32.totalorder %s5286_s29, 4   ;;  %s6483_s24 = smov %s5168_s25 }
 0x450   : > { %s6484_s25 = smov %s5172_s26  ;;  %s6485_s26 = smov %s5296_s9 }
 0x451   : > { %s6486_s27 = smov %s5286_s29  ;;  %21 = sbr.rel (!%p19_p9) target bundleno = 5 (0x5), region = 186 }
 0x456   :  { %3867 = vsyncpa [#allocation3], 1 }
 0x457   :  { %3869 = vsyncpa [#allocation3 + $0x1], 1 }
 0x458   :  { %3870 = vsyncpa [#allocation5], 1 }
 0x459   :  { %3871 = vsyncpa [#allocation8], 1 }

</bundles_post_ra>
